<compile_context>
chip_gen: v6e
topology: v6e:2x2x1
jax: 0.10.0
libtpu: 0.0.40
codegen_flags: <defaults>
</compile_context>

<pallas_src>
import functools

import jax
import jax.numpy as jnp
from jax.experimental import pallas as pl
from jax.experimental.pallas import tpu as pltpu


def _inter_modality_kernel(
    v_ref, q_ref,
    vmask_col_ref, vmask_row_ref, qmask_col_ref, qmask_row_ref,
    wv_ref, bv_ref, wq_ref, bq_ref,
    wvo_a_ref, wvo_b_ref, bvo_ref,
    wqo_a_ref, wqo_b_ref, bqo_ref,
    out_v_ref, out_q_ref,
    vupd_ref, qupd_ref,
    *, num_head: int, output_size: int,
):
    # One grid step == one block of batch elements.
    Bb, N, Dv = v_ref.shape          # N, L are padded to multiples of 8 on host
    _, L, Dq = q_ref.shape
    out = output_size
    hd = out // num_head

    v_flat = v_ref[...].reshape(Bb * N, Dv)          # bf16, free sublane merge
    q_flat = q_ref[...].reshape(Bb * L, Dq)

    # ---- fused input projections over the whole batch block (bf16 -> f32 acc)
    v_trans = jnp.dot(jnp.maximum(v_flat, 0.0), wv_ref[...],
                      preferred_element_type=jnp.float32) + bv_ref[...]
    q_trans = jnp.dot(jnp.maximum(q_flat, 0.0), wq_ref[...],
                      preferred_element_type=jnp.float32) + bq_ref[...]

    # mask padded tokens, reshape back to [Bb, seq, 3*out], single bf16 cast.
    v_tr = (v_trans.reshape(Bb, N, 3 * out) * vmask_col_ref[...]).astype(jnp.bfloat16)
    q_tr = (q_trans.reshape(Bb, L, 3 * out) * qmask_col_ref[...]).astype(jnp.bfloat16)

    # key-padding masks, broadcast once (hoisted out of the head loop).
    q_pad = jnp.broadcast_to(qmask_row_ref[...], (Bb, N, L)) == 0.0   # [Bb, N, L]
    v_pad = jnp.broadcast_to(vmask_row_ref[...], (Bb, L, N)) == 0.0   # [Bb, L, N]

    # ---- per-head cross-modal attention.  1/sqrt(hd) is already folded into
    # the "query" weight columns on the host, so scores come out pre-scaled.
    # Heads write straight into VMEM slabs (no concatenates).
    for h in range(num_head):
        s0 = h * hd
        vk_h = v_tr[:, :, s0:s0 + hd]                        # [Bb, N, hd]
        vq_h = v_tr[:, :, out + s0:out + s0 + hd]
        vv_h = v_tr[:, :, 2 * out + s0:2 * out + s0 + hd]
        qk_h = q_tr[:, :, s0:s0 + hd]                        # [Bb, L, hd]
        qq_h = q_tr[:, :, out + s0:out + s0 + hd]
        qv_h = q_tr[:, :, 2 * out + s0:2 * out + s0 + hd]

        # q -> v attention: scores [Bb, N, L], softmax over question tokens.
        s_q2v = jnp.einsum('bnd,bld->bnl', vq_h, qk_h,
                           preferred_element_type=jnp.float32)
        s_q2v = jnp.where(q_pad, -1e9, s_q2v)
        s_q2v = s_q2v - jnp.max(s_q2v, axis=-1, keepdims=True)
        e_q2v = jnp.exp(s_q2v)
        p_q2v = (e_q2v * pl.reciprocal(jnp.sum(e_q2v, axis=-1, keepdims=True),
                                       approx=True)).astype(jnp.bfloat16)
        vupd_ref[:, :, s0:s0 + hd] = jnp.einsum(
            'bnl,bld->bnd', p_q2v, qv_h,
            preferred_element_type=jnp.float32).astype(jnp.bfloat16)

        # v -> q attention: scores [Bb, L, N], softmax over visual objects.
        s_v2q = jnp.einsum('bld,bnd->bln', qq_h, vk_h,
                           preferred_element_type=jnp.float32)
        s_v2q = jnp.where(v_pad, -1e9, s_v2q)
        s_v2q = s_v2q - jnp.max(s_v2q, axis=-1, keepdims=True)
        e_v2q = jnp.exp(s_v2q)
        p_v2q = (e_v2q * pl.reciprocal(jnp.sum(e_v2q, axis=-1, keepdims=True),
                                       approx=True)).astype(jnp.bfloat16)
        qupd_ref[:, :, s0:s0 + hd] = jnp.einsum(
            'bln,bnd->bld', p_v2q, vv_h,
            preferred_element_type=jnp.float32).astype(jnp.bfloat16)

    # ---- concat-free output projections:  cat([x, upd]) @ W == x@W_a + upd@W_b
    v_upd16 = vupd_ref[...].reshape(Bb * N, out)
    q_upd16 = qupd_ref[...].reshape(Bb * L, out)

    upd_v = (jnp.dot(v_flat, wvo_a_ref[...], preferred_element_type=jnp.float32)
             + jnp.dot(v_upd16, wvo_b_ref[...], preferred_element_type=jnp.float32)
             + bvo_ref[...])
    upd_q = (jnp.dot(q_flat, wqo_a_ref[...], preferred_element_type=jnp.float32)
             + jnp.dot(q_upd16, wqo_b_ref[...], preferred_element_type=jnp.float32)
             + bqo_ref[...])

    out_pad = out_v_ref.shape[-1]                    # lane-dense (multiple of 128)
    out_v_ref[...] = upd_v.reshape(Bb, N, out_pad).astype(out_v_ref.dtype)
    out_q_ref[...] = upd_q.reshape(Bb, L, out_pad).astype(out_q_ref.dtype)


def _round_up(x, m):
    return ((x + m - 1) // m) * m


def _vmem_bytes_estimate(block_b, Np, Lp, Dv, Dq, out, out_pad, weight_bytes):
    """Rough per-grid-step VMEM estimate (weights + pipelined blocks + live temps)."""
    toks = block_b * (Np + Lp)
    inputs = 2 * 2 * block_b * (Np * Dv + Lp * Dq)            # bf16, double-buffered
    masks = 2 * 4 * 2 * block_b * (Np + Lp)                   # f32, two layouts
    outputs = 2 * 4 * block_b * (Np + Lp) * out_pad           # f32, double-buffered
    slabs = 2 * toks * out                                    # bf16 update scratch
    interm = 6 * toks * 3 * out + 4 * toks * out_pad + 16 * block_b * Np * Lp
    return weight_bytes + inputs + masks + outputs + slabs + (3 * interm) // 2


def _pick_block_b(batch, vmem_for_block, budget_bytes, max_block=32):
    """Largest divisor of `batch` that fits the VMEM budget; prefer an even grid
    length (both v7x TensorCores busy), then any multi-step grid, then anything."""
    divisors = [d for d in range(1, batch + 1) if batch % d == 0]
    for pref in ("even", "multi", "any"):
        best = None
        for d in divisors:
            if d > max_block or vmem_for_block(d) > budget_bytes:
                continue
            g = batch // d
            if pref == "even" and (g < 2 or g % 2 != 0):
                continue
            if pref == "multi" and g < 2:
                continue
            if best is None or d > best:
                best = d
        if best is not None:
            return best
    return 1


def inter_modality_update(v, q, v_mask, q_mask, params, *,
                          num_head, output_size, block_b=None,
                          vmem_budget_bytes=56 * 1024 * 1024):
    B, N, Dv = v.shape
    _, L, Dq = q.shape
    assert output_size % num_head == 0
    hd = output_size // num_head
    wv, bv, wq, bq, wvo, bvo, wqo, bqo = params

    # ---- host-side prep ------------------------------------------------------
    # (1) pad sequence dims to multiples of 8 (free sublane-aligned reshapes);
    #     masks are zero-extended so padded rows are inert, rows dropped below.
    Np, Lp = _round_up(N, 8), _round_up(L, 8)
    if Np != N:
        v = jnp.pad(v, ((0, 0), (0, Np - N), (0, 0)))
        v_mask = jnp.pad(v_mask, ((0, 0), (0, Np - N)))
    if Lp != L:
        q = jnp.pad(q, ((0, 0), (0, Lp - L), (0, 0)))
        q_mask = jnp.pad(q_mask, ((0, 0), (0, Lp - L)))

    # (2) bf16 activations (every in-kernel consumer is bf16).
    v16 = v.astype(jnp.bfloat16)
    q16 = q.astype(jnp.bfloat16)

    # (3) masks in both broadcast layouts (keeps BlockSpecs legal for any block_b).
    v_mask = v_mask.astype(jnp.float32)
    q_mask = q_mask.astype(jnp.float32)
    vmask_col, vmask_row = v_mask[:, :, None], v_mask[:, None, :]
    qmask_col, qmask_row = q_mask[:, :, None], q_mask[:, None, :]

    # (4) fold 1/sqrt(head_dim) into the "query" third of the input projections.
    inv_sqrt_hd = 1.0 / float(hd) ** 0.5
    sec = slice(output_size, 2 * output_size)
    wv = wv.at[:, sec].multiply(inv_sqrt_hd)
    bv = bv.at[sec].multiply(inv_sqrt_hd)
    wq = wq.at[:, sec].multiply(inv_sqrt_hd)
    bq = bq.at[sec].multiply(inv_sqrt_hd)

    # (5) lane-pad the output-projection columns to a multiple of 128 and split
    #     the rows into "original feature" and "attention update" parts.
    out_pad = _round_up(output_size, 128)
    padc = out_pad - output_size
    pad_cols = (lambda w: jnp.pad(w, ((0, 0), (0, padc)))) if padc else (lambda w: w)
    pad_vec = (lambda b: jnp.pad(b, (0, padc))) if padc else (lambda b: b)

    wv16 = wv.astype(jnp.bfloat16)
    wq16 = wq.astype(jnp.bfloat16)
    wvo_a = pad_cols(wvo[:Dv]).astype(jnp.bfloat16)          # original v rows
    wvo_b = pad_cols(wvo[Dv:]).astype(jnp.bfloat16)          # v_update rows
    wqo_a = pad_cols(wqo[:Dq]).astype(jnp.bfloat16)
    wqo_b = pad_cols(wqo[Dq:]).astype(jnp.bfloat16)
    bv2, bq2 = bv.reshape(1, -1), bq.reshape(1, -1)
    bvo2, bqo2 = pad_vec(bvo).reshape(1, -1), pad_vec(bqo).reshape(1, -1)

    weight_bytes = 2 * ((Dv + Dq) * 3 * output_size                      # wv, wq
                        + (Dv + Dq + 2 * output_size) * out_pad)         # wvo/wqo
    weight_bytes += 4 * (2 * 3 * output_size + 2 * out_pad)              # biases

    vmem_for_block = lambda d: _vmem_bytes_estimate(
        d, Np, Lp, Dv, Dq, output_size, out_pad, weight_bytes)
    if block_b is None:
        block_b = _pick_block_b(B, vmem_for_block, vmem_budget_bytes)
    assert B % block_b == 0
    grid_b = B // block_b
    vmem_limit = int(min(max(vmem_for_block(block_b) + (4 << 20), 32 << 20), 96 << 20))

    cost = pl.CostEstimate(
        flops=int(2 * B * (Np * Dv + Lp * Dq) * 3 * output_size
                  + 8 * B * Np * Lp * output_size
                  + 2 * B * (Np * (Dv + output_size)
                             + Lp * (Dq + output_size)) * out_pad),
        transcendentals=int(2 * B * num_head * Np * Lp),
        bytes_accessed=int(2 * B * (Np * Dv + Lp * Dq)
                           + 16 * B * (Np + Lp)
                           + weight_bytes
                           + 4 * B * (Np + Lp) * out_pad),
    )

    kernel = functools.partial(
        _inter_modality_kernel, num_head=num_head, output_size=output_size)

    def run(single_buffer_weights):
        if single_buffer_weights:
            # Constant index_map => weights never re-DMA; single-buffering halves
            # their VMEM residency (important on v7x's 64 MiB).
            def w_spec(rows, cols):
                return pl.BlockSpec((rows, cols), lambda b: (0, 0),
                                    pipeline_mode=pl.Buffered(1))
        else:
            def w_spec(rows, cols):
                return pl.BlockSpec((rows, cols), lambda b: (0, 0))

        return pl.pallas_call(
            kernel,
            out_shape=(
                jax.ShapeDtypeStruct((B, Np, out_pad), jnp.float32),
                jax.ShapeDtypeStruct((B, Lp, out_pad), jnp.float32),
            ),
            grid=(grid_b,),
            in_specs=[
                pl.BlockSpec((block_b, Np, Dv), lambda b: (b, 0, 0)),   # v (bf16)
                pl.BlockSpec((block_b, Lp, Dq), lambda b: (b, 0, 0)),   # q (bf16)
                pl.BlockSpec((block_b, Np, 1), lambda b: (b, 0, 0)),    # v_mask col
                pl.BlockSpec((block_b, 1, Np), lambda b: (b, 0, 0)),    # v_mask row
                pl.BlockSpec((block_b, Lp, 1), lambda b: (b, 0, 0)),    # q_mask col
                pl.BlockSpec((block_b, 1, Lp), lambda b: (b, 0, 0)),    # q_mask row
                w_spec(Dv, 3 * output_size),                            # wv
                w_spec(1, 3 * output_size),                             # bv
                w_spec(Dq, 3 * output_size),                            # wq
                w_spec(1, 3 * output_size),                             # bq
                w_spec(Dv, out_pad),                                    # wvo (v rows)
                w_spec(output_size, out_pad),                           # wvo (upd rows)
                w_spec(1, out_pad),                                     # bvo
                w_spec(Dq, out_pad),                                    # wqo (q rows)
                w_spec(output_size, out_pad),                           # wqo (upd rows)
                w_spec(1, out_pad),                                     # bqo
            ],
            out_specs=(
                pl.BlockSpec((block_b, Np, out_pad), lambda b: (b, 0, 0)),
                pl.BlockSpec((block_b, Lp, out_pad), lambda b: (b, 0, 0)),
            ),
            scratch_shapes=[
                pltpu.VMEM((block_b, Np, output_size), jnp.bfloat16),   # v_update slab
                pltpu.VMEM((block_b, Lp, output_size), jnp.bfloat16),   # q_update slab
            ],
            compiler_params=pltpu.CompilerParams(
                dimension_semantics=("parallel",),
                vmem_limit_bytes=vmem_limit,
            ),
            cost_estimate=cost,
        )(v16, q16, vmask_col, vmask_row, qmask_col, qmask_row,
          wv16, bv2, wq16, bq2, wvo_a, wvo_b, bvo2, wqo_a, wqo_b, bqo2)

    try:
        out_v, out_q = run(single_buffer_weights=True)
    except Exception:
        # Fallback for Pallas versions without pipeline_mode / Buffered(1) support.
        out_v, out_q = run(single_buffer_weights=False)

    return out_v[:, :N, :output_size], out_q[:, :L, :output_size]


def _reference(v, q, v_mask, q_mask, params, *, num_head, output_size):
    """Pure-JAX f32 mirror of the PyTorch forward (for sanity checking)."""
    wv, bv, wq, bq, wvo, bvo, wqo, bqo = params
    v_trans = jnp.maximum(v, 0.0) @ wv + bv
    q_trans = jnp.maximum(q, 0.0) @ wq + bq
    v_trans = v_trans * v_mask[..., None]
    q_trans = q_trans * q_mask[..., None]
    o = output_size
    v_k, v_q, v_v = v_trans[..., :o], v_trans[..., o:2 * o], v_trans[..., 2 * o:]
    q_k, q_q, q_v = q_trans[..., :o], q_trans[..., o:2 * o], q_trans[..., 2 * o:]
    hd = o // num_head
    v_upds, q_upds = [], []
    for i in range(num_head):
        sl = slice(i * hd, (i + 1) * hd)
        q2v = jnp.einsum("bnd,bld->bnl", v_q[..., sl], q_k[..., sl])
        q2v = jnp.where(q_mask[:, None, :] == 0, -1e9, q2v) / (hd ** 0.5)
        v2q = jnp.einsum("bld,bnd->bln", q_q[..., sl], v_k[..., sl])
        v2q = jnp.where(v_mask[:, None, :] == 0, -1e9, v2q) / (hd ** 0.5)
        v_upds.append(jax.nn.softmax(q2v, axis=2) @ q_v[..., sl])
        q_upds.append(jax.nn.softmax(v2q, axis=2) @ v_v[..., sl])
    v_update = jnp.concatenate(v_upds, axis=2)
    q_update = jnp.concatenate(q_upds, axis=2)
    upd_v = jnp.concatenate([v, v_update], axis=2) @ wvo + bvo
    upd_q = jnp.concatenate([q, q_update], axis=2) @ wqo + bqo
    return upd_v, upd_q


if __name__ == "__main__":
    # Small, module-consistent shapes; N/L deliberately not multiples of 8 so the
    # host padding path is exercised.
    B, N, L = 2, 12, 10                 # batch, num_obj, max_len
    v_size, q_size, output_size, num_head = 32, 32, 32, 4

    key = jax.random.PRNGKey(0)
    keys = jax.random.split(key, 10)

    v = jax.random.normal(keys[0], (B, N, v_size), jnp.float32)
    q = jax.random.normal(keys[1], (B, L, q_size), jnp.float32)
    # deterministic masks with some padding inside the un-padded region
    v_mask = (jnp.arange(N)[None, :] < jnp.array([[N], [N - 4]])).astype(jnp.float32)
    q_mask = (jnp.arange(L)[None, :] < jnp.array([[L], [L - 3]])).astype(jnp.float32)

    def lin(kw, kb, fan_in, fan_out):
        bound = 1.0 / (fan_in ** 0.5)
        w = jax.random.uniform(kw, (fan_in, fan_out), jnp.float32, -bound, bound)
        b = jax.random.uniform(kb, (fan_out,), jnp.float32, -bound, bound)
        return w, b

    wv, bv = lin(keys[2], keys[3], v_size, output_size * 3)
    wq, bq = lin(keys[4], keys[5], q_size, output_size * 3)
    wvo, bvo = lin(keys[6], keys[7], v_size + output_size, output_size)
    wqo, bqo = lin(keys[8], keys[9], q_size + output_size, output_size)
    params = (wv, bv, wq, bq, wvo, bvo, wqo, bqo)

    out_v, out_q = inter_modality_update(
        v, q, v_mask, q_mask, params, num_head=num_head, output_size=output_size)
    jax.block_until_ready((out_v, out_q))

    ref_v, ref_q = _reference(
        v, q, v_mask, q_mask, params, num_head=num_head, output_size=output_size)
    assert out_v.shape == ref_v.shape and out_q.shape == ref_q.shape
    # bf16 matmul operands + approx reciprocal -> looser tolerance than pure-f32.
    assert jnp.allclose(out_v, ref_v, atol=5e-2, rtol=5e-2), "v output mismatch"
    assert jnp.allclose(out_q, ref_q, atol=5e-2, rtol=5e-2), "q output mismatch"

    print("KERNEL_OK")
</pallas_src>

<mosaic_0001>
module attributes {stable_mosaic.version = 11 : i64} {
  func.func @_inter_modality_kernel(%arg0: i32, %arg1: memref<1x16x32xbf16, #tpu.memory_space<vmem>>, %arg2: memref<1x16x32xbf16, #tpu.memory_space<vmem>>, %arg3: memref<1x16x1xf32, #tpu.memory_space<vmem>>, %arg4: memref<1x1x16xf32, #tpu.memory_space<vmem>>, %arg5: memref<1x16x1xf32, #tpu.memory_space<vmem>>, %arg6: memref<1x1x16xf32, #tpu.memory_space<vmem>>, %arg7: memref<32x96xbf16, #tpu.memory_space<vmem>>, %arg8: memref<1x96xf32, #tpu.memory_space<vmem>>, %arg9: memref<32x96xbf16, #tpu.memory_space<vmem>>, %arg10: memref<1x96xf32, #tpu.memory_space<vmem>>, %arg11: memref<32x128xbf16, #tpu.memory_space<vmem>>, %arg12: memref<32x128xbf16, #tpu.memory_space<vmem>>, %arg13: memref<1x128xf32, #tpu.memory_space<vmem>>, %arg14: memref<32x128xbf16, #tpu.memory_space<vmem>>, %arg15: memref<32x128xbf16, #tpu.memory_space<vmem>>, %arg16: memref<1x128xf32, #tpu.memory_space<vmem>>, %arg17: memref<1x16x128xf32, #tpu.memory_space<vmem>>, %arg18: memref<1x16x128xf32, #tpu.memory_space<vmem>>, %arg19: memref<1x16x32xbf16, #tpu.memory_space<vmem>>, %arg20: memref<1x16x32xbf16, #tpu.memory_space<vmem>>) attributes {dimension_semantics = [#tpu.dimension_semantics<parallel>], iteration_bounds = array<i64: 2>, scalar_prefetch = 0 : i64, scratch_operands = 2 : i64, tpu.core_type = #tpu.core_type<tc>, window_params = [{transform_indices = @transform_0, window_bounds = array<i64: 1, 16, 32>}, {transform_indices = @transform_1, window_bounds = array<i64: 1, 16, 32>}, {transform_indices = @transform_2, window_bounds = array<i64: 1, 16, 1>}, {transform_indices = @transform_3, window_bounds = array<i64: 1, 1, 16>}, {transform_indices = @transform_4, window_bounds = array<i64: 1, 16, 1>}, {transform_indices = @transform_5, window_bounds = array<i64: 1, 1, 16>}, {pipeline_mode = #tpu.pipeline_mode<synchronous>, transform_indices = @transform_6, window_bounds = array<i64: 32, 96>}, {pipeline_mode = #tpu.pipeline_mode<synchronous>, transform_indices = @transform_7, window_bounds = array<i64: 1, 96>}, {pipeline_mode = #tpu.pipeline_mode<synchronous>, transform_indices = @transform_8, window_bounds = array<i64: 32, 96>}, {pipeline_mode = #tpu.pipeline_mode<synchronous>, transform_indices = @transform_9, window_bounds = array<i64: 1, 96>}, {pipeline_mode = #tpu.pipeline_mode<synchronous>, transform_indices = @transform_10, window_bounds = array<i64: 32, 128>}, {pipeline_mode = #tpu.pipeline_mode<synchronous>, transform_indices = @transform_11, window_bounds = array<i64: 32, 128>}, {pipeline_mode = #tpu.pipeline_mode<synchronous>, transform_indices = @transform_12, window_bounds = array<i64: 1, 128>}, {pipeline_mode = #tpu.pipeline_mode<synchronous>, transform_indices = @transform_13, window_bounds = array<i64: 32, 128>}, {pipeline_mode = #tpu.pipeline_mode<synchronous>, transform_indices = @transform_14, window_bounds = array<i64: 32, 128>}, {pipeline_mode = #tpu.pipeline_mode<synchronous>, transform_indices = @transform_15, window_bounds = array<i64: 1, 128>}, {transform_indices = @transform_16, window_bounds = array<i64: 1, 16, 128>}, {transform_indices = @transform_17, window_bounds = array<i64: 1, 16, 128>}]} {
    %c0 = arith.constant 0 : index
    %c0_0 = arith.constant 0 : index
    %c0_1 = arith.constant 0 : index
    %0 = vector.load %arg1[%c0, %c0_0, %c0_1] : memref<1x16x32xbf16, #tpu.memory_space<vmem>>, vector<1x16x32xbf16>
    %1 = vector.shape_cast %0 : vector<1x16x32xbf16> to vector<16x32xbf16>
    %c0_2 = arith.constant 0 : index
    %c0_3 = arith.constant 0 : index
    %c0_4 = arith.constant 0 : index
    %2 = vector.load %arg2[%c0_2, %c0_3, %c0_4] : memref<1x16x32xbf16, #tpu.memory_space<vmem>>, vector<1x16x32xbf16>
    %3 = vector.shape_cast %2 : vector<1x16x32xbf16> to vector<16x32xbf16>
    %cst = arith.constant 0.000000e+00 : bf16
    %4 = vector.broadcast %cst : bf16 to vector<16x32xbf16>
    %5 = arith.maximumf %1, %4 : vector<16x32xbf16>
    %c0_5 = arith.constant 0 : index
    %c0_6 = arith.constant 0 : index
    %6 = vector.load %arg7[%c0_5, %c0_6] : memref<32x96xbf16, #tpu.memory_space<vmem>>, vector<32x96xbf16>
    %cst_7 = arith.constant dense<0.000000e+00> : vector<16x96xf32>
    %7 = tpu.matmul %5, %6, %cst_7 {dimension_numbers = #tpu.dot_dimension_numbers<[1], [0], [0], [1], [0, 0, 1, 1], [], []>} : vector<16x32xbf16>, vector<32x96xbf16>, vector<16x96xf32> -> vector<16x96xf32>
    %c0_8 = arith.constant 0 : index
    %c0_9 = arith.constant 0 : index
    %8 = vector.load %arg8[%c0_8, %c0_9] : memref<1x96xf32, #tpu.memory_space<vmem>>, vector<1x96xf32>
    %9 = vector.broadcast %8 : vector<1x96xf32> to vector<16x96xf32>
    %10 = arith.addf %7, %9 : vector<16x96xf32>
    %cst_10 = arith.constant 0.000000e+00 : bf16
    %11 = vector.broadcast %cst_10 : bf16 to vector<16x32xbf16>
    %12 = arith.maximumf %3, %11 : vector<16x32xbf16>
    %c0_11 = arith.constant 0 : index
    %c0_12 = arith.constant 0 : index
    %13 = vector.load %arg9[%c0_11, %c0_12] : memref<32x96xbf16, #tpu.memory_space<vmem>>, vector<32x96xbf16>
    %cst_13 = arith.constant dense<0.000000e+00> : vector<16x96xf32>
    %14 = tpu.matmul %12, %13, %cst_13 {dimension_numbers = #tpu.dot_dimension_numbers<[1], [0], [0], [1], [0, 0, 1, 1], [], []>} : vector<16x32xbf16>, vector<32x96xbf16>, vector<16x96xf32> -> vector<16x96xf32>
    %c0_14 = arith.constant 0 : index
    %c0_15 = arith.constant 0 : index
    %15 = vector.load %arg10[%c0_14, %c0_15] : memref<1x96xf32, #tpu.memory_space<vmem>>, vector<1x96xf32>
    %16 = vector.broadcast %15 : vector<1x96xf32> to vector<16x96xf32>
    %17 = arith.addf %14, %16 : vector<16x96xf32>
    %18 = vector.shape_cast %10 : vector<16x96xf32> to vector<1x16x96xf32>
    %c0_16 = arith.constant 0 : index
    %c0_17 = arith.constant 0 : index
    %c0_18 = arith.constant 0 : index
    %19 = vector.load %arg3[%c0_16, %c0_17, %c0_18] : memref<1x16x1xf32, #tpu.memory_space<vmem>>, vector<1x16x1xf32>
    %20 = vector.broadcast %19 : vector<1x16x1xf32> to vector<1x16x96xf32>
    %21 = arith.mulf %18, %20 : vector<1x16x96xf32>
    %22 = arith.truncf %21 : vector<1x16x96xf32> to vector<1x16x96xbf16>
    %23 = vector.shape_cast %17 : vector<16x96xf32> to vector<1x16x96xf32>
    %c0_19 = arith.constant 0 : index
    %c0_20 = arith.constant 0 : index
    %c0_21 = arith.constant 0 : index
    %24 = vector.load %arg5[%c0_19, %c0_20, %c0_21] : memref<1x16x1xf32, #tpu.memory_space<vmem>>, vector<1x16x1xf32>
    %25 = vector.broadcast %24 : vector<1x16x1xf32> to vector<1x16x96xf32>
    %26 = arith.mulf %23, %25 : vector<1x16x96xf32>
    %27 = arith.truncf %26 : vector<1x16x96xf32> to vector<1x16x96xbf16>
    %c0_22 = arith.constant 0 : index
    %c0_23 = arith.constant 0 : index
    %c0_24 = arith.constant 0 : index
    %28 = vector.load %arg6[%c0_22, %c0_23, %c0_24] : memref<1x1x16xf32, #tpu.memory_space<vmem>>, vector<1x1x16xf32>
    %29 = vector.shape_cast %28 : vector<1x1x16xf32> to vector<1x1x16xf32>
    %30 = vector.broadcast %29 : vector<1x1x16xf32> to vector<1x16x16xf32>
    %cst_25 = arith.constant 0.000000e+00 : f32
    %31 = vector.broadcast %cst_25 : f32 to vector<1x16x16xf32>
    %32 = arith.cmpf oeq, %30, %31 : vector<1x16x16xf32>
    %c0_26 = arith.constant 0 : index
    %c0_27 = arith.constant 0 : index
    %c0_28 = arith.constant 0 : index
    %33 = vector.load %arg4[%c0_26, %c0_27, %c0_28] : memref<1x1x16xf32, #tpu.memory_space<vmem>>, vector<1x1x16xf32>
    %34 = vector.shape_cast %33 : vector<1x1x16xf32> to vector<1x1x16xf32>
    %35 = vector.broadcast %34 : vector<1x1x16xf32> to vector<1x16x16xf32>
    %cst_29 = arith.constant 0.000000e+00 : f32
    %36 = vector.broadcast %cst_29 : f32 to vector<1x16x16xf32>
    %37 = arith.cmpf oeq, %35, %36 : vector<1x16x16xf32>
    %38 = vector.extract_strided_slice %22 {offsets = [0, 0, 0], sizes = [1, 16, 8], strides = [1, 1, 1]} : vector<1x16x96xbf16> to vector<1x16x8xbf16>
    %39 = vector.extract_strided_slice %22 {offsets = [0, 0, 32], sizes = [1, 16, 8], strides = [1, 1, 1]} : vector<1x16x96xbf16> to vector<1x16x8xbf16>
    %40 = vector.extract_strided_slice %22 {offsets = [0, 0, 64], sizes = [1, 16, 8], strides = [1, 1, 1]} : vector<1x16x96xbf16> to vector<1x16x8xbf16>
    %41 = vector.extract_strided_slice %27 {offsets = [0, 0, 0], sizes = [1, 16, 8], strides = [1, 1, 1]} : vector<1x16x96xbf16> to vector<1x16x8xbf16>
    %42 = vector.extract_strided_slice %27 {offsets = [0, 0, 32], sizes = [1, 16, 8], strides = [1, 1, 1]} : vector<1x16x96xbf16> to vector<1x16x8xbf16>
    %43 = vector.extract_strided_slice %27 {offsets = [0, 0, 64], sizes = [1, 16, 8], strides = [1, 1, 1]} : vector<1x16x96xbf16> to vector<1x16x8xbf16>
    "tpu.trace_start"() <{level = 10 : i32, message = "bnd,bld->bnl"}> : () -> ()
    %cst_30 = arith.constant dense<0.000000e+00> : vector<1x16x16xf32>
    %44 = tpu.matmul %39, %41, %cst_30 {dimension_numbers = #tpu.dot_dimension_numbers<[2], [2], [1], [1], [0, 0, 0, 1, 1, 1], [0], [0]>} : vector<1x16x8xbf16>, vector<1x16x8xbf16>, vector<1x16x16xf32> -> vector<1x16x16xf32>
    %cst_31 = arith.constant -1.000000e+09 : f32
    "tpu.trace_stop"() : () -> ()
    %45 = vector.broadcast %cst_31 : f32 to vector<1x16x16xf32>
    %46 = arith.select %32, %45, %44 : vector<1x16x16xi1>, vector<1x16x16xf32>
    %cst_32 = arith.constant dense<0xFF800000> : vector<1x16xf32>
    %47 = vector.multi_reduction <maximumf>, %46, %cst_32 [2] : vector<1x16x16xf32> to vector<1x16xf32>
    %48 = vector.shape_cast %47 : vector<1x16xf32> to vector<1x16x1xf32>
    %49 = vector.broadcast %48 : vector<1x16x1xf32> to vector<1x16x16xf32>
    %50 = arith.subf %46, %49 : vector<1x16x16xf32>
    %51 = math.exp %50 : vector<1x16x16xf32>
    %cst_33 = arith.constant dense<0.000000e+00> : vector<1x16xf32>
    %52 = vector.multi_reduction <add>, %51, %cst_33 [2] : vector<1x16x16xf32> to vector<1x16xf32>
    %53 = vector.shape_cast %52 : vector<1x16xf32> to vector<1x16x1xf32>
    %54 = tpu.reciprocal %53 {approx = true} : vector<1x16x1xf32> -> vector<1x16x1xf32>
    %55 = vector.broadcast %54 : vector<1x16x1xf32> to vector<1x16x16xf32>
    %56 = arith.mulf %51, %55 : vector<1x16x16xf32>
    %57 = arith.truncf %56 : vector<1x16x16xf32> to vector<1x16x16xbf16>
    "tpu.trace_start"() <{level = 10 : i32, message = "bnl,bld->bnd"}> : () -> ()
    %cst_34 = arith.constant dense<0.000000e+00> : vector<1x16x8xf32>
    %58 = tpu.matmul %57, %43, %cst_34 {dimension_numbers = #tpu.dot_dimension_numbers<[2], [1], [1], [2], [0, 0, 0, 1, 1, 2], [0], [0]>} : vector<1x16x16xbf16>, vector<1x16x8xbf16>, vector<1x16x8xf32> -> vector<1x16x8xf32>
    "tpu.trace_stop"() : () -> ()
    %59 = arith.truncf %58 : vector<1x16x8xf32> to vector<1x16x8xbf16>
    %c0_35 = arith.constant 0 : index
    %c0_36 = arith.constant 0 : index
    %c0_37 = arith.constant 0 : index
    %60 = vector.load %arg19[%c0_35, %c0_36, %c0_37] : memref<1x16x32xbf16, #tpu.memory_space<vmem>>, vector<1x16x8xbf16>
    tpu.vector_store %arg19[%c0_35, %c0_36, %c0_37], %59 {strides = array<i32>} : memref<1x16x32xbf16, #tpu.memory_space<vmem>>, vector<1x16x8xbf16>,
    "tpu.trace_start"() <{level = 10 : i32, message = "bld,bnd->bln"}> : () -> ()
    %cst_38 = arith.constant dense<0.000000e+00> : vector<1x16x16xf32>
    %61 = tpu.matmul %42, %38, %cst_38 {dimension_numbers = #tpu.dot_dimension_numbers<[2], [2], [1], [1], [0, 0, 0, 1, 1, 1], [0], [0]>} : vector<1x16x8xbf16>, vector<1x16x8xbf16>, vector<1x16x16xf32> -> vector<1x16x16xf32>
    %cst_39 = arith.constant -1.000000e+09 : f32
    "tpu.trace_stop"() : () -> ()
    %62 = vector.broadcast %cst_39 : f32 to vector<1x16x16xf32>
    %63 = arith.select %37, %62, %61 : vector<1x16x16xi1>, vector<1x16x16xf32>
    %cst_40 = arith.constant dense<0xFF800000> : vector<1x16xf32>
    %64 = vector.multi_reduction <maximumf>, %63, %cst_40 [2] : vector<1x16x16xf32> to vector<1x16xf32>
    %65 = vector.shape_cast %64 : vector<1x16xf32> to vector<1x16x1xf32>
    %66 = vector.broadcast %65 : vector<1x16x1xf32> to vector<1x16x16xf32>
    %67 = arith.subf %63, %66 : vector<1x16x16xf32>
    %68 = math.exp %67 : vector<1x16x16xf32>
    %cst_41 = arith.constant dense<0.000000e+00> : vector<1x16xf32>
    %69 = vector.multi_reduction <add>, %68, %cst_41 [2] : vector<1x16x16xf32> to vector<1x16xf32>
    %70 = vector.shape_cast %69 : vector<1x16xf32> to vector<1x16x1xf32>
    %71 = tpu.reciprocal %70 {approx = true} : vector<1x16x1xf32> -> vector<1x16x1xf32>
    %72 = vector.broadcast %71 : vector<1x16x1xf32> to vector<1x16x16xf32>
    %73 = arith.mulf %68, %72 : vector<1x16x16xf32>
    %74 = arith.truncf %73 : vector<1x16x16xf32> to vector<1x16x16xbf16>
    "tpu.trace_start"() <{level = 10 : i32, message = "bln,bnd->bld"}> : () -> ()
    %cst_42 = arith.constant dense<0.000000e+00> : vector<1x16x8xf32>
    %75 = tpu.matmul %74, %40, %cst_42 {dimension_numbers = #tpu.dot_dimension_numbers<[2], [1], [1], [2], [0, 0, 0, 1, 1, 2], [0], [0]>} : vector<1x16x16xbf16>, vector<1x16x8xbf16>, vector<1x16x8xf32> -> vector<1x16x8xf32>
    "tpu.trace_stop"() : () -> ()
    %76 = arith.truncf %75 : vector<1x16x8xf32> to vector<1x16x8xbf16>
    %c0_43 = arith.constant 0 : index
    %c0_44 = arith.constant 0 : index
    %c0_45 = arith.constant 0 : index
    %77 = vector.load %arg20[%c0_43, %c0_44, %c0_45] : memref<1x16x32xbf16, #tpu.memory_space<vmem>>, vector<1x16x8xbf16>
    tpu.vector_store %arg20[%c0_43, %c0_44, %c0_45], %76 {strides = array<i32>} : memref<1x16x32xbf16, #tpu.memory_space<vmem>>, vector<1x16x8xbf16>,
    %78 = vector.extract_strided_slice %22 {offsets = [0, 0, 8], sizes = [1, 16, 8], strides = [1, 1, 1]} : vector<1x16x96xbf16> to vector<1x16x8xbf16>
    %79 = vector.extract_strided_slice %22 {offsets = [0, 0, 40], sizes = [1, 16, 8], strides = [1, 1, 1]} : vector<1x16x96xbf16> to vector<1x16x8xbf16>
    %80 = vector.extract_strided_slice %22 {offsets = [0, 0, 72], sizes = [1, 16, 8], strides = [1, 1, 1]} : vector<1x16x96xbf16> to vector<1x16x8xbf16>
    %81 = vector.extract_strided_slice %27 {offsets = [0, 0, 8], sizes = [1, 16, 8], strides = [1, 1, 1]} : vector<1x16x96xbf16> to vector<1x16x8xbf16>
    %82 = vector.extract_strided_slice %27 {offsets = [0, 0, 40], sizes = [1, 16, 8], strides = [1, 1, 1]} : vector<1x16x96xbf16> to vector<1x16x8xbf16>
    %83 = vector.extract_strided_slice %27 {offsets = [0, 0, 72], sizes = [1, 16, 8], strides = [1, 1, 1]} : vector<1x16x96xbf16> to vector<1x16x8xbf16>
    "tpu.trace_start"() <{level = 10 : i32, message = "bnd,bld->bnl"}> : () -> ()
    %cst_46 = arith.constant dense<0.000000e+00> : vector<1x16x16xf32>
    %84 = tpu.matmul %79, %81, %cst_46 {dimension_numbers = #tpu.dot_dimension_numbers<[2], [2], [1], [1], [0, 0, 0, 1, 1, 1], [0], [0]>} : vector<1x16x8xbf16>, vector<1x16x8xbf16>, vector<1x16x16xf32> -> vector<1x16x16xf32>
    %cst_47 = arith.constant -1.000000e+09 : f32
    "tpu.trace_stop"() : () -> ()
    %85 = vector.broadcast %cst_47 : f32 to vector<1x16x16xf32>
    %86 = arith.select %32, %85, %84 : vector<1x16x16xi1>, vector<1x16x16xf32>
    %cst_48 = arith.constant dense<0xFF800000> : vector<1x16xf32>
    %87 = vector.multi_reduction <maximumf>, %86, %cst_48 [2] : vector<1x16x16xf32> to vector<1x16xf32>
    %88 = vector.shape_cast %87 : vector<1x16xf32> to vector<1x16x1xf32>
    %89 = vector.broadcast %88 : vector<1x16x1xf32> to vector<1x16x16xf32>
    %90 = arith.subf %86, %89 : vector<1x16x16xf32>
    %91 = math.exp %90 : vector<1x16x16xf32>
    %cst_49 = arith.constant dense<0.000000e+00> : vector<1x16xf32>
    %92 = vector.multi_reduction <add>, %91, %cst_49 [2] : vector<1x16x16xf32> to vector<1x16xf32>
    %93 = vector.shape_cast %92 : vector<1x16xf32> to vector<1x16x1xf32>
    %94 = tpu.reciprocal %93 {approx = true} : vector<1x16x1xf32> -> vector<1x16x1xf32>
    %95 = vector.broadcast %94 : vector<1x16x1xf32> to vector<1x16x16xf32>
    %96 = arith.mulf %91, %95 : vector<1x16x16xf32>
    %97 = arith.truncf %96 : vector<1x16x16xf32> to vector<1x16x16xbf16>
    "tpu.trace_start"() <{level = 10 : i32, message = "bnl,bld->bnd"}> : () -> ()
    %cst_50 = arith.constant dense<0.000000e+00> : vector<1x16x8xf32>
    %98 = tpu.matmul %97, %83, %cst_50 {dimension_numbers = #tpu.dot_dimension_numbers<[2], [1], [1], [2], [0, 0, 0, 1, 1, 2], [0], [0]>} : vector<1x16x16xbf16>, vector<1x16x8xbf16>, vector<1x16x8xf32> -> vector<1x16x8xf32>
    "tpu.trace_stop"() : () -> ()
    %99 = arith.truncf %98 : vector<1x16x8xf32> to vector<1x16x8xbf16>
    %c0_51 = arith.constant 0 : index
    %c0_52 = arith.constant 0 : index
    %c8 = arith.constant 8 : index
    %100 = vector.load %arg19[%c0_51, %c0_52, %c8] : memref<1x16x32xbf16, #tpu.memory_space<vmem>>, vector<1x16x8xbf16>
    tpu.vector_store %arg19[%c0_51, %c0_52, %c8], %99 {strides = array<i32>} : memref<1x16x32xbf16, #tpu.memory_space<vmem>>, vector<1x16x8xbf16>,
    "tpu.trace_start"() <{level = 10 : i32, message = "bld,bnd->bln"}> : () -> ()
    %cst_53 = arith.constant dense<0.000000e+00> : vector<1x16x16xf32>
    %101 = tpu.matmul %82, %78, %cst_53 {dimension_numbers = #tpu.dot_dimension_numbers<[2], [2], [1], [1], [0, 0, 0, 1, 1, 1], [0], [0]>} : vector<1x16x8xbf16>, vector<1x16x8xbf16>, vector<1x16x16xf32> -> vector<1x16x16xf32>
    %cst_54 = arith.constant -1.000000e+09 : f32
    "tpu.trace_stop"() : () -> ()
    %102 = vector.broadcast %cst_54 : f32 to vector<1x16x16xf32>
    %103 = arith.select %37, %102, %101 : vector<1x16x16xi1>, vector<1x16x16xf32>
    %cst_55 = arith.constant dense<0xFF800000> : vector<1x16xf32>
    %104 = vector.multi_reduction <maximumf>, %103, %cst_55 [2] : vector<1x16x16xf32> to vector<1x16xf32>
    %105 = vector.shape_cast %104 : vector<1x16xf32> to vector<1x16x1xf32>
    %106 = vector.broadcast %105 : vector<1x16x1xf32> to vector<1x16x16xf32>
    %107 = arith.subf %103, %106 : vector<1x16x16xf32>
    %108 = math.exp %107 : vector<1x16x16xf32>
    %cst_56 = arith.constant dense<0.000000e+00> : vector<1x16xf32>
    %109 = vector.multi_reduction <add>, %108, %cst_56 [2] : vector<1x16x16xf32> to vector<1x16xf32>
    %110 = vector.shape_cast %109 : vector<1x16xf32> to vector<1x16x1xf32>
    %111 = tpu.reciprocal %110 {approx = true} : vector<1x16x1xf32> -> vector<1x16x1xf32>
    %112 = vector.broadcast %111 : vector<1x16x1xf32> to vector<1x16x16xf32>
    %113 = arith.mulf %108, %112 : vector<1x16x16xf32>
    %114 = arith.truncf %113 : vector<1x16x16xf32> to vector<1x16x16xbf16>
    "tpu.trace_start"() <{level = 10 : i32, message = "bln,bnd->bld"}> : () -> ()
    %cst_57 = arith.constant dense<0.000000e+00> : vector<1x16x8xf32>
    %115 = tpu.matmul %114, %80, %cst_57 {dimension_numbers = #tpu.dot_dimension_numbers<[2], [1], [1], [2], [0, 0, 0, 1, 1, 2], [0], [0]>} : vector<1x16x16xbf16>, vector<1x16x8xbf16>, vector<1x16x8xf32> -> vector<1x16x8xf32>
    "tpu.trace_stop"() : () -> ()
    %116 = arith.truncf %115 : vector<1x16x8xf32> to vector<1x16x8xbf16>
    %c0_58 = arith.constant 0 : index
    %c0_59 = arith.constant 0 : index
    %c8_60 = arith.constant 8 : index
    %117 = vector.load %arg20[%c0_58, %c0_59, %c8_60] : memref<1x16x32xbf16, #tpu.memory_space<vmem>>, vector<1x16x8xbf16>
    tpu.vector_store %arg20[%c0_58, %c0_59, %c8_60], %116 {strides = array<i32>} : memref<1x16x32xbf16, #tpu.memory_space<vmem>>, vector<1x16x8xbf16>,
    %118 = vector.extract_strided_slice %22 {offsets = [0, 0, 16], sizes = [1, 16, 8], strides = [1, 1, 1]} : vector<1x16x96xbf16> to vector<1x16x8xbf16>
    %119 = vector.extract_strided_slice %22 {offsets = [0, 0, 48], sizes = [1, 16, 8], strides = [1, 1, 1]} : vector<1x16x96xbf16> to vector<1x16x8xbf16>
    %120 = vector.extract_strided_slice %22 {offsets = [0, 0, 80], sizes = [1, 16, 8], strides = [1, 1, 1]} : vector<1x16x96xbf16> to vector<1x16x8xbf16>
    %121 = vector.extract_strided_slice %27 {offsets = [0, 0, 16], sizes = [1, 16, 8], strides = [1, 1, 1]} : vector<1x16x96xbf16> to vector<1x16x8xbf16>
    %122 = vector.extract_strided_slice %27 {offsets = [0, 0, 48], sizes = [1, 16, 8], strides = [1, 1, 1]} : vector<1x16x96xbf16> to vector<1x16x8xbf16>
    %123 = vector.extract_strided_slice %27 {offsets = [0, 0, 80], sizes = [1, 16, 8], strides = [1, 1, 1]} : vector<1x16x96xbf16> to vector<1x16x8xbf16>
    "tpu.trace_start"() <{level = 10 : i32, message = "bnd,bld->bnl"}> : () -> ()
    %cst_61 = arith.constant dense<0.000000e+00> : vector<1x16x16xf32>
    %124 = tpu.matmul %119, %121, %cst_61 {dimension_numbers = #tpu.dot_dimension_numbers<[2], [2], [1], [1], [0, 0, 0, 1, 1, 1], [0], [0]>} : vector<1x16x8xbf16>, vector<1x16x8xbf16>, vector<1x16x16xf32> -> vector<1x16x16xf32>
    %cst_62 = arith.constant -1.000000e+09 : f32
    "tpu.trace_stop"() : () -> ()
    %125 = vector.broadcast %cst_62 : f32 to vector<1x16x16xf32>
    %126 = arith.select %32, %125, %124 : vector<1x16x16xi1>, vector<1x16x16xf32>
    %cst_63 = arith.constant dense<0xFF800000> : vector<1x16xf32>
    %127 = vector.multi_reduction <maximumf>, %126, %cst_63 [2] : vector<1x16x16xf32> to vector<1x16xf32>
    %128 = vector.shape_cast %127 : vector<1x16xf32> to vector<1x16x1xf32>
    %129 = vector.broadcast %128 : vector<1x16x1xf32> to vector<1x16x16xf32>
    %130 = arith.subf %126, %129 : vector<1x16x16xf32>
    %131 = math.exp %130 : vector<1x16x16xf32>
    %cst_64 = arith.constant dense<0.000000e+00> : vector<1x16xf32>
    %132 = vector.multi_reduction <add>, %131, %cst_64 [2] : vector<1x16x16xf32> to vector<1x16xf32>
    %133 = vector.shape_cast %132 : vector<1x16xf32> to vector<1x16x1xf32>
    %134 = tpu.reciprocal %133 {approx = true} : vector<1x16x1xf32> -> vector<1x16x1xf32>
    %135 = vector.broadcast %134 : vector<1x16x1xf32> to vector<1x16x16xf32>
    %136 = arith.mulf %131, %135 : vector<1x16x16xf32>
    %137 = arith.truncf %136 : vector<1x16x16xf32> to vector<1x16x16xbf16>
    "tpu.trace_start"() <{level = 10 : i32, message = "bnl,bld->bnd"}> : () -> ()
    %cst_65 = arith.constant dense<0.000000e+00> : vector<1x16x8xf32>
    %138 = tpu.matmul %137, %123, %cst_65 {dimension_numbers = #tpu.dot_dimension_numbers<[2], [1], [1], [2], [0, 0, 0, 1, 1, 2], [0], [0]>} : vector<1x16x16xbf16>, vector<1x16x8xbf16>, vector<1x16x8xf32> -> vector<1x16x8xf32>
    "tpu.trace_stop"() : () -> ()
    %139 = arith.truncf %138 : vector<1x16x8xf32> to vector<1x16x8xbf16>
    %c0_66 = arith.constant 0 : index
    %c0_67 = arith.constant 0 : index
    %c16 = arith.constant 16 : index
    %140 = vector.load %arg19[%c0_66, %c0_67, %c16] : memref<1x16x32xbf16, #tpu.memory_space<vmem>>, vector<1x16x8xbf16>
    tpu.vector_store %arg19[%c0_66, %c0_67, %c16], %139 {strides = array<i32>} : memref<1x16x32xbf16, #tpu.memory_space<vmem>>, vector<1x16x8xbf16>,
    "tpu.trace_start"() <{level = 10 : i32, message = "bld,bnd->bln"}> : () -> ()
    %cst_68 = arith.constant dense<0.000000e+00> : vector<1x16x16xf32>
    %141 = tpu.matmul %122, %118, %cst_68 {dimension_numbers = #tpu.dot_dimension_numbers<[2], [2], [1], [1], [0, 0, 0, 1, 1, 1], [0], [0]>} : vector<1x16x8xbf16>, vector<1x16x8xbf16>, vector<1x16x16xf32> -> vector<1x16x16xf32>
    %cst_69 = arith.constant -1.000000e+09 : f32
    "tpu.trace_stop"() : () -> ()
    %142 = vector.broadcast %cst_69 : f32 to vector<1x16x16xf32>
    %143 = arith.select %37, %142, %141 : vector<1x16x16xi1>, vector<1x16x16xf32>
    %cst_70 = arith.constant dense<0xFF800000> : vector<1x16xf32>
    %144 = vector.multi_reduction <maximumf>, %143, %cst_70 [2] : vector<1x16x16xf32> to vector<1x16xf32>
    %145 = vector.shape_cast %144 : vector<1x16xf32> to vector<1x16x1xf32>
    %146 = vector.broadcast %145 : vector<1x16x1xf32> to vector<1x16x16xf32>
    %147 = arith.subf %143, %146 : vector<1x16x16xf32>
    %148 = math.exp %147 : vector<1x16x16xf32>
    %cst_71 = arith.constant dense<0.000000e+00> : vector<1x16xf32>
    %149 = vector.multi_reduction <add>, %148, %cst_71 [2] : vector<1x16x16xf32> to vector<1x16xf32>
    %150 = vector.shape_cast %149 : vector<1x16xf32> to vector<1x16x1xf32>
    %151 = tpu.reciprocal %150 {approx = true} : vector<1x16x1xf32> -> vector<1x16x1xf32>
    %152 = vector.broadcast %151 : vector<1x16x1xf32> to vector<1x16x16xf32>
    %153 = arith.mulf %148, %152 : vector<1x16x16xf32>
    %154 = arith.truncf %153 : vector<1x16x16xf32> to vector<1x16x16xbf16>
    "tpu.trace_start"() <{level = 10 : i32, message = "bln,bnd->bld"}> : () -> ()
    %cst_72 = arith.constant dense<0.000000e+00> : vector<1x16x8xf32>
    %155 = tpu.matmul %154, %120, %cst_72 {dimension_numbers = #tpu.dot_dimension_numbers<[2], [1], [1], [2], [0, 0, 0, 1, 1, 2], [0], [0]>} : vector<1x16x16xbf16>, vector<1x16x8xbf16>, vector<1x16x8xf32> -> vector<1x16x8xf32>
    "tpu.trace_stop"() : () -> ()
    %156 = arith.truncf %155 : vector<1x16x8xf32> to vector<1x16x8xbf16>
    %c0_73 = arith.constant 0 : index
    %c0_74 = arith.constant 0 : index
    %c16_75 = arith.constant 16 : index
    %157 = vector.load %arg20[%c0_73, %c0_74, %c16_75] : memref<1x16x32xbf16, #tpu.memory_space<vmem>>, vector<1x16x8xbf16>
    tpu.vector_store %arg20[%c0_73, %c0_74, %c16_75], %156 {strides = array<i32>} : memref<1x16x32xbf16, #tpu.memory_space<vmem>>, vector<1x16x8xbf16>,
    %158 = vector.extract_strided_slice %22 {offsets = [0, 0, 24], sizes = [1, 16, 8], strides = [1, 1, 1]} : vector<1x16x96xbf16> to vector<1x16x8xbf16>
    %159 = vector.extract_strided_slice %22 {offsets = [0, 0, 56], sizes = [1, 16, 8], strides = [1, 1, 1]} : vector<1x16x96xbf16> to vector<1x16x8xbf16>
    %160 = vector.extract_strided_slice %22 {offsets = [0, 0, 88], sizes = [1, 16, 8], strides = [1, 1, 1]} : vector<1x16x96xbf16> to vector<1x16x8xbf16>
    %161 = vector.extract_strided_slice %27 {offsets = [0, 0, 24], sizes = [1, 16, 8], strides = [1, 1, 1]} : vector<1x16x96xbf16> to vector<1x16x8xbf16>
    %162 = vector.extract_strided_slice %27 {offsets = [0, 0, 56], sizes = [1, 16, 8], strides = [1, 1, 1]} : vector<1x16x96xbf16> to vector<1x16x8xbf16>
    %163 = vector.extract_strided_slice %27 {offsets = [0, 0, 88], sizes = [1, 16, 8], strides = [1, 1, 1]} : vector<1x16x96xbf16> to vector<1x16x8xbf16>
    "tpu.trace_start"() <{level = 10 : i32, message = "bnd,bld->bnl"}> : () -> ()
    %cst_76 = arith.constant dense<0.000000e+00> : vector<1x16x16xf32>
    %164 = tpu.matmul %159, %161, %cst_76 {dimension_numbers = #tpu.dot_dimension_numbers<[2], [2], [1], [1], [0, 0, 0, 1, 1, 1], [0], [0]>} : vector<1x16x8xbf16>, vector<1x16x8xbf16>, vector<1x16x16xf32> -> vector<1x16x16xf32>
    %cst_77 = arith.constant -1.000000e+09 : f32
    "tpu.trace_stop"() : () -> ()
    %165 = vector.broadcast %cst_77 : f32 to vector<1x16x16xf32>
    %166 = arith.select %32, %165, %164 : vector<1x16x16xi1>, vector<1x16x16xf32>
    %cst_78 = arith.constant dense<0xFF800000> : vector<1x16xf32>
    %167 = vector.multi_reduction <maximumf>, %166, %cst_78 [2] : vector<1x16x16xf32> to vector<1x16xf32>
    %168 = vector.shape_cast %167 : vector<1x16xf32> to vector<1x16x1xf32>
    %169 = vector.broadcast %168 : vector<1x16x1xf32> to vector<1x16x16xf32>
    %170 = arith.subf %166, %169 : vector<1x16x16xf32>
    %171 = math.exp %170 : vector<1x16x16xf32>
    %cst_79 = arith.constant dense<0.000000e+00> : vector<1x16xf32>
    %172 = vector.multi_reduction <add>, %171, %cst_79 [2] : vector<1x16x16xf32> to vector<1x16xf32>
    %173 = vector.shape_cast %172 : vector<1x16xf32> to vector<1x16x1xf32>
    %174 = tpu.reciprocal %173 {approx = true} : vector<1x16x1xf32> -> vector<1x16x1xf32>
    %175 = vector.broadcast %174 : vector<1x16x1xf32> to vector<1x16x16xf32>
    %176 = arith.mulf %171, %175 : vector<1x16x16xf32>
    %177 = arith.truncf %176 : vector<1x16x16xf32> to vector<1x16x16xbf16>
    "tpu.trace_start"() <{level = 10 : i32, message = "bnl,bld->bnd"}> : () -> ()
    %cst_80 = arith.constant dense<0.000000e+00> : vector<1x16x8xf32>
    %178 = tpu.matmul %177, %163, %cst_80 {dimension_numbers = #tpu.dot_dimension_numbers<[2], [1], [1], [2], [0, 0, 0, 1, 1, 2], [0], [0]>} : vector<1x16x16xbf16>, vector<1x16x8xbf16>, vector<1x16x8xf32> -> vector<1x16x8xf32>
    "tpu.trace_stop"() : () -> ()
    %179 = arith.truncf %178 : vector<1x16x8xf32> to vector<1x16x8xbf16>
    %c0_81 = arith.constant 0 : index
    %c0_82 = arith.constant 0 : index
    %c24 = arith.constant 24 : index
    %180 = vector.load %arg19[%c0_81, %c0_82, %c24] : memref<1x16x32xbf16, #tpu.memory_space<vmem>>, vector<1x16x8xbf16>
    tpu.vector_store %arg19[%c0_81, %c0_82, %c24], %179 {strides = array<i32>} : memref<1x16x32xbf16, #tpu.memory_space<vmem>>, vector<1x16x8xbf16>,
    "tpu.trace_start"() <{level = 10 : i32, message = "bld,bnd->bln"}> : () -> ()
    %cst_83 = arith.constant dense<0.000000e+00> : vector<1x16x16xf32>
    %181 = tpu.matmul %162, %158, %cst_83 {dimension_numbers = #tpu.dot_dimension_numbers<[2], [2], [1], [1], [0, 0, 0, 1, 1, 1], [0], [0]>} : vector<1x16x8xbf16>, vector<1x16x8xbf16>, vector<1x16x16xf32> -> vector<1x16x16xf32>
    %cst_84 = arith.constant -1.000000e+09 : f32
    "tpu.trace_stop"() : () -> ()
    %182 = vector.broadcast %cst_84 : f32 to vector<1x16x16xf32>
    %183 = arith.select %37, %182, %181 : vector<1x16x16xi1>, vector<1x16x16xf32>
    %cst_85 = arith.constant dense<0xFF800000> : vector<1x16xf32>
    %184 = vector.multi_reduction <maximumf>, %183, %cst_85 [2] : vector<1x16x16xf32> to vector<1x16xf32>
    %185 = vector.shape_cast %184 : vector<1x16xf32> to vector<1x16x1xf32>
    %186 = vector.broadcast %185 : vector<1x16x1xf32> to vector<1x16x16xf32>
    %187 = arith.subf %183, %186 : vector<1x16x16xf32>
    %188 = math.exp %187 : vector<1x16x16xf32>
    %cst_86 = arith.constant dense<0.000000e+00> : vector<1x16xf32>
    %189 = vector.multi_reduction <add>, %188, %cst_86 [2] : vector<1x16x16xf32> to vector<1x16xf32>
    %190 = vector.shape_cast %189 : vector<1x16xf32> to vector<1x16x1xf32>
    %191 = tpu.reciprocal %190 {approx = true} : vector<1x16x1xf32> -> vector<1x16x1xf32>
    %192 = vector.broadcast %191 : vector<1x16x1xf32> to vector<1x16x16xf32>
    %193 = arith.mulf %188, %192 : vector<1x16x16xf32>
    %194 = arith.truncf %193 : vector<1x16x16xf32> to vector<1x16x16xbf16>
    "tpu.trace_start"() <{level = 10 : i32, message = "bln,bnd->bld"}> : () -> ()
    %cst_87 = arith.constant dense<0.000000e+00> : vector<1x16x8xf32>
    %195 = tpu.matmul %194, %160, %cst_87 {dimension_numbers = #tpu.dot_dimension_numbers<[2], [1], [1], [2], [0, 0, 0, 1, 1, 2], [0], [0]>} : vector<1x16x16xbf16>, vector<1x16x8xbf16>, vector<1x16x8xf32> -> vector<1x16x8xf32>
    "tpu.trace_stop"() : () -> ()
    %196 = arith.truncf %195 : vector<1x16x8xf32> to vector<1x16x8xbf16>
    %c0_88 = arith.constant 0 : index
    %c0_89 = arith.constant 0 : index
    %c24_90 = arith.constant 24 : index
    %197 = vector.load %arg20[%c0_88, %c0_89, %c24_90] : memref<1x16x32xbf16, #tpu.memory_space<vmem>>, vector<1x16x8xbf16>
    tpu.vector_store %arg20[%c0_88, %c0_89, %c24_90], %196 {strides = array<i32>} : memref<1x16x32xbf16, #tpu.memory_space<vmem>>, vector<1x16x8xbf16>,
    %c0_91 = arith.constant 0 : index
    %c0_92 = arith.constant 0 : index
    %c0_93 = arith.constant 0 : index
    %198 = vector.load %arg19[%c0_91, %c0_92, %c0_93] : memref<1x16x32xbf16, #tpu.memory_space<vmem>>, vector<1x16x32xbf16>
    %199 = vector.shape_cast %198 : vector<1x16x32xbf16> to vector<16x32xbf16>
    %c0_94 = arith.constant 0 : index
    %c0_95 = arith.constant 0 : index
    %c0_96 = arith.constant 0 : index
    %200 = vector.load %arg20[%c0_94, %c0_95, %c0_96] : memref<1x16x32xbf16, #tpu.memory_space<vmem>>, vector<1x16x32xbf16>
    %201 = vector.shape_cast %200 : vector<1x16x32xbf16> to vector<16x32xbf16>
    %c0_97 = arith.constant 0 : index
    %c0_98 = arith.constant 0 : index
    %202 = vector.load %arg11[%c0_97, %c0_98] : memref<32x128xbf16, #tpu.memory_space<vmem>>, vector<32x128xbf16>
    %cst_99 = arith.constant dense<0.000000e+00> : vector<16x128xf32>
    %203 = tpu.matmul %1, %202, %cst_99 {dimension_numbers = #tpu.dot_dimension_numbers<[1], [0], [0], [1], [0, 0, 1, 1], [], []>} : vector<16x32xbf16>, vector<32x128xbf16>, vector<16x128xf32> -> vector<16x128xf32>
    %c0_100 = arith.constant 0 : index
    %c0_101 = arith.constant 0 : index
    %204 = vector.load %arg12[%c0_100, %c0_101] : memref<32x128xbf16, #tpu.memory_space<vmem>>, vector<32x128xbf16>
    %cst_102 = arith.constant dense<0.000000e+00> : vector<16x128xf32>
    %205 = tpu.matmul %199, %204, %cst_102 {dimension_numbers = #tpu.dot_dimension_numbers<[1], [0], [0], [1], [0, 0, 1, 1], [], []>} : vector<16x32xbf16>, vector<32x128xbf16>, vector<16x128xf32> -> vector<16x128xf32>
    %206 = arith.addf %203, %205 : vector<16x128xf32>
    %c0_103 = arith.constant 0 : index
    %c0_104 = arith.constant 0 : index
    %207 = vector.load %arg13[%c0_103, %c0_104] : memref<1x128xf32, #tpu.memory_space<vmem>>, vector<1x128xf32>
    %208 = vector.broadcast %207 : vector<1x128xf32> to vector<16x128xf32>
    %209 = arith.addf %206, %208 : vector<16x128xf32>
    %c0_105 = arith.constant 0 : index
    %c0_106 = arith.constant 0 : index
    %210 = vector.load %arg14[%c0_105, %c0_106] : memref<32x128xbf16, #tpu.memory_space<vmem>>, vector<32x128xbf16>
    %cst_107 = arith.constant dense<0.000000e+00> : vector<16x128xf32>
    %211 = tpu.matmul %3, %210, %cst_107 {dimension_numbers = #tpu.dot_dimension_numbers<[1], [0], [0], [1], [0, 0, 1, 1], [], []>} : vector<16x32xbf16>, vector<32x128xbf16>, vector<16x128xf32> -> vector<16x128xf32>
    %c0_108 = arith.constant 0 : index
    %c0_109 = arith.constant 0 : index
    %212 = vector.load %arg15[%c0_108, %c0_109] : memref<32x128xbf16, #tpu.memory_space<vmem>>, vector<32x128xbf16>
    %cst_110 = arith.constant dense<0.000000e+00> : vector<16x128xf32>
    %213 = tpu.matmul %201, %212, %cst_110 {dimension_numbers = #tpu.dot_dimension_numbers<[1], [0], [0], [1], [0, 0, 1, 1], [], []>} : vector<16x32xbf16>, vector<32x128xbf16>, vector<16x128xf32> -> vector<16x128xf32>
    %214 = arith.addf %211, %213 : vector<16x128xf32>
    %c0_111 = arith.constant 0 : index
    %c0_112 = arith.constant 0 : index
    %215 = vector.load %arg16[%c0_111, %c0_112] : memref<1x128xf32, #tpu.memory_space<vmem>>, vector<1x128xf32>
    %216 = vector.broadcast %215 : vector<1x128xf32> to vector<16x128xf32>
    %217 = arith.addf %214, %216 : vector<16x128xf32>
    %218 = vector.shape_cast %209 : vector<16x128xf32> to vector<1x16x128xf32>
    %c0_113 = arith.constant 0 : index
    %c0_114 = arith.constant 0 : index
    %c0_115 = arith.constant 0 : index
    %219 = vector.load %arg17[%c0_113, %c0_114, %c0_115] : memref<1x16x128xf32, #tpu.memory_space<vmem>>, vector<1x16x128xf32>
    tpu.vector_store %arg17[%c0_113, %c0_114, %c0_115], %218 {strides = array<i32>} : memref<1x16x128xf32, #tpu.memory_space<vmem>>, vector<1x16x128xf32>,
    %220 = vector.shape_cast %217 : vector<16x128xf32> to vector<1x16x128xf32>
    %c0_116 = arith.constant 0 : index
    %c0_117 = arith.constant 0 : index
    %c0_118 = arith.constant 0 : index
    %221 = vector.load %arg18[%c0_116, %c0_117, %c0_118] : memref<1x16x128xf32, #tpu.memory_space<vmem>>, vector<1x16x128xf32>
    tpu.vector_store %arg18[%c0_116, %c0_117, %c0_118], %220 {strides = array<i32>} : memref<1x16x128xf32, #tpu.memory_space<vmem>>, vector<1x16x128xf32>,
    return
  }
  func.func @transform_0(%arg0: i32) -> (i32, i32, i32) {
    %c0_i32 = arith.constant 0 : i32
    %c0_i32_0 = arith.constant 0 : i32
    %c0_i32_1 = arith.constant 0 : i32
    return %arg0, %c0_i32, %c0_i32_0 : i32, i32, i32
  }
  func.func @transform_1(%arg0: i32) -> (i32, i32, i32) {
    %c0_i32 = arith.constant 0 : i32
    %c0_i32_0 = arith.constant 0 : i32
    %c0_i32_1 = arith.constant 0 : i32
    return %arg0, %c0_i32, %c0_i32_0 : i32, i32, i32
  }
  func.func @transform_2(%arg0: i32) -> (i32, i32, i32) {
    %c0_i32 = arith.constant 0 : i32
    %c0_i32_0 = arith.constant 0 : i32
    %c0_i32_1 = arith.constant 0 : i32
    return %arg0, %c0_i32, %c0_i32_0 : i32, i32, i32
  }
  func.func @transform_3(%arg0: i32) -> (i32, i32, i32) {
    %c0_i32 = arith.constant 0 : i32
    %c0_i32_0 = arith.constant 0 : i32
    %c0_i32_1 = arith.constant 0 : i32
    return %arg0, %c0_i32, %c0_i32_0 : i32, i32, i32
  }
  func.func @transform_4(%arg0: i32) -> (i32, i32, i32) {
    %c0_i32 = arith.constant 0 : i32
    %c0_i32_0 = arith.constant 0 : i32
    %c0_i32_1 = arith.constant 0 : i32
    return %arg0, %c0_i32, %c0_i32_0 : i32, i32, i32
  }
  func.func @transform_5(%arg0: i32) -> (i32, i32, i32) {
    %c0_i32 = arith.constant 0 : i32
    %c0_i32_0 = arith.constant 0 : i32
    %c0_i32_1 = arith.constant 0 : i32
    return %arg0, %c0_i32, %c0_i32_0 : i32, i32, i32
  }
  func.func @transform_6(%arg0: i32) -> (i32, i32) {
    %c0_i32 = arith.constant 0 : i32
    %c0_i32_0 = arith.constant 0 : i32
    %c0_i32_1 = arith.constant 0 : i32
    return %c0_i32, %c0_i32_0 : i32, i32
  }
  func.func @transform_7(%arg0: i32) -> (i32, i32) {
    %c0_i32 = arith.constant 0 : i32
    %c0_i32_0 = arith.constant 0 : i32
    %c0_i32_1 = arith.constant 0 : i32
    return %c0_i32, %c0_i32_0 : i32, i32
  }
  func.func @transform_8(%arg0: i32) -> (i32, i32) {
    %c0_i32 = arith.constant 0 : i32
    %c0_i32_0 = arith.constant 0 : i32
    %c0_i32_1 = arith.constant 0 : i32
    return %c0_i32, %c0_i32_0 : i32, i32
  }
  func.func @transform_9(%arg0: i32) -> (i32, i32) {
    %c0_i32 = arith.constant 0 : i32
    %c0_i32_0 = arith.constant 0 : i32
    %c0_i32_1 = arith.constant 0 : i32
    return %c0_i32, %c0_i32_0 : i32, i32
  }
  func.func @transform_10(%arg0: i32) -> (i32, i32) {
    %c0_i32 = arith.constant 0 : i32
    %c0_i32_0 = arith.constant 0 : i32
    %c0_i32_1 = arith.constant 0 : i32
    return %c0_i32, %c0_i32_0 : i32, i32
  }
  func.func @transform_11(%arg0: i32) -> (i32, i32) {
    %c0_i32 = arith.constant 0 : i32
    %c0_i32_0 = arith.constant 0 : i32
    %c0_i32_1 = arith.constant 0 : i32
    return %c0_i32, %c0_i32_0 : i32, i32
  }
  func.func @transform_12(%arg0: i32) -> (i32, i32) {
    %c0_i32 = arith.constant 0 : i32
    %c0_i32_0 = arith.constant 0 : i32
    %c0_i32_1 = arith.constant 0 : i32
    return %c0_i32, %c0_i32_0 : i32, i32
  }
  func.func @transform_13(%arg0: i32) -> (i32, i32) {
    %c0_i32 = arith.constant 0 : i32
    %c0_i32_0 = arith.constant 0 : i32
    %c0_i32_1 = arith.constant 0 : i32
    return %c0_i32, %c0_i32_0 : i32, i32
  }
  func.func @transform_14(%arg0: i32) -> (i32, i32) {
    %c0_i32 = arith.constant 0 : i32
    %c0_i32_0 = arith.constant 0 : i32
    %c0_i32_1 = arith.constant 0 : i32
    return %c0_i32, %c0_i32_0 : i32, i32
  }
  func.func @transform_15(%arg0: i32) -> (i32, i32) {
    %c0_i32 = arith.constant 0 : i32
    %c0_i32_0 = arith.constant 0 : i32
    %c0_i32_1 = arith.constant 0 : i32
    return %c0_i32, %c0_i32_0 : i32, i32
  }
  func.func @transform_16(%arg0: i32) -> (i32, i32, i32) {
    %c0_i32 = arith.constant 0 : i32
    %c0_i32_0 = arith.constant 0 : i32
    %c0_i32_1 = arith.constant 0 : i32
    return %arg0, %c0_i32, %c0_i32_0 : i32, i32, i32
  }
  func.func @transform_17(%arg0: i32) -> (i32, i32, i32) {
    %c0_i32 = arith.constant 0 : i32
    %c0_i32_0 = arith.constant 0 : i32
    %c0_i32_1 = arith.constant 0 : i32
    return %arg0, %c0_i32, %c0_i32_0 : i32, i32, i32
  }
}

module attributes {stable_mosaic.version = 11 : i64} {
  func.func @_inter_modality_kernel(%arg0: i32, %arg1: memref<1x16x32xbf16, #tpu.memory_space<vmem>>, %arg2: memref<1x16x32xbf16, #tpu.memory_space<vmem>>, %arg3: memref<1x16x1xf32, #tpu.memory_space<vmem>>, %arg4: memref<1x1x16xf32, #tpu.memory_space<vmem>>, %arg5: memref<1x16x1xf32, #tpu.memory_space<vmem>>, %arg6: memref<1x1x16xf32, #tpu.memory_space<vmem>>, %arg7: memref<32x96xbf16, #tpu.memory_space<vmem>>, %arg8: memref<1x96xf32, #tpu.memory_space<vmem>>, %arg9: memref<32x96xbf16, #tpu.memory_space<vmem>>, %arg10: memref<1x96xf32, #tpu.memory_space<vmem>>, %arg11: memref<32x128xbf16, #tpu.memory_space<vmem>>, %arg12: memref<32x128xbf16, #tpu.memory_space<vmem>>, %arg13: memref<1x128xf32, #tpu.memory_space<vmem>>, %arg14: memref<32x128xbf16, #tpu.memory_space<vmem>>, %arg15: memref<32x128xbf16, #tpu.memory_space<vmem>>, %arg16: memref<1x128xf32, #tpu.memory_space<vmem>>, %arg17: memref<1x16x128xf32, #tpu.memory_space<vmem>>, %arg18: memref<1x16x128xf32, #tpu.memory_space<vmem>>, %arg19: memref<1x16x32xbf16, #tpu.memory_space<vmem>>, %arg20: memref<1x16x32xbf16, #tpu.memory_space<vmem>>) attributes {dimension_semantics = [#tpu.dimension_semantics<parallel>], iteration_bounds = array<i64: 2>, scalar_prefetch = 0 : i64, scratch_operands = 2 : i64, tpu.core_type = #tpu.core_type<tc>, window_params = [{transform_indices = @transform_0, window_bounds = array<i64: 1, 16, 32>}, {transform_indices = @transform_1, window_bounds = array<i64: 1, 16, 32>}, {transform_indices = @transform_2, window_bounds = array<i64: 1, 16, 1>}, {transform_indices = @transform_3, window_bounds = array<i64: 1, 1, 16>}, {transform_indices = @transform_4, window_bounds = array<i64: 1, 16, 1>}, {transform_indices = @transform_5, window_bounds = array<i64: 1, 1, 16>}, {pipeline_mode = #tpu.pipeline_mode<synchronous>, transform_indices = @transform_6, window_bounds = array<i64: 32, 96>}, {pipeline_mode = #tpu.pipeline_mode<synchronous>, transform_indices = @transform_7, window_bounds = array<i64: 1, 96>}, {pipeline_mode = #tpu.pipeline_mode<synchronous>, transform_indices = @transform_8, window_bounds = array<i64: 32, 96>}, {pipeline_mode = #tpu.pipeline_mode<synchronous>, transform_indices = @transform_9, window_bounds = array<i64: 1, 96>}, {pipeline_mode = #tpu.pipeline_mode<synchronous>, transform_indices = @transform_10, window_bounds = array<i64: 32, 128>}, {pipeline_mode = #tpu.pipeline_mode<synchronous>, transform_indices = @transform_11, window_bounds = array<i64: 32, 128>}, {pipeline_mode = #tpu.pipeline_mode<synchronous>, transform_indices = @transform_12, window_bounds = array<i64: 1, 128>}, {pipeline_mode = #tpu.pipeline_mode<synchronous>, transform_indices = @transform_13, window_bounds = array<i64: 32, 128>}, {pipeline_mode = #tpu.pipeline_mode<synchronous>, transform_indices = @transform_14, window_bounds = array<i64: 32, 128>}, {pipeline_mode = #tpu.pipeline_mode<synchronous>, transform_indices = @transform_15, window_bounds = array<i64: 1, 128>}, {transform_indices = @transform_16, window_bounds = array<i64: 1, 16, 128>}, {transform_indices = @transform_17, window_bounds = array<i64: 1, 16, 128>}]} {
    %c0 = arith.constant 0 : index
    %c0_0 = arith.constant 0 : index
    %c0_1 = arith.constant 0 : index
    %0 = vector.load %arg1[%c0, %c0_0, %c0_1] : memref<1x16x32xbf16, #tpu.memory_space<vmem>>, vector<1x16x32xbf16>
    %1 = vector.shape_cast %0 : vector<1x16x32xbf16> to vector<16x32xbf16>
    %c0_2 = arith.constant 0 : index
    %c0_3 = arith.constant 0 : index
    %c0_4 = arith.constant 0 : index
    %2 = vector.load %arg2[%c0_2, %c0_3, %c0_4] : memref<1x16x32xbf16, #tpu.memory_space<vmem>>, vector<1x16x32xbf16>
    %3 = vector.shape_cast %2 : vector<1x16x32xbf16> to vector<16x32xbf16>
    %cst = arith.constant 0.000000e+00 : bf16
    %4 = vector.broadcast %cst : bf16 to vector<16x32xbf16>
    %5 = arith.maximumf %1, %4 : vector<16x32xbf16>
    %c0_5 = arith.constant 0 : index
    %c0_6 = arith.constant 0 : index
    %6 = vector.load %arg7[%c0_5, %c0_6] : memref<32x96xbf16, #tpu.memory_space<vmem>>, vector<32x96xbf16>
    %cst_7 = arith.constant dense<0.000000e+00> : vector<16x96xf32>
    %7 = tpu.matmul %5, %6, %cst_7 {dimension_numbers = #tpu.dot_dimension_numbers<[1], [0], [0], [1], [0, 0, 1, 1], [], []>} : vector<16x32xbf16>, vector<32x96xbf16>, vector<16x96xf32> -> vector<16x96xf32>
    %c0_8 = arith.constant 0 : index
    %c0_9 = arith.constant 0 : index
    %8 = vector.load %arg8[%c0_8, %c0_9] : memref<1x96xf32, #tpu.memory_space<vmem>>, vector<1x96xf32>
    %9 = vector.broadcast %8 : vector<1x96xf32> to vector<16x96xf32>
    %10 = arith.addf %7, %9 : vector<16x96xf32>
    %cst_10 = arith.constant 0.000000e+00 : bf16
    %11 = vector.broadcast %cst_10 : bf16 to vector<16x32xbf16>
    %12 = arith.maximumf %3, %11 : vector<16x32xbf16>
    %c0_11 = arith.constant 0 : index
    %c0_12 = arith.constant 0 : index
    %13 = vector.load %arg9[%c0_11, %c0_12] : memref<32x96xbf16, #tpu.memory_space<vmem>>, vector<32x96xbf16>
    %cst_13 = arith.constant dense<0.000000e+00> : vector<16x96xf32>
    %14 = tpu.matmul %12, %13, %cst_13 {dimension_numbers = #tpu.dot_dimension_numbers<[1], [0], [0], [1], [0, 0, 1, 1], [], []>} : vector<16x32xbf16>, vector<32x96xbf16>, vector<16x96xf32> -> vector<16x96xf32>
    %c0_14 = arith.constant 0 : index
    %c0_15 = arith.constant 0 : index
    %15 = vector.load %arg10[%c0_14, %c0_15] : memref<1x96xf32, #tpu.memory_space<vmem>>, vector<1x96xf32>
    %16 = vector.broadcast %15 : vector<1x96xf32> to vector<16x96xf32>
    %17 = arith.addf %14, %16 : vector<16x96xf32>
    %18 = vector.shape_cast %10 : vector<16x96xf32> to vector<1x16x96xf32>
    %c0_16 = arith.constant 0 : index
    %c0_17 = arith.constant 0 : index
    %c0_18 = arith.constant 0 : index
    %19 = vector.load %arg3[%c0_16, %c0_17, %c0_18] : memref<1x16x1xf32, #tpu.memory_space<vmem>>, vector<1x16x1xf32>
    %20 = vector.broadcast %19 : vector<1x16x1xf32> to vector<1x16x96xf32>
    %21 = arith.mulf %18, %20 : vector<1x16x96xf32>
    %22 = arith.truncf %21 : vector<1x16x96xf32> to vector<1x16x96xbf16>
    %23 = vector.shape_cast %17 : vector<16x96xf32> to vector<1x16x96xf32>
    %c0_19 = arith.constant 0 : index
    %c0_20 = arith.constant 0 : index
    %c0_21 = arith.constant 0 : index
    %24 = vector.load %arg5[%c0_19, %c0_20, %c0_21] : memref<1x16x1xf32, #tpu.memory_space<vmem>>, vector<1x16x1xf32>
    %25 = vector.broadcast %24 : vector<1x16x1xf32> to vector<1x16x96xf32>
    %26 = arith.mulf %23, %25 : vector<1x16x96xf32>
    %27 = arith.truncf %26 : vector<1x16x96xf32> to vector<1x16x96xbf16>
    %c0_22 = arith.constant 0 : index
    %c0_23 = arith.constant 0 : index
    %c0_24 = arith.constant 0 : index
    %28 = vector.load %arg6[%c0_22, %c0_23, %c0_24] : memref<1x1x16xf32, #tpu.memory_space<vmem>>, vector<1x1x16xf32>
    %29 = vector.shape_cast %28 : vector<1x1x16xf32> to vector<1x1x16xf32>
    %30 = vector.broadcast %29 : vector<1x1x16xf32> to vector<1x16x16xf32>
    %cst_25 = arith.constant 0.000000e+00 : f32
    %31 = vector.broadcast %cst_25 : f32 to vector<1x16x16xf32>
    %32 = arith.cmpf oeq, %30, %31 : vector<1x16x16xf32>
    %c0_26 = arith.constant 0 : index
    %c0_27 = arith.constant 0 : index
    %c0_28 = arith.constant 0 : index
    %33 = vector.load %arg4[%c0_26, %c0_27, %c0_28] : memref<1x1x16xf32, #tpu.memory_space<vmem>>, vector<1x1x16xf32>
    %34 = vector.shape_cast %33 : vector<1x1x16xf32> to vector<1x1x16xf32>
    %35 = vector.broadcast %34 : vector<1x1x16xf32> to vector<1x16x16xf32>
    %cst_29 = arith.constant 0.000000e+00 : f32
    %36 = vector.broadcast %cst_29 : f32 to vector<1x16x16xf32>
    %37 = arith.cmpf oeq, %35, %36 : vector<1x16x16xf32>
    %38 = vector.extract_strided_slice %22 {offsets = [0, 0, 0], sizes = [1, 16, 8], strides = [1, 1, 1]} : vector<1x16x96xbf16> to vector<1x16x8xbf16>
    %39 = vector.extract_strided_slice %22 {offsets = [0, 0, 32], sizes = [1, 16, 8], strides = [1, 1, 1]} : vector<1x16x96xbf16> to vector<1x16x8xbf16>
    %40 = vector.extract_strided_slice %22 {offsets = [0, 0, 64], sizes = [1, 16, 8], strides = [1, 1, 1]} : vector<1x16x96xbf16> to vector<1x16x8xbf16>
    %41 = vector.extract_strided_slice %27 {offsets = [0, 0, 0], sizes = [1, 16, 8], strides = [1, 1, 1]} : vector<1x16x96xbf16> to vector<1x16x8xbf16>
    %42 = vector.extract_strided_slice %27 {offsets = [0, 0, 32], sizes = [1, 16, 8], strides = [1, 1, 1]} : vector<1x16x96xbf16> to vector<1x16x8xbf16>
    %43 = vector.extract_strided_slice %27 {offsets = [0, 0, 64], sizes = [1, 16, 8], strides = [1, 1, 1]} : vector<1x16x96xbf16> to vector<1x16x8xbf16>
    "tpu.trace_start"() <{level = 10 : i32, message = "bnd,bld->bnl"}> : () -> ()
    %cst_30 = arith.constant dense<0.000000e+00> : vector<1x16x16xf32>
    %44 = tpu.matmul %39, %41, %cst_30 {dimension_numbers = #tpu.dot_dimension_numbers<[2], [2], [1], [1], [0, 0, 0, 1, 1, 1], [0], [0]>} : vector<1x16x8xbf16>, vector<1x16x8xbf16>, vector<1x16x16xf32> -> vector<1x16x16xf32>
    %cst_31 = arith.constant -1.000000e+09 : f32
    "tpu.trace_stop"() : () -> ()
    %45 = vector.broadcast %cst_31 : f32 to vector<1x16x16xf32>
    %46 = arith.select %32, %45, %44 : vector<1x16x16xi1>, vector<1x16x16xf32>
    %cst_32 = arith.constant dense<0xFF800000> : vector<1x16xf32>
    %47 = vector.multi_reduction <maximumf>, %46, %cst_32 [2] : vector<1x16x16xf32> to vector<1x16xf32>
    %48 = vector.shape_cast %47 : vector<1x16xf32> to vector<1x16x1xf32>
    %49 = vector.broadcast %48 : vector<1x16x1xf32> to vector<1x16x16xf32>
    %50 = arith.subf %46, %49 : vector<1x16x16xf32>
    %51 = math.exp %50 : vector<1x16x16xf32>
    %cst_33 = arith.constant dense<0.000000e+00> : vector<1x16xf32>
    %52 = vector.multi_reduction <add>, %51, %cst_33 [2] : vector<1x16x16xf32> to vector<1x16xf32>
    %53 = vector.shape_cast %52 : vector<1x16xf32> to vector<1x16x1xf32>
    %54 = tpu.reciprocal %53 {approx = true} : vector<1x16x1xf32> -> vector<1x16x1xf32>
    %55 = vector.broadcast %54 : vector<1x16x1xf32> to vector<1x16x16xf32>
    %56 = arith.mulf %51, %55 : vector<1x16x16xf32>
    %57 = arith.truncf %56 : vector<1x16x16xf32> to vector<1x16x16xbf16>
    "tpu.trace_start"() <{level = 10 : i32, message = "bnl,bld->bnd"}> : () -> ()
    %cst_34 = arith.constant dense<0.000000e+00> : vector<1x16x8xf32>
    %58 = tpu.matmul %57, %43, %cst_34 {dimension_numbers = #tpu.dot_dimension_numbers<[2], [1], [1], [2], [0, 0, 0, 1, 1, 2], [0], [0]>} : vector<1x16x16xbf16>, vector<1x16x8xbf16>, vector<1x16x8xf32> -> vector<1x16x8xf32>
    "tpu.trace_stop"() : () -> ()
    %59 = arith.truncf %58 : vector<1x16x8xf32> to vector<1x16x8xbf16>
    %c0_35 = arith.constant 0 : index
    %c0_36 = arith.constant 0 : index
    %c0_37 = arith.constant 0 : index
    %60 = vector.load %arg19[%c0_35, %c0_36, %c0_37] : memref<1x16x32xbf16, #tpu.memory_space<vmem>>, vector<1x16x8xbf16>
    tpu.vector_store %arg19[%c0_35, %c0_36, %c0_37], %59 {strides = array<i32>} : memref<1x16x32xbf16, #tpu.memory_space<vmem>>, vector<1x16x8xbf16>,
    "tpu.trace_start"() <{level = 10 : i32, message = "bld,bnd->bln"}> : () -> ()
    %cst_38 = arith.constant dense<0.000000e+00> : vector<1x16x16xf32>
    %61 = tpu.matmul %42, %38, %cst_38 {dimension_numbers = #tpu.dot_dimension_numbers<[2], [2], [1], [1], [0, 0, 0, 1, 1, 1], [0], [0]>} : vector<1x16x8xbf16>, vector<1x16x8xbf16>, vector<1x16x16xf32> -> vector<1x16x16xf32>
    %cst_39 = arith.constant -1.000000e+09 : f32
    "tpu.trace_stop"() : () -> ()
    %62 = vector.broadcast %cst_39 : f32 to vector<1x16x16xf32>
    %63 = arith.select %37, %62, %61 : vector<1x16x16xi1>, vector<1x16x16xf32>
    %cst_40 = arith.constant dense<0xFF800000> : vector<1x16xf32>
    %64 = vector.multi_reduction <maximumf>, %63, %cst_40 [2] : vector<1x16x16xf32> to vector<1x16xf32>
    %65 = vector.shape_cast %64 : vector<1x16xf32> to vector<1x16x1xf32>
    %66 = vector.broadcast %65 : vector<1x16x1xf32> to vector<1x16x16xf32>
    %67 = arith.subf %63, %66 : vector<1x16x16xf32>
    %68 = math.exp %67 : vector<1x16x16xf32>
    %cst_41 = arith.constant dense<0.000000e+00> : vector<1x16xf32>
    %69 = vector.multi_reduction <add>, %68, %cst_41 [2] : vector<1x16x16xf32> to vector<1x16xf32>
    %70 = vector.shape_cast %69 : vector<1x16xf32> to vector<1x16x1xf32>
    %71 = tpu.reciprocal %70 {approx = true} : vector<1x16x1xf32> -> vector<1x16x1xf32>
    %72 = vector.broadcast %71 : vector<1x16x1xf32> to vector<1x16x16xf32>
    %73 = arith.mulf %68, %72 : vector<1x16x16xf32>
    %74 = arith.truncf %73 : vector<1x16x16xf32> to vector<1x16x16xbf16>
    "tpu.trace_start"() <{level = 10 : i32, message = "bln,bnd->bld"}> : () -> ()
    %cst_42 = arith.constant dense<0.000000e+00> : vector<1x16x8xf32>
    %75 = tpu.matmul %74, %40, %cst_42 {dimension_numbers = #tpu.dot_dimension_numbers<[2], [1], [1], [2], [0, 0, 0, 1, 1, 2], [0], [0]>} : vector<1x16x16xbf16>, vector<1x16x8xbf16>, vector<1x16x8xf32> -> vector<1x16x8xf32>
    "tpu.trace_stop"() : () -> ()
    %76 = arith.truncf %75 : vector<1x16x8xf32> to vector<1x16x8xbf16>
    %c0_43 = arith.constant 0 : index
    %c0_44 = arith.constant 0 : index
    %c0_45 = arith.constant 0 : index
    %77 = vector.load %arg20[%c0_43, %c0_44, %c0_45] : memref<1x16x32xbf16, #tpu.memory_space<vmem>>, vector<1x16x8xbf16>
    tpu.vector_store %arg20[%c0_43, %c0_44, %c0_45], %76 {strides = array<i32>} : memref<1x16x32xbf16, #tpu.memory_space<vmem>>, vector<1x16x8xbf16>,
    %78 = vector.extract_strided_slice %22 {offsets = [0, 0, 8], sizes = [1, 16, 8], strides = [1, 1, 1]} : vector<1x16x96xbf16> to vector<1x16x8xbf16>
    %79 = vector.extract_strided_slice %22 {offsets = [0, 0, 40], sizes = [1, 16, 8], strides = [1, 1, 1]} : vector<1x16x96xbf16> to vector<1x16x8xbf16>
    %80 = vector.extract_strided_slice %22 {offsets = [0, 0, 72], sizes = [1, 16, 8], strides = [1, 1, 1]} : vector<1x16x96xbf16> to vector<1x16x8xbf16>
    %81 = vector.extract_strided_slice %27 {offsets = [0, 0, 8], sizes = [1, 16, 8], strides = [1, 1, 1]} : vector<1x16x96xbf16> to vector<1x16x8xbf16>
    %82 = vector.extract_strided_slice %27 {offsets = [0, 0, 40], sizes = [1, 16, 8], strides = [1, 1, 1]} : vector<1x16x96xbf16> to vector<1x16x8xbf16>
    %83 = vector.extract_strided_slice %27 {offsets = [0, 0, 72], sizes = [1, 16, 8], strides = [1, 1, 1]} : vector<1x16x96xbf16> to vector<1x16x8xbf16>
    "tpu.trace_start"() <{level = 10 : i32, message = "bnd,bld->bnl"}> : () -> ()
    %cst_46 = arith.constant dense<0.000000e+00> : vector<1x16x16xf32>
    %84 = tpu.matmul %79, %81, %cst_46 {dimension_numbers = #tpu.dot_dimension_numbers<[2], [2], [1], [1], [0, 0, 0, 1, 1, 1], [0], [0]>} : vector<1x16x8xbf16>, vector<1x16x8xbf16>, vector<1x16x16xf32> -> vector<1x16x16xf32>
    %cst_47 = arith.constant -1.000000e+09 : f32
    "tpu.trace_stop"() : () -> ()
    %85 = vector.broadcast %cst_47 : f32 to vector<1x16x16xf32>
    %86 = arith.select %32, %85, %84 : vector<1x16x16xi1>, vector<1x16x16xf32>
    %cst_48 = arith.constant dense<0xFF800000> : vector<1x16xf32>
    %87 = vector.multi_reduction <maximumf>, %86, %cst_48 [2] : vector<1x16x16xf32> to vector<1x16xf32>
    %88 = vector.shape_cast %87 : vector<1x16xf32> to vector<1x16x1xf32>
    %89 = vector.broadcast %88 : vector<1x16x1xf32> to vector<1x16x16xf32>
    %90 = arith.subf %86, %89 : vector<1x16x16xf32>
    %91 = math.exp %90 : vector<1x16x16xf32>
    %cst_49 = arith.constant dense<0.000000e+00> : vector<1x16xf32>
    %92 = vector.multi_reduction <add>, %91, %cst_49 [2] : vector<1x16x16xf32> to vector<1x16xf32>
    %93 = vector.shape_cast %92 : vector<1x16xf32> to vector<1x16x1xf32>
    %94 = tpu.reciprocal %93 {approx = true} : vector<1x16x1xf32> -> vector<1x16x1xf32>
    %95 = vector.broadcast %94 : vector<1x16x1xf32> to vector<1x16x16xf32>
    %96 = arith.mulf %91, %95 : vector<1x16x16xf32>
    %97 = arith.truncf %96 : vector<1x16x16xf32> to vector<1x16x16xbf16>
    "tpu.trace_start"() <{level = 10 : i32, message = "bnl,bld->bnd"}> : () -> ()
    %cst_50 = arith.constant dense<0.000000e+00> : vector<1x16x8xf32>
    %98 = tpu.matmul %97, %83, %cst_50 {dimension_numbers = #tpu.dot_dimension_numbers<[2], [1], [1], [2], [0, 0, 0, 1, 1, 2], [0], [0]>} : vector<1x16x16xbf16>, vector<1x16x8xbf16>, vector<1x16x8xf32> -> vector<1x16x8xf32>
    "tpu.trace_stop"() : () -> ()
    %99 = arith.truncf %98 : vector<1x16x8xf32> to vector<1x16x8xbf16>
    %c0_51 = arith.constant 0 : index
    %c0_52 = arith.constant 0 : index
    %c8 = arith.constant 8 : index
    %100 = vector.load %arg19[%c0_51, %c0_52, %c8] : memref<1x16x32xbf16, #tpu.memory_space<vmem>>, vector<1x16x8xbf16>
    tpu.vector_store %arg19[%c0_51, %c0_52, %c8], %99 {strides = array<i32>} : memref<1x16x32xbf16, #tpu.memory_space<vmem>>, vector<1x16x8xbf16>,
    "tpu.trace_start"() <{level = 10 : i32, message = "bld,bnd->bln"}> : () -> ()
    %cst_53 = arith.constant dense<0.000000e+00> : vector<1x16x16xf32>
    %101 = tpu.matmul %82, %78, %cst_53 {dimension_numbers = #tpu.dot_dimension_numbers<[2], [2], [1], [1], [0, 0, 0, 1, 1, 1], [0], [0]>} : vector<1x16x8xbf16>, vector<1x16x8xbf16>, vector<1x16x16xf32> -> vector<1x16x16xf32>
    %cst_54 = arith.constant -1.000000e+09 : f32
    "tpu.trace_stop"() : () -> ()
    %102 = vector.broadcast %cst_54 : f32 to vector<1x16x16xf32>
    %103 = arith.select %37, %102, %101 : vector<1x16x16xi1>, vector<1x16x16xf32>
    %cst_55 = arith.constant dense<0xFF800000> : vector<1x16xf32>
    %104 = vector.multi_reduction <maximumf>, %103, %cst_55 [2] : vector<1x16x16xf32> to vector<1x16xf32>
    %105 = vector.shape_cast %104 : vector<1x16xf32> to vector<1x16x1xf32>
    %106 = vector.broadcast %105 : vector<1x16x1xf32> to vector<1x16x16xf32>
    %107 = arith.subf %103, %106 : vector<1x16x16xf32>
    %108 = math.exp %107 : vector<1x16x16xf32>
    %cst_56 = arith.constant dense<0.000000e+00> : vector<1x16xf32>
    %109 = vector.multi_reduction <add>, %108, %cst_56 [2] : vector<1x16x16xf32> to vector<1x16xf32>
    %110 = vector.shape_cast %109 : vector<1x16xf32> to vector<1x16x1xf32>
    %111 = tpu.reciprocal %110 {approx = true} : vector<1x16x1xf32> -> vector<1x16x1xf32>
    %112 = vector.broadcast %111 : vector<1x16x1xf32> to vector<1x16x16xf32>
    %113 = arith.mulf %108, %112 : vector<1x16x16xf32>
    %114 = arith.truncf %113 : vector<1x16x16xf32> to vector<1x16x16xbf16>
    "tpu.trace_start"() <{level = 10 : i32, message = "bln,bnd->bld"}> : () -> ()
    %cst_57 = arith.constant dense<0.000000e+00> : vector<1x16x8xf32>
    %115 = tpu.matmul %114, %80, %cst_57 {dimension_numbers = #tpu.dot_dimension_numbers<[2], [1], [1], [2], [0, 0, 0, 1, 1, 2], [0], [0]>} : vector<1x16x16xbf16>, vector<1x16x8xbf16>, vector<1x16x8xf32> -> vector<1x16x8xf32>
    "tpu.trace_stop"() : () -> ()
    %116 = arith.truncf %115 : vector<1x16x8xf32> to vector<1x16x8xbf16>
    %c0_58 = arith.constant 0 : index
    %c0_59 = arith.constant 0 : index
    %c8_60 = arith.constant 8 : index
    %117 = vector.load %arg20[%c0_58, %c0_59, %c8_60] : memref<1x16x32xbf16, #tpu.memory_space<vmem>>, vector<1x16x8xbf16>
    tpu.vector_store %arg20[%c0_58, %c0_59, %c8_60], %116 {strides = array<i32>} : memref<1x16x32xbf16, #tpu.memory_space<vmem>>, vector<1x16x8xbf16>,
    %118 = vector.extract_strided_slice %22 {offsets = [0, 0, 16], sizes = [1, 16, 8], strides = [1, 1, 1]} : vector<1x16x96xbf16> to vector<1x16x8xbf16>
    %119 = vector.extract_strided_slice %22 {offsets = [0, 0, 48], sizes = [1, 16, 8], strides = [1, 1, 1]} : vector<1x16x96xbf16> to vector<1x16x8xbf16>
    %120 = vector.extract_strided_slice %22 {offsets = [0, 0, 80], sizes = [1, 16, 8], strides = [1, 1, 1]} : vector<1x16x96xbf16> to vector<1x16x8xbf16>
    %121 = vector.extract_strided_slice %27 {offsets = [0, 0, 16], sizes = [1, 16, 8], strides = [1, 1, 1]} : vector<1x16x96xbf16> to vector<1x16x8xbf16>
    %122 = vector.extract_strided_slice %27 {offsets = [0, 0, 48], sizes = [1, 16, 8], strides = [1, 1, 1]} : vector<1x16x96xbf16> to vector<1x16x8xbf16>
    %123 = vector.extract_strided_slice %27 {offsets = [0, 0, 80], sizes = [1, 16, 8], strides = [1, 1, 1]} : vector<1x16x96xbf16> to vector<1x16x8xbf16>
    "tpu.trace_start"() <{level = 10 : i32, message = "bnd,bld->bnl"}> : () -> ()
    %cst_61 = arith.constant dense<0.000000e+00> : vector<1x16x16xf32>
    %124 = tpu.matmul %119, %121, %cst_61 {dimension_numbers = #tpu.dot_dimension_numbers<[2], [2], [1], [1], [0, 0, 0, 1, 1, 1], [0], [0]>} : vector<1x16x8xbf16>, vector<1x16x8xbf16>, vector<1x16x16xf32> -> vector<1x16x16xf32>
    %cst_62 = arith.constant -1.000000e+09 : f32
    "tpu.trace_stop"() : () -> ()
    %125 = vector.broadcast %cst_62 : f32 to vector<1x16x16xf32>
    %126 = arith.select %32, %125, %124 : vector<1x16x16xi1>, vector<1x16x16xf32>
    %cst_63 = arith.constant dense<0xFF800000> : vector<1x16xf32>
    %127 = vector.multi_reduction <maximumf>, %126, %cst_63 [2] : vector<1x16x16xf32> to vector<1x16xf32>
    %128 = vector.shape_cast %127 : vector<1x16xf32> to vector<1x16x1xf32>
    %129 = vector.broadcast %128 : vector<1x16x1xf32> to vector<1x16x16xf32>
    %130 = arith.subf %126, %129 : vector<1x16x16xf32>
    %131 = math.exp %130 : vector<1x16x16xf32>
    %cst_64 = arith.constant dense<0.000000e+00> : vector<1x16xf32>
    %132 = vector.multi_reduction <add>, %131, %cst_64 [2] : vector<1x16x16xf32> to vector<1x16xf32>
    %133 = vector.shape_cast %132 : vector<1x16xf32> to vector<1x16x1xf32>
    %134 = tpu.reciprocal %133 {approx = true} : vector<1x16x1xf32> -> vector<1x16x1xf32>
    %135 = vector.broadcast %134 : vector<1x16x1xf32> to vector<1x16x16xf32>
    %136 = arith.mulf %131, %135 : vector<1x16x16xf32>
    %137 = arith.truncf %136 : vector<1x16x16xf32> to vector<1x16x16xbf16>
    "tpu.trace_start"() <{level = 10 : i32, message = "bnl,bld->bnd"}> : () -> ()
    %cst_65 = arith.constant dense<0.000000e+00> : vector<1x16x8xf32>
    %138 = tpu.matmul %137, %123, %cst_65 {dimension_numbers = #tpu.dot_dimension_numbers<[2], [1], [1], [2], [0, 0, 0, 1, 1, 2], [0], [0]>} : vector<1x16x16xbf16>, vector<1x16x8xbf16>, vector<1x16x8xf32> -> vector<1x16x8xf32>
    "tpu.trace_stop"() : () -> ()
    %139 = arith.truncf %138 : vector<1x16x8xf32> to vector<1x16x8xbf16>
    %c0_66 = arith.constant 0 : index
    %c0_67 = arith.constant 0 : index
    %c16 = arith.constant 16 : index
    %140 = vector.load %arg19[%c0_66, %c0_67, %c16] : memref<1x16x32xbf16, #tpu.memory_space<vmem>>, vector<1x16x8xbf16>
    tpu.vector_store %arg19[%c0_66, %c0_67, %c16], %139 {strides = array<i32>} : memref<1x16x32xbf16, #tpu.memory_space<vmem>>, vector<1x16x8xbf16>,
    "tpu.trace_start"() <{level = 10 : i32, message = "bld,bnd->bln"}> : () -> ()
    %cst_68 = arith.constant dense<0.000000e+00> : vector<1x16x16xf32>
    %141 = tpu.matmul %122, %118, %cst_68 {dimension_numbers = #tpu.dot_dimension_numbers<[2], [2], [1], [1], [0, 0, 0, 1, 1, 1], [0], [0]>} : vector<1x16x8xbf16>, vector<1x16x8xbf16>, vector<1x16x16xf32> -> vector<1x16x16xf32>
    %cst_69 = arith.constant -1.000000e+09 : f32
    "tpu.trace_stop"() : () -> ()
    %142 = vector.broadcast %cst_69 : f32 to vector<1x16x16xf32>
    %143 = arith.select %37, %142, %141 : vector<1x16x16xi1>, vector<1x16x16xf32>
    %cst_70 = arith.constant dense<0xFF800000> : vector<1x16xf32>
    %144 = vector.multi_reduction <maximumf>, %143, %cst_70 [2] : vector<1x16x16xf32> to vector<1x16xf32>
    %145 = vector.shape_cast %144 : vector<1x16xf32> to vector<1x16x1xf32>
    %146 = vector.broadcast %145 : vector<1x16x1xf32> to vector<1x16x16xf32>
    %147 = arith.subf %143, %146 : vector<1x16x16xf32>
    %148 = math.exp %147 : vector<1x16x16xf32>
    %cst_71 = arith.constant dense<0.000000e+00> : vector<1x16xf32>
    %149 = vector.multi_reduction <add>, %148, %cst_71 [2] : vector<1x16x16xf32> to vector<1x16xf32>
    %150 = vector.shape_cast %149 : vector<1x16xf32> to vector<1x16x1xf32>
    %151 = tpu.reciprocal %150 {approx = true} : vector<1x16x1xf32> -> vector<1x16x1xf32>
    %152 = vector.broadcast %151 : vector<1x16x1xf32> to vector<1x16x16xf32>
    %153 = arith.mulf %148, %152 : vector<1x16x16xf32>
    %154 = arith.truncf %153 : vector<1x16x16xf32> to vector<1x16x16xbf16>
    "tpu.trace_start"() <{level = 10 : i32, message = "bln,bnd->bld"}> : () -> ()
    %cst_72 = arith.constant dense<0.000000e+00> : vector<1x16x8xf32>
    %155 = tpu.matmul %154, %120, %cst_72 {dimension_numbers = #tpu.dot_dimension_numbers<[2], [1], [1], [2], [0, 0, 0, 1, 1, 2], [0], [0]>} : vector<1x16x16xbf16>, vector<1x16x8xbf16>, vector<1x16x8xf32> -> vector<1x16x8xf32>
    "tpu.trace_stop"() : () -> ()
    %156 = arith.truncf %155 : vector<1x16x8xf32> to vector<1x16x8xbf16>
    %c0_73 = arith.constant 0 : index
    %c0_74 = arith.constant 0 : index
    %c16_75 = arith.constant 16 : index
    %157 = vector.load %arg20[%c0_73, %c0_74, %c16_75] : memref<1x16x32xbf16, #tpu.memory_space<vmem>>, vector<1x16x8xbf16>
    tpu.vector_store %arg20[%c0_73, %c0_74, %c16_75], %156 {strides = array<i32>} : memref<1x16x32xbf16, #tpu.memory_space<vmem>>, vector<1x16x8xbf16>,
    %158 = vector.extract_strided_slice %22 {offsets = [0, 0, 24], sizes = [1, 16, 8], strides = [1, 1, 1]} : vector<1x16x96xbf16> to vector<1x16x8xbf16>
    %159 = vector.extract_strided_slice %22 {offsets = [0, 0, 56], sizes = [1, 16, 8], strides = [1, 1, 1]} : vector<1x16x96xbf16> to vector<1x16x8xbf16>
    %160 = vector.extract_strided_slice %22 {offsets = [0, 0, 88], sizes = [1, 16, 8], strides = [1, 1, 1]} : vector<1x16x96xbf16> to vector<1x16x8xbf16>
    %161 = vector.extract_strided_slice %27 {offsets = [0, 0, 24], sizes = [1, 16, 8], strides = [1, 1, 1]} : vector<1x16x96xbf16> to vector<1x16x8xbf16>
    %162 = vector.extract_strided_slice %27 {offsets = [0, 0, 56], sizes = [1, 16, 8], strides = [1, 1, 1]} : vector<1x16x96xbf16> to vector<1x16x8xbf16>
    %163 = vector.extract_strided_slice %27 {offsets = [0, 0, 88], sizes = [1, 16, 8], strides = [1, 1, 1]} : vector<1x16x96xbf16> to vector<1x16x8xbf16>
    "tpu.trace_start"() <{level = 10 : i32, message = "bnd,bld->bnl"}> : () -> ()
    %cst_76 = arith.constant dense<0.000000e+00> : vector<1x16x16xf32>
    %164 = tpu.matmul %159, %161, %cst_76 {dimension_numbers = #tpu.dot_dimension_numbers<[2], [2], [1], [1], [0, 0, 0, 1, 1, 1], [0], [0]>} : vector<1x16x8xbf16>, vector<1x16x8xbf16>, vector<1x16x16xf32> -> vector<1x16x16xf32>
    %cst_77 = arith.constant -1.000000e+09 : f32
    "tpu.trace_stop"() : () -> ()
    %165 = vector.broadcast %cst_77 : f32 to vector<1x16x16xf32>
    %166 = arith.select %32, %165, %164 : vector<1x16x16xi1>, vector<1x16x16xf32>
    %cst_78 = arith.constant dense<0xFF800000> : vector<1x16xf32>
    %167 = vector.multi_reduction <maximumf>, %166, %cst_78 [2] : vector<1x16x16xf32> to vector<1x16xf32>
    %168 = vector.shape_cast %167 : vector<1x16xf32> to vector<1x16x1xf32>
    %169 = vector.broadcast %168 : vector<1x16x1xf32> to vector<1x16x16xf32>
    %170 = arith.subf %166, %169 : vector<1x16x16xf32>
    %171 = math.exp %170 : vector<1x16x16xf32>
    %cst_79 = arith.constant dense<0.000000e+00> : vector<1x16xf32>
    %172 = vector.multi_reduction <add>, %171, %cst_79 [2] : vector<1x16x16xf32> to vector<1x16xf32>
    %173 = vector.shape_cast %172 : vector<1x16xf32> to vector<1x16x1xf32>
    %174 = tpu.reciprocal %173 {approx = true} : vector<1x16x1xf32> -> vector<1x16x1xf32>
    %175 = vector.broadcast %174 : vector<1x16x1xf32> to vector<1x16x16xf32>
    %176 = arith.mulf %171, %175 : vector<1x16x16xf32>
    %177 = arith.truncf %176 : vector<1x16x16xf32> to vector<1x16x16xbf16>
    "tpu.trace_start"() <{level = 10 : i32, message = "bnl,bld->bnd"}> : () -> ()
    %cst_80 = arith.constant dense<0.000000e+00> : vector<1x16x8xf32>
    %178 = tpu.matmul %177, %163, %cst_80 {dimension_numbers = #tpu.dot_dimension_numbers<[2], [1], [1], [2], [0, 0, 0, 1, 1, 2], [0], [0]>} : vector<1x16x16xbf16>, vector<1x16x8xbf16>, vector<1x16x8xf32> -> vector<1x16x8xf32>
    "tpu.trace_stop"() : () -> ()
    %179 = arith.truncf %178 : vector<1x16x8xf32> to vector<1x16x8xbf16>
    %c0_81 = arith.constant 0 : index
    %c0_82 = arith.constant 0 : index
    %c24 = arith.constant 24 : index
    %180 = vector.load %arg19[%c0_81, %c0_82, %c24] : memref<1x16x32xbf16, #tpu.memory_space<vmem>>, vector<1x16x8xbf16>
    tpu.vector_store %arg19[%c0_81, %c0_82, %c24], %179 {strides = array<i32>} : memref<1x16x32xbf16, #tpu.memory_space<vmem>>, vector<1x16x8xbf16>,
    "tpu.trace_start"() <{level = 10 : i32, message = "bld,bnd->bln"}> : () -> ()
    %cst_83 = arith.constant dense<0.000000e+00> : vector<1x16x16xf32>
    %181 = tpu.matmul %162, %158, %cst_83 {dimension_numbers = #tpu.dot_dimension_numbers<[2], [2], [1], [1], [0, 0, 0, 1, 1, 1], [0], [0]>} : vector<1x16x8xbf16>, vector<1x16x8xbf16>, vector<1x16x16xf32> -> vector<1x16x16xf32>
    %cst_84 = arith.constant -1.000000e+09 : f32
    "tpu.trace_stop"() : () -> ()
    %182 = vector.broadcast %cst_84 : f32 to vector<1x16x16xf32>
    %183 = arith.select %37, %182, %181 : vector<1x16x16xi1>, vector<1x16x16xf32>
    %cst_85 = arith.constant dense<0xFF800000> : vector<1x16xf32>
    %184 = vector.multi_reduction <maximumf>, %183, %cst_85 [2] : vector<1x16x16xf32> to vector<1x16xf32>
    %185 = vector.shape_cast %184 : vector<1x16xf32> to vector<1x16x1xf32>
    %186 = vector.broadcast %185 : vector<1x16x1xf32> to vector<1x16x16xf32>
    %187 = arith.subf %183, %186 : vector<1x16x16xf32>
    %188 = math.exp %187 : vector<1x16x16xf32>
    %cst_86 = arith.constant dense<0.000000e+00> : vector<1x16xf32>
    %189 = vector.multi_reduction <add>, %188, %cst_86 [2] : vector<1x16x16xf32> to vector<1x16xf32>
    %190 = vector.shape_cast %189 : vector<1x16xf32> to vector<1x16x1xf32>
    %191 = tpu.reciprocal %190 {approx = true} : vector<1x16x1xf32> -> vector<1x16x1xf32>
    %192 = vector.broadcast %191 : vector<1x16x1xf32> to vector<1x16x16xf32>
    %193 = arith.mulf %188, %192 : vector<1x16x16xf32>
    %194 = arith.truncf %193 : vector<1x16x16xf32> to vector<1x16x16xbf16>
    "tpu.trace_start"() <{level = 10 : i32, message = "bln,bnd->bld"}> : () -> ()
    %cst_87 = arith.constant dense<0.000000e+00> : vector<1x16x8xf32>
    %195 = tpu.matmul %194, %160, %cst_87 {dimension_numbers = #tpu.dot_dimension_numbers<[2], [1], [1], [2], [0, 0, 0, 1, 1, 2], [0], [0]>} : vector<1x16x16xbf16>, vector<1x16x8xbf16>, vector<1x16x8xf32> -> vector<1x16x8xf32>
    "tpu.trace_stop"() : () -> ()
    %196 = arith.truncf %195 : vector<1x16x8xf32> to vector<1x16x8xbf16>
    %c0_88 = arith.constant 0 : index
    %c0_89 = arith.constant 0 : index
    %c24_90 = arith.constant 24 : index
    %197 = vector.load %arg20[%c0_88, %c0_89, %c24_90] : memref<1x16x32xbf16, #tpu.memory_space<vmem>>, vector<1x16x8xbf16>
    tpu.vector_store %arg20[%c0_88, %c0_89, %c24_90], %196 {strides = array<i32>} : memref<1x16x32xbf16, #tpu.memory_space<vmem>>, vector<1x16x8xbf16>,
    %c0_91 = arith.constant 0 : index
    %c0_92 = arith.constant 0 : index
    %c0_93 = arith.constant 0 : index
    %198 = vector.load %arg19[%c0_91, %c0_92, %c0_93] : memref<1x16x32xbf16, #tpu.memory_space<vmem>>, vector<1x16x32xbf16>
    %199 = vector.shape_cast %198 : vector<1x16x32xbf16> to vector<16x32xbf16>
    %c0_94 = arith.constant 0 : index
    %c0_95 = arith.constant 0 : index
    %c0_96 = arith.constant 0 : index
    %200 = vector.load %arg20[%c0_94, %c0_95, %c0_96] : memref<1x16x32xbf16, #tpu.memory_space<vmem>>, vector<1x16x32xbf16>
    %201 = vector.shape_cast %200 : vector<1x16x32xbf16> to vector<16x32xbf16>
    %c0_97 = arith.constant 0 : index
    %c0_98 = arith.constant 0 : index
    %202 = vector.load %arg11[%c0_97, %c0_98] : memref<32x128xbf16, #tpu.memory_space<vmem>>, vector<32x128xbf16>
    %cst_99 = arith.constant dense<0.000000e+00> : vector<16x128xf32>
    %203 = tpu.matmul %1, %202, %cst_99 {dimension_numbers = #tpu.dot_dimension_numbers<[1], [0], [0], [1], [0, 0, 1, 1], [], []>} : vector<16x32xbf16>, vector<32x128xbf16>, vector<16x128xf32> -> vector<16x128xf32>
    %c0_100 = arith.constant 0 : index
    %c0_101 = arith.constant 0 : index
    %204 = vector.load %arg12[%c0_100, %c0_101] : memref<32x128xbf16, #tpu.memory_space<vmem>>, vector<32x128xbf16>
    %cst_102 = arith.constant dense<0.000000e+00> : vector<16x128xf32>
    %205 = tpu.matmul %199, %204, %cst_102 {dimension_numbers = #tpu.dot_dimension_numbers<[1], [0], [0], [1], [0, 0, 1, 1], [], []>} : vector<16x32xbf16>, vector<32x128xbf16>, vector<16x128xf32> -> vector<16x128xf32>
    %206 = arith.addf %203, %205 : vector<16x128xf32>
    %c0_103 = arith.constant 0 : index
    %c0_104 = arith.constant 0 : index
    %207 = vector.load %arg13[%c0_103, %c0_104] : memref<1x128xf32, #tpu.memory_space<vmem>>, vector<1x128xf32>
    %208 = vector.broadcast %207 : vector<1x128xf32> to vector<16x128xf32>
    %209 = arith.addf %206, %208 : vector<16x128xf32>
    %c0_105 = arith.constant 0 : index
    %c0_106 = arith.constant 0 : index
    %210 = vector.load %arg14[%c0_105, %c0_106] : memref<32x128xbf16, #tpu.memory_space<vmem>>, vector<32x128xbf16>
    %cst_107 = arith.constant dense<0.000000e+00> : vector<16x128xf32>
    %211 = tpu.matmul %3, %210, %cst_107 {dimension_numbers = #tpu.dot_dimension_numbers<[1], [0], [0], [1], [0, 0, 1, 1], [], []>} : vector<16x32xbf16>, vector<32x128xbf16>, vector<16x128xf32> -> vector<16x128xf32>
    %c0_108 = arith.constant 0 : index
    %c0_109 = arith.constant 0 : index
    %212 = vector.load %arg15[%c0_108, %c0_109] : memref<32x128xbf16, #tpu.memory_space<vmem>>, vector<32x128xbf16>
    %cst_110 = arith.constant dense<0.000000e+00> : vector<16x128xf32>
    %213 = tpu.matmul %201, %212, %cst_110 {dimension_numbers = #tpu.dot_dimension_numbers<[1], [0], [0], [1], [0, 0, 1, 1], [], []>} : vector<16x32xbf16>, vector<32x128xbf16>, vector<16x128xf32> -> vector<16x128xf32>
    %214 = arith.addf %211, %213 : vector<16x128xf32>
    %c0_111 = arith.constant 0 : index
    %c0_112 = arith.constant 0 : index
    %215 = vector.load %arg16[%c0_111, %c0_112] : memref<1x128xf32, #tpu.memory_space<vmem>>, vector<1x128xf32>
    %216 = vector.broadcast %215 : vector<1x128xf32> to vector<16x128xf32>
    %217 = arith.addf %214, %216 : vector<16x128xf32>
    %218 = vector.shape_cast %209 : vector<16x128xf32> to vector<1x16x128xf32>
    %c0_113 = arith.constant 0 : index
    %c0_114 = arith.constant 0 : index
    %c0_115 = arith.constant 0 : index
    %219 = vector.load %arg17[%c0_113, %c0_114, %c0_115] : memref<1x16x128xf32, #tpu.memory_space<vmem>>, vector<1x16x128xf32>
    tpu.vector_store %arg17[%c0_113, %c0_114, %c0_115], %218 {strides = array<i32>} : memref<1x16x128xf32, #tpu.memory_space<vmem>>, vector<1x16x128xf32>,
    %220 = vector.shape_cast %217 : vector<16x128xf32> to vector<1x16x128xf32>
    %c0_116 = arith.constant 0 : index
    %c0_117 = arith.constant 0 : index
    %c0_118 = arith.constant 0 : index
    %221 = vector.load %arg18[%c0_116, %c0_117, %c0_118] : memref<1x16x128xf32, #tpu.memory_space<vmem>>, vector<1x16x128xf32>
    tpu.vector_store %arg18[%c0_116, %c0_117, %c0_118], %220 {strides = array<i32>} : memref<1x16x128xf32, #tpu.memory_space<vmem>>, vector<1x16x128xf32>,
    return
  }
  func.func @transform_0(%arg0: i32) -> (i32, i32, i32) {
    %c0_i32 = arith.constant 0 : i32
    %c0_i32_0 = arith.constant 0 : i32
    %c0_i32_1 = arith.constant 0 : i32
    return %arg0, %c0_i32, %c0_i32_0 : i32, i32, i32
  }
  func.func @transform_1(%arg0: i32) -> (i32, i32, i32) {
    %c0_i32 = arith.constant 0 : i32
    %c0_i32_0 = arith.constant 0 : i32
    %c0_i32_1 = arith.constant 0 : i32
    return %arg0, %c0_i32, %c0_i32_0 : i32, i32, i32
  }
  func.func @transform_2(%arg0: i32) -> (i32, i32, i32) {
    %c0_i32 = arith.constant 0 : i32
    %c0_i32_0 = arith.constant 0 : i32
    %c0_i32_1 = arith.constant 0 : i32
    return %arg0, %c0_i32, %c0_i32_0 : i32, i32, i32
  }
  func.func @transform_3(%arg0: i32) -> (i32, i32, i32) {
    %c0_i32 = arith.constant 0 : i32
    %c0_i32_0 = arith.constant 0 : i32
    %c0_i32_1 = arith.constant 0 : i32
    return %arg0, %c0_i32, %c0_i32_0 : i32, i32, i32
  }
  func.func @transform_4(%arg0: i32) -> (i32, i32, i32) {
    %c0_i32 = arith.constant 0 : i32
    %c0_i32_0 = arith.constant 0 : i32
    %c0_i32_1 = arith.constant 0 : i32
    return %arg0, %c0_i32, %c0_i32_0 : i32, i32, i32
  }
  func.func @transform_5(%arg0: i32) -> (i32, i32, i32) {
    %c0_i32 = arith.constant 0 : i32
    %c0_i32_0 = arith.constant 0 : i32
    %c0_i32_1 = arith.constant 0 : i32
    return %arg0, %c0_i32, %c0_i32_0 : i32, i32, i32
  }
  func.func @transform_6(%arg0: i32) -> (i32, i32) {
    %c0_i32 = arith.constant 0 : i32
    %c0_i32_0 = arith.constant 0 : i32
    %c0_i32_1 = arith.constant 0 : i32
    return %c0_i32, %c0_i32_0 : i32, i32
  }
  func.func @transform_7(%arg0: i32) -> (i32, i32) {
    %c0_i32 = arith.constant 0 : i32
    %c0_i32_0 = arith.constant 0 : i32
    %c0_i32_1 = arith.constant 0 : i32
    return %c0_i32, %c0_i32_0 : i32, i32
  }
  func.func @transform_8(%arg0: i32) -> (i32, i32) {
    %c0_i32 = arith.constant 0 : i32
    %c0_i32_0 = arith.constant 0 : i32
    %c0_i32_1 = arith.constant 0 : i32
    return %c0_i32, %c0_i32_0 : i32, i32
  }
  func.func @transform_9(%arg0: i32) -> (i32, i32) {
    %c0_i32 = arith.constant 0 : i32
    %c0_i32_0 = arith.constant 0 : i32
    %c0_i32_1 = arith.constant 0 : i32
    return %c0_i32, %c0_i32_0 : i32, i32
  }
  func.func @transform_10(%arg0: i32) -> (i32, i32) {
    %c0_i32 = arith.constant 0 : i32
    %c0_i32_0 = arith.constant 0 : i32
    %c0_i32_1 = arith.constant 0 : i32
    return %c0_i32, %c0_i32_0 : i32, i32
  }
  func.func @transform_11(%arg0: i32) -> (i32, i32) {
    %c0_i32 = arith.constant 0 : i32
    %c0_i32_0 = arith.constant 0 : i32
    %c0_i32_1 = arith.constant 0 : i32
    return %c0_i32, %c0_i32_0 : i32, i32
  }
  func.func @transform_12(%arg0: i32) -> (i32, i32) {
    %c0_i32 = arith.constant 0 : i32
    %c0_i32_0 = arith.constant 0 : i32
    %c0_i32_1 = arith.constant 0 : i32
    return %c0_i32, %c0_i32_0 : i32, i32
  }
  func.func @transform_13(%arg0: i32) -> (i32, i32) {
    %c0_i32 = arith.constant 0 : i32
    %c0_i32_0 = arith.constant 0 : i32
    %c0_i32_1 = arith.constant 0 : i32
    return %c0_i32, %c0_i32_0 : i32, i32
  }
  func.func @transform_14(%arg0: i32) -> (i32, i32) {
    %c0_i32 = arith.constant 0 : i32
    %c0_i32_0 = arith.constant 0 : i32
    %c0_i32_1 = arith.constant 0 : i32
    return %c0_i32, %c0_i32_0 : i32, i32
  }
  func.func @transform_15(%arg0: i32) -> (i32, i32) {
    %c0_i32 = arith.constant 0 : i32
    %c0_i32_0 = arith.constant 0 : i32
    %c0_i32_1 = arith.constant 0 : i32
    return %c0_i32, %c0_i32_0 : i32, i32
  }
  func.func @transform_16(%arg0: i32) -> (i32, i32, i32) {
    %c0_i32 = arith.constant 0 : i32
    %c0_i32_0 = arith.constant 0 : i32
    %c0_i32_1 = arith.constant 0 : i32
    return %arg0, %c0_i32, %c0_i32_0 : i32, i32, i32
  }
  func.func @transform_17(%arg0: i32) -> (i32, i32, i32) {
    %c0_i32 = arith.constant 0 : i32
    %c0_i32_0 = arith.constant 0 : i32
    %c0_i32_1 = arith.constant 0 : i32
    return %arg0, %c0_i32, %c0_i32_0 : i32, i32, i32
  }
}

</mosaic_0001>

<bundles_post_ra>
// kernel: tpu_custom_call.1
= control target key start
LH: loop header
LB: loop body
LE: loop exit
PB: predicated region body
PF: predicated region fallthrough
CT: control target
= control target key end

     0   :  { %s4186_s0 = inlined_call_operand.vmem [shape: bf16[2,16,32], index: 0, kind: input, shape index: {}]   ;;  %s4187_s1 = inlined_call_operand.vmem [shape: bf16[2,16,32], index: 1, kind: input, shape index: {}]   ;;  %s4188_s2 = inlined_call_operand.vmem [shape: f32[2,16,1], index: 2, kind: input, shape index: {}]   ;;  %s4189_s3 = inlined_call_operand.hbm [shape: f32[2,1,16], index: 3, kind: input, shape index: {}]   ;;  %s4190_s4 = inlined_call_operand.vmem [shape: f32[2,16,1], index: 4, kind: input, shape index: {}]   ;;  %s4191_s5 = inlined_call_operand.hbm [shape: f32[2,1,16], index: 5, kind: input, shape index: {}]   ;;  %s4192_s6 = inlined_call_operand.vmem [shape: bf16[32,96], index: 6, kind: input, shape index: {}]   ;;  %s4193_s7 = inlined_call_operand.hbm [shape: f32[1,96], index: 7, kind: input, shape index: {}]   ;;  %s4194_s8 = inlined_call_operand.vmem [shape: bf16[32,96], index: 8, kind: input, shape index: {}]   ;;  %s4195_s9 = inlined_call_operand.vmem [shape: f32[1,96], index: 9, kind: input, shape index: {}]   ;;  %s4196_s10 = inlined_call_operand.vmem [shape: bf16[32,128], index: 10, kind: input, shape index: {}]   ;;  %s4197_s11 = inlined_call_operand.hbm [shape: bf16[32,128], index: 11, kind: input, shape index: {}]   ;;  %s4198_s12 = inlined_call_operand.vmem [shape: f32[1,128], index: 12, kind: input, shape index: {}]   ;;  %s4199_s13 = inlined_call_operand.hbm [shape: bf16[32,128], index: 13, kind: input, shape index: {}]   ;;  %s4200_s14 = inlined_call_operand.hbm [shape: bf16[32,128], index: 14, kind: input, shape index: {}]   ;;  %s4201_s15 = inlined_call_operand.vmem [shape: f32[1,128], index: 15, kind: input, shape index: {}]   ;;  %s4202_s16 = inlined_call_operand.hbm [shape: f32[2,16,128], index: 16, kind: output, shape index: {0}]   ;;  %s4203_s17 = inlined_call_operand.hbm [shape: f32[2,16,128], index: 17, kind: output, shape index: {1}]  }
   0x1   :  { %4214 = sst [smem:[#allocation30_spill]] %s4186_s0 }
   0x2   :  { %4215 = sst [smem:[#allocation31_spill]] %s4187_s1 }
   0x3   :  { %4216 = sst [smem:[#allocation32_spill]] %s4189_s3 }
   0x4   :  { %4217 = sst [smem:[#allocation33_spill]] %s4191_s5 }
   0x5   :  { %4218 = sst [smem:[#allocation34_spill]] %s4193_s7 }
   0x6   :  { %4219 = sst [smem:[#allocation35_spill]] %s4197_s11 }
   0x7   :  { %4220 = sst [smem:[#allocation36_spill]] %s4199_s13 }
   0x8   :  { %4221 = sst [smem:[#allocation37_spill]] %s4200_s14 }
   0x9   :  { %4222 = sst [smem:[#allocation38_spill]] %s4201_s15 }
   0xa   :  { %4223 = sst [smem:[#allocation39_spill]] %s4203_s17 }
   0xb   :  { %23 = vsyncpa [#allocation5], 0 }
   0xc   :  { %25 = vsyncpa [#allocation5 + $0x1], 0 }
   0xd   :  { %26 = vsyncpa [#allocation8], 0 }
   0xe   :  { %28 = vsyncpa [#allocation8 + $0x1], 0 }
   0xf   :  { %29 = vsyncpa [#allocation11], 0 }
  0x10   :  { %30 = vsyncpa [#allocation14], 0 }
  0x11   :  { %31 = vsyncpa [#allocation6], 0 }
  0x12   :  { %33 = vsyncpa [#allocation6 + $0x1], 0 }
  0x13   :  { %34 = vsyncpa [#allocation17], 0 }
  0x14   :  { %36 = vsyncpa [#allocation17 + $0x1], 0  ;;  %s3462_s24 = smov 0   ;;  %s3464_s25 = smov 0  }
  0x15   :  { %s3466_s26 = smov 0   ;;  %s3468_s27 = smov 0  }
  0x16 LB: > { %4224 = sst [smem:[#allocation25_spill]] %s3330_s24  ;;  %s3344_s28 = smov [#allocation9]   ;;  %s3342_s27 = sphi %s3468_s27, %s4261_s27   ;;  %s3338_s26 = sphi %s3466_s26, %s4263_s26   ;;  %s3334_s25 = sphi %s3464_s25, %s4265_s25   ;;  %s3330_s24 = sphi %s3462_s24, %s4264_s24  }
  0x17   : > { %4225 = sst [smem:[#allocation26_spill]] %s3338_s26  ;;  %s481_s29 = sshll.u32 %s3344_s28, 4  ;;  %s482_s29 = int_to_ptr.vmem [resolvable:$true] %s481_s29 }
  0x18   : > { %s3483_s0 = sadd.s32 4294967295, %s3342_s27   ;;  %p2564_p0 = scmp.ge.s32.totalorder %s3342_s27, 1 }
  0x19   : > { %p4210_p1 = scmp.eq.s32.totalorder %s3483_s0, 0  ;;  %p465_p2 = scmp.lt.s32.totalorder %s3342_s27, 3 }
  0x1a   : > { %s3345_s18 = smov [#allocation10]   ;;  %s3346_s20 = smov [#allocation12]  }
  0x1b   : > { %p3488_p3 = pnand %p2564_p0, %p465_p2  ;;  %s500_s19 = sshll.u32 %s3345_s18, 4  ;;  %s3495_s19 = int_to_ptr.vmem [resolvable:$true] %s500_s19 }
  0x1c   : > { %s516_s21 = sshll.u32 %s3346_s20, 4  ;;  %s3083_s22 = scalar_lea.vmem %s482_s29, 16  ;;  %s3503_s21 = int_to_ptr.vmem [resolvable:$true] %s516_s21 }
  0x1d   : > { %s4226_s30 = scalar_select %p3488_p3, 1, 0 }
  0x1e   : > { %p2897_p5 = pneg %p3488_p3  ;;  %p3084_p8 = scmp.ne.s32.totalorder %s482_s29, %s3083_s22 }
  0x1f   : > { %s3090_s23 = scalar_lea.vmem %s482_s29, 32  ;;  %p3091_p11 = scmp.lt.s32.totalorder %s482_s29, %s482_s29 }
  0x20   : > { %p3499_p6 = pnand %p2897_p5, %p4210_p1  ;;  %p3092_p12 = scmp.lt.s32.totalorder %s3090_s23, %s3083_s22 }
  0x22   : > { %p3074_p7 = pneg %p3499_p6  ;;  %p3093_p13 = por %p3092_p12, %p3091_p11 }
  0x24   : > { %p3086_p9 = pnand %p3084_p8, %p3074_p7 }
  0x26   : > { %p3087_p10 = pneg %p3086_p9 }
  0x28   : > { %p3094_p0 = pnand %p3093_p13, %p3087_p10 }
  0x2a   : > { %3097 = shalt.err (!%p3094_p0)
}
  0x2b   : > { %s4228_s7 = sld [smem:[#allocation34_spill]]  ;;  %s3109_s20 = scalar_lea.vmem %s3495_s19, 256 }
  0x2c   : > { %p3110_p2 = scmp.ne.s32.totalorder %s3495_s19, %s3109_s20  ;;  %p3117_p9 = scmp.lt.s32.totalorder %s3495_s19, %s3495_s19 }
  0x2d   : > { %p3118_p10 = scmp.lt.s32.totalorder %s3109_s20, %s3109_s20 }
  0x2e   : > { %p3112_p5 = pnand %p3110_p2, %p3074_p7 }
  0x2f   : > { %p3119_p11 = por %p3118_p10, %p3117_p9 }
  0x30   : > { %p3113_p8 = pneg %p3112_p5 }
  0x31   : > { %2900 = dma.hbm_to_vmem [thread:$0]  (!%p3499_p6), %s4228_s7, 16, %s482_s29, [#allocation8]  }
  0x32   : > { %p3120_p12 = pnand %p3119_p11, %p3113_p8 }
  0x34   : > { %3123 = shalt.err (!%p3120_p12)
}
  0x35   : > { %s3347_s22 = smov 64   ;;  %s3348_s29 = smov 4  }
  0x36   : > { %s4229_s11 = sld [smem:[#allocation35_spill]]  ;;  %s3135_s18 = scalar_lea.vmem %s3503_s21, 256 }
  0x37   : > { %p3136_p13 = scmp.ne.s32.totalorder %s3503_s21, %s3135_s18  ;;  %p3143_p5 = scmp.lt.s32.totalorder %s3503_s21, %s3503_s21 }
  0x38   : > { %p3144_p8 = scmp.lt.s32.totalorder %s3135_s18, %s3135_s18 }
  0x39   : > { %p3138_p0 = pnand %p3136_p13, %p3074_p7 }
  0x3a   : > { %p3145_p9 = por %p3144_p8, %p3143_p5 }
  0x3b   : > { %p3139_p2 = pneg %p3138_p0 }
  0x3c   : > { %2903 = dma.hbm_to_vmem [thread:$0]  (!%p3499_p6), %s4229_s11, 256, %s3495_s19, [#allocation11], %s3347_s22, %s3347_s22, %s3348_s29  }
  0x3d   : > { %p3146_p10 = pnand %p3145_p9, %p3139_p2 }
  0x3f   : > { %3149 = shalt.err (!%p3146_p10)
}
  0x40   : > { %s4230_s13 = sld [smem:[#allocation36_spill]]  ;;  %s3349_s19 = smov [#allocation13]  }
  0x41   : > { %s529_s23 = sshll.u32 %s3349_s19, 4  ;;  %s530_s23 = int_to_ptr.vmem [resolvable:$true] %s529_s23 }
  0x42   : > { %s3161_s28 = scalar_lea.vmem %s530_s23, 256  ;;  %p3169_p0 = scmp.lt.s32.totalorder %s530_s23, %s530_s23 }
  0x43   : > { %p3162_p11 = scmp.ne.s32.totalorder %s530_s23, %s3161_s28  ;;  %p3170_p2 = scmp.lt.s32.totalorder %s3161_s28, %s3161_s28 }
  0x45   : > { %p3164_p12 = pnand %p3162_p11, %p3074_p7  ;;  %p3171_p5 = por %p3170_p2, %p3169_p0 }
  0x46   : > { %2906 = dma.hbm_to_vmem [thread:$0]  (!%p3499_p6), %s4230_s13, 256, %s3503_s21, [#allocation11], %s3347_s22, %s3347_s22, %s3348_s29  }
  0x47   : > { %p3165_p13 = pneg %p3164_p12 }
  0x49   : > { %p3172_p8 = pnand %p3171_p5, %p3165_p13 }
  0x4b   : > { %3175 = shalt.err (!%p3172_p8)
}
  0x4c   : > { %s4231_s14 = sld [smem:[#allocation37_spill]]  ;;  %s2563_s21 = sadd.s32 4294967294, %s3342_s27  }
  0x4d   : > { %s3551_s1 = sadd.s32 1, %s3342_s27   ;;  %s127_s19 = sadd.s32 1, %s3338_s26 }
  0x4e   : > { %4232 = sst [smem:[#allocation27_spill]] %s3551_s1  ;;  %s124_s20 = ssub.s32 %s3342_s27, %s3551_s1 }
  0x4f   : > { %p125_p7 = scmp.eq.s32.totalorder %s124_s20, 0  ;;  %p134_p9 = scmp.ne.s32.totalorder %s3338_s26, %s3334_s25 }
  0x50   : > { %p135_p10 = scmp.eq.s32.totalorder %s3342_s27, 0  ;;  %p140_p11 = scmp.ne.s32.totalorder %s3334_s25, %s3330_s24 }
  0x51   : > { %s3562_s28 = scalar_select %p125_p7, %s3338_s26, %s127_s19  }
  0x52   : > { %2909 = dma.hbm_to_vmem [thread:$0]  (!%p3499_p6), %s4231_s14, 256, %s530_s23, [#allocation14], %s3347_s22, %s3347_s22, %s3348_s29  }
  0x53   : > { %4233 = sst [smem:[#allocation28_spill]] %s3562_s28  ;;  %p3564_p12 = por %p135_p10, %p134_p9 }
  0x54   : > { %p3570_p6 = por %p4210_p1, %p140_p11  ;;  %p426_p13 = scmp.eq.s32.totalorder %s3483_s0, 1 }
  0x55   : > { %p432_p0 = scmp.eq.s32.totalorder %s2563_s21, 1  ;;  %p2928_p2 = scmp.lt.s32.totalorder %s3342_s27, 2 }
  0x56   : > { %s4235_s22 = scalar_select %p3570_p6, 1, 0 }
  0x57   : > { %s3577_s29 = sand.u32 1, %s3338_s26   ;;  %p3579_p5 = por %p426_p13, %p134_p9 }
  0x58   : > { %p3583_p8 = por %p432_p0, %p140_p11  ;;  %s2570_s20 = sshll.u32 %s3342_s27, 4 }
  0x59   : > { %s4236_s23 = scalar_select %p3579_p5, 1, 0 }
  0x5a   : > { %s4237_s7 = scalar_select %p3583_p8, 1, 0 }
  0x5b   : > { %s573_s19 = scalar_lea.vmem [#allocation4], %s3577_s29  ;;  %s4239_s3 = sld [smem:[#allocation32_spill]] }
  0x5c   : > { %4238 = sst [smem:[#allocation29_spill]] %s4237_s7  ;;  %s580_s11 = sshll.u32 %s573_s19, 4  ;;  %s3594_s11 = int_to_ptr.vmem [resolvable:$true] %s580_s11 }
  0x5d   : > { %p3598_p7 = pnand %p2928_p2, %p3564_p12  ;;  %s4241_s5 = sld [smem:[#allocation33_spill]] }
  0x5e   : > { %s595_s13 = sand.u32 1, %s3342_s27   ;;  %s571_s14 = scalar_lea.sflag [#allocation5], %s3577_s29 }
  0x5f   : > { %p3178_p10 = pneg %p3598_p7 }
  0x61   : > { %s3592_s21 = scalar_lea.hbm %s4239_s3, %s2570_s20  ;;  %s3181_s17 = scalar_lea.hbm %s4239_s3, 32 }
  0x62   : > { %s3176_s7 = scalar_lea.hbm %s3592_s21, 16  ;;  %p3182_p13 = scmp.lt.s32.totalorder %s3592_s21, %s4239_s3 }
  0x63   : > { %s3605_s19 = scalar_lea.hbm %s4241_s5, %s2570_s20  ;;  %p3177_p9 = scmp.ne.s32.totalorder %s3592_s21, %s3176_s7 }
  0x64   : > { %p3183_p0 = scmp.lt.s32.totalorder %s3181_s17, %s3176_s7 }
  0x65   : > { %p3179_p11 = pnand %p3178_p10, %p3177_p9 }
  0x66   : > { %p3184_p2 = por %p3183_p0, %p3182_p13 }
  0x67   : > { %p3180_p12 = pneg %p3179_p11 }
  0x69   : > { %p3185_p4 = pnand %p3184_p2, %p3180_p12 }
  0x6b   : > { %3188 = shalt.err (!%p3185_p4)
}
  0x6c   : > { %s3189_s1 = scalar_lea.vmem %s3594_s11, 16  ;;  %s3350_s24 = smov [#allocation4]  }
  0x6d   : > { %p3190_p1 = scmp.ne.s32.totalorder %s3594_s11, %s3189_s1  ;;  %s3194_s20 = sshll.u32 %s3350_s24, 4  ;;  %s3195_s20 = int_to_ptr.vmem [resolvable:$false] %s3194_s20 }
  0x6e   : > { %s3196_s18 = scalar_lea.vmem %s3195_s20, 32  ;;  %p3197_p8 = scmp.lt.s32.totalorder %s3594_s11, %s3195_s20 }
  0x6f   : > { %p3192_p9 = pnand %p3190_p1, %p3178_p10  ;;  %p3198_p5 = scmp.lt.s32.totalorder %s3196_s18, %s3189_s1 }
  0x71   : > { %p3193_p11 = pneg %p3192_p9  ;;  %p3199_p6 = por %p3198_p5, %p3197_p8 }
  0x73   : > { %p3200_p13 = pnand %p3199_p6, %p3193_p11 }
  0x75   : > { %3203 = shalt.err (!%p3200_p13)
}
  0x76   : > { %2913 = dma.hbm_to_vmem [thread:$0]  (!%p3598_p7), %s3592_s21, 16, %s3594_s11, %s571_s14  }
  0x77   : > { %s598_s15 = scalar_lea.vmem [#allocation7], %s3577_s29  ;;  %s596_s7 = scalar_lea.sflag [#allocation8], %s595_s13 }
  0x78   : > { %s605_s17 = sshll.u32 %s598_s15, 4  ;;  %s3204_s26 = scalar_lea.hbm %s3605_s19, 16  ;;  %s606_s17 = int_to_ptr.vmem [resolvable:$true] %s605_s17 }
  0x79   : > { %p3205_p1 = scmp.ne.s32.totalorder %s3605_s19, %s3204_s26  ;;  %s3209_s20 = scalar_lea.hbm %s4241_s5, 32 }
  0x7a   : > { %p3210_p5 = scmp.lt.s32.totalorder %s3605_s19, %s4241_s5  ;;  %p3211_p8 = scmp.lt.s32.totalorder %s3209_s20, %s3204_s26 }
  0x7b   : > { %p3207_p4 = pnand %p3205_p1, %p3178_p10 }
  0x7c   : > { %p3212_p12 = por %p3211_p8, %p3210_p5 }
  0x7d   : > { %p3208_p6 = pneg %p3207_p4 }
  0x7f   : > { %p3213_p0 = pnand %p3212_p12, %p3208_p6 }
  0x81   : > { %3216 = shalt.err (!%p3213_p0)
}
  0x82   : > { %s3217_s11 = scalar_lea.vmem %s606_s17, 16  ;;  %s3351_s29 = smov [#allocation7]  }
  0x83   : > { %p3218_p2 = scmp.ne.s32.totalorder %s606_s17, %s3217_s11  ;;  %s3222_s21 = sshll.u32 %s3351_s29, 4  ;;  %s3223_s21 = int_to_ptr.vmem [resolvable:$false] %s3222_s21 }
  0x84   : > { %s3224_s13 = scalar_lea.vmem %s3223_s21, 32  ;;  %p3225_p13 = scmp.lt.s32.totalorder %s606_s17, %s3223_s21 }
  0x85   : > { %p3220_p9 = pnand %p3218_p2, %p3178_p10  ;;  %p3226_p1 = scmp.lt.s32.totalorder %s3224_s13, %s3217_s11 }
  0x87   : > { %p3221_p11 = pneg %p3220_p9  ;;  %p3227_p4 = por %p3226_p1, %p3225_p13 }
  0x89   : > { %p3228_p3 = pnand %p3227_p4, %p3221_p11 }
  0x8b   : > { %3231 = shalt.err (!%p3228_p3)
}
  0x8c   : > { %2916 = dma.hbm_to_vmem [thread:$0]  (!%p3598_p7), %s3605_s19, 16, %s606_s17, %s596_s7  }
  0x8d   : > { %p4242_p6 = scmp.ne.s32.totalorder %s4226_s30, 0 }
  0x8e   : > { %s3657_s3 = sand.u32 (!%p4242_p6), 1, %s3334_s25   ;;  %p4243_p10 = scmp.ne.s32.totalorder (!%p4242_p6), %s4235_s22, 0 }
  0x8f   : > { %614 = sbr.rel (%p4242_p6) target bundleno = 1628 (0x65c), region = 84  ;;  %s617_s14 = scalar_lea.sflag (!%p4242_p6), [#allocation5], %s3657_s3 }
  0x94   : > { %3301 = dma.done.wait (%p4243_p10), %s617_s14, 16  }
  0x95   : > { %3303 = vsyncadd (%p4243_p10), %s617_s14, 4294967280  ;;  %s624_s28 = sand.u32 1, %s3483_s0  }
  0x96   : > { %s625_s19 = scalar_lea.sflag [#allocation8], %s624_s28 }
  0x97   : > { %3305 = dma.done.wait (%p4243_p10), %s625_s19, 16  }
  0x98   : > { %3307 = vsyncadd (%p4243_p10), %s625_s19, 4294967280  ;;  %p4244_p3 = scmp.eq.s32.totalorder %s3483_s0, 0 }
  0x9a   : > { %3309 = dma.done.wait (%p4244_p3), [#allocation8], 16   ;;  %p4245_p7 = pmov %p4244_p3 }
  0x9b   : > { %p4246_p5 = pmov %p4244_p3 }
  0x9c   : > { %3311 = vsyncadd (%p4245_p7), [#allocation8], 4294967280 }
  0x9d   : > { %3313 = dma.done.wait (%p4246_p5), [#allocation11], 512   ;;  %p4247_p8 = pmov %p4244_p3 }
  0x9e   : > { %p4248_p12 = pmov %p4244_p3 }
  0x9f   : > { %3315 = vsyncadd (%p4247_p8), [#allocation11], 4294966784 }
  0xa0   : > { %3317 = dma.done.wait (%p4248_p12), [#allocation14], 256   ;;  %p4249_p0 = pmov %p4244_p3 }
  0xa1   : > { %p722_p2 = scmp.lt.s32.totalorder %s3483_s0, 1  ;;  %v3352_v0 = vmov 0.0   ;;  %vm3353_vm0 = vmmov 0   ;;  %v3354_v1 = vmov 0   ;;  %v2992_v2 = vld [vmem:[%s4192_s6 + $0x8] sm:$0xff]   ;;  %s4250_s29 = sld [smem:[#allocation30_spill]] }
  0xa2   : > { %3319 = vsyncadd (%p4249_p0), [#allocation14], 4294967040  ;;  %2729 = vmatprep.subr.bf16.mxu0 %v3352_v0  ;;  %2737 = vmatprep.subr.bf16.mxu1 %v3352_v0  ;;  %v2993_v3 = vld [vmem:[%s4194_s8 + $0x8] sm:$0xff]   ;;  %s4251_s28 = sld [smem:[#allocation31_spill]]  ;;  %v2994_v4 = vld [vmem:[%s4192_s6] sm:$0xff]   ;;  %vm777_vm1 = vcmask 261120  }
  0xa3   : > { %2733 = vmatprep.mubr.msk.bf16.mxu0 %vm3353_vm0, %v3352_v0  ;;  %2741 = vmatprep.mubr.msk.bf16.mxu1 %vm3353_vm0, %v3352_v0  ;;  %s723_s22 = scalar_select %p722_p2, %s3483_s0, 1  ;;  %v2995_v5 = vld [vmem:[%s4194_s8] sm:$0xff]   ;;  %v2587_v25 = vld [vmem:[#allocation9] ss:$0 sm:$0xff]  ;;  %vm945_vm2 = vcmask 64512   ;;  %vm995_vm4 = vcmask 130048  }
  0xa4   : > { %2990 = vset.pattern.permute.xlu0 %v3354_v1  ;;  %2991 = vset.pattern.permute.xlu1 %v3354_v1  ;;  %v2592_v22 = vld [vmem:[%s4195_s9] ss:$0 sm:$0xff]  ;;  %s3355_s30 = smov 96   ;;  %s3360_s13 = smov 104   ;;  %vm1075_vm6 = vcmask 60416   ;;  %vm1344_vm7 = vcmask 126016  }
  0xa5   : > { %s2657_s17 = sshll.u32 %s723_s22, 3  ;;  %s2659_s7 = sshll.u32 %s723_s22, 4  ;;  %2730 = vmatpush3.bf16.msra.mxu0 %v2992_v2  ;;  %2738 = vmatpush3.bf16.msra.mxu1 %v2993_v3  ;;  %vm1619_vm8 = vcmask 191616   ;;  %vm1894_vm9 = vcmask 257216  }
  0xa6   : > { %s736_s1 = scalar_lea.vmem %s4188_s2, %s2659_s7  ;;  %s741_s20 = scalar_lea.vmem %s4190_s4, %s2659_s7  ;;  %2731 = vmatprep.subr.bf16.mxu0 %v3352_v0  ;;  %2739 = vmatprep.subr.bf16.mxu1 %v3352_v0 }
  0xa7   : > { %s726_s21 = scalar_lea.vmem %s4250_s29, %s2657_s17  ;;  %v896_v14 = vld [vmem:[%s736_s1] sm:$0xff]  ;;  %v897_v18 = vld [vmem:[%s736_s1 + $0x8] sm:$0xff]  ;;  %s3357_s7 = smov 88  }
  0xa8   : > { %s731_s19 = scalar_lea.vmem %s4251_s28, %s2657_s17  ;;  %v3717_v6 = vld [vmem:[%s726_s21] sm:$0xf]  ;;  %v3719_v7 = vld [vmem:[%s726_s21 + $0x4] sm:$0xf]  ;;  %900 = vperm.xlu0 %2990, %v896_v14   ;;  %v912_v19 = vld [vmem:[%s741_s20 + $0x8] sm:$0xff]  ;;  %s3356_s17 = smov 120  }
  0xa9   : > { %v3721_v8 = vld [vmem:[%s731_s19] sm:$0xf]  ;;  %v747_v9 = vmax.bf16 %v3354_v1, %v3717_v6  ;;  %v748_v10 = vmax.bf16 %v3354_v1, %v3719_v7  ;;  %v2635_v11 = vcombine.low %v3717_v6, %v3719_v7  ;;  %v3727_v12 = vld [vmem:[%s731_s19 + $0x4] sm:$0xf]  ;;  %2732 = vmatpush3.bf16.msra.mxu0 %v2994_v4  ;;  %2740 = vmatpush3.bf16.msra.mxu1 %v2995_v5  ;;  %s3358_s29 = smov 112   ;;  %s3359_s21 = smov 80  }
  0xaa   : > { %v822_v13 = vmax.bf16 %v3354_v1, %v3721_v8  ;;  %v911_v15 = vld [vmem:[%s741_s20] sm:$0xff]  ;;  %v823_v16 = vmax.bf16 %v3354_v1, %v3727_v12  ;;  %v2644_v17 = vcombine.low %v3721_v8, %v3727_v12  ;;  %2745 = vmatprep.subr.bf16.mxu0 %v3352_v0  ;;  %2751 = vmatprep.subr.bf16.mxu1 %v3352_v0  ;;  %s3361_s14 = smov 72   ;;  %s3362_s28 = smov 64  }
  0xab   : > { %v2588_v20 = vcombine.low %v747_v9, %v748_v10  ;;  %915 = vperm.xlu1 %2991, %v911_v15   ;;  %s4252_s19 = scalar_lea.vmem [#allocation7], %s3657_s3  ;;  %s4253_s22 = scalar_lea.vmem [#allocation4], %s3657_s3 }
  0xac   : > { %v2593_v21 = vcombine.low %v822_v13, %v823_v16  ;;  %905 = vperm.xlu0 %2990, %v897_v18   ;;  %v3809_v9 = vld [vmem:[%s4252_s19] ss:$0 sm:$0xff]  ;;  %s3363_s26 = smov 56   ;;  %s3364_s1 = smov 48  }
  0xad   : > { %2734 = vmatmul.mubr.msk.bf16.vlgmr.msra.gmra.mxu0 %vm777_vm1, %v2588_v20  ;;  %vm933_vm3 = vcmp.eq.f32.partialorder %v3809_v9, 0.0  ;;  %v3820_v16 = vld [vmem:[%s4253_s22] ss:$0 sm:$0xff]  ;;  %s3365_s24 = smov 40   ;;  %s3366_s20 = smov 8  }
  0xae   : > { %2742 = vmatmul.mubr.msk.bf16.vlgmr.msra.gmra.mxu1 %vm777_vm1, %v2593_v21  ;;  %2747 = vmatprep.mubr.msk.bf16.mxu0 %vm3353_vm0, %v3352_v0  ;;  %vm941_vm5 = vcmp.eq.f32.partialorder %v3820_v16, 0.0  ;;  %s3367_s18 = smov 16   ;;  %p4254_p11 = scmp.ne.s32.totalorder %s4236_s23, 0 }
  0xaf   : > { %920 = vperm.xlu1 %2991, %v912_v19   ;;  %2753 = vmatprep.mubr.msk.bf16.mxu1 %vm3353_vm0, %v3352_v0 }
 0x123   : > { %v901_v24 = vpop.permute.xlu0 %900 }
 0x126   : > { %v916_v23 = vpop.permute.xlu1 %915 }
 0x127   : > { %v906_v37 = vpop.permute.xlu0 %905 }
 0x12a   : > { %v921_v35 = vpop.permute.xlu1 %920 }
 0x16d   : > { %v815_v26 = vpop.f32.mrf.mxu0 }
 0x16e   : > { %v889_v27 = vpop.f32.mrf.mxu1  ;;  %v816_v30 = vadd.f32 %v2587_v25, %v815_v26 }
 0x16f   : > { %v890_v28 = vadd.f32 %v2592_v22, %v889_v27  ;;  %v2735_v29 = vpop.f32.mrf.mxu0 }
 0x170   : > { %v2743_v31 = vpop.f32.mrf.mxu1  ;;  %v908_v40 = vmul.f32 %v901_v24, %v816_v30 }
 0x171   : > { %v818_v32 = vpop.f32.mrf.mxu0  ;;  %v923_v36 = vmul.f32 %v916_v23, %v890_v28 }
 0x172   : > { %v819_v33 = vadd.f32 %v2587_v25, %v818_v32  ;;  %v892_v34 = vpop.f32.mrf.mxu1 }
 0x173   : > { %v893_v38 = vadd.f32 %v2592_v22, %v892_v34  ;;  %v2736_v39 = vpop.f32.mrf.mxu0 }
 0x174   : > { %v909_v41 = vmul.f32 %v906_v37, %v819_v33  ;;  %v2744_v42 = vpop.f32.mrf.mxu1 }
 0x175   : > { %v924_v43 = vmul.f32 %v921_v35, %v893_v38 }
 0x176   : > { %v3744_v44 = vpack.c.bf16 %v909_v41, %v908_v40 }
 0x177   : > { %v3746_v45 = vpack.c.bf16 %v924_v43, %v923_v36 }
 0x178   : > { %943 = vrot.lane.b32.xlu0 %v3744_v44, %s3355_s30  ;;  %v1084_v49 = vsel %vm945_vm2, %v3744_v44, 0 }
 0x179   : > { %1078 = vrot.lane.b32.xlu1 %v3746_v45, %s3355_s30  ;;  %v950_v46 = vsel %vm945_vm2, %v3746_v45, 0 }
 0x17a   : > { %2746 = vmatpush3.bf16.xpose.msra.mxu0 %v950_v46 }
 0x17b   : > { %2757 = vmatprep.subr.bf16.mxu0 %v3352_v0 }
 0x17c   : > { %1211 = vrot.lane.b32.xlu0 %v3746_v45, %s3356_s17 }
 0x17d   : > { %1209 = vrot.lane.b32.xlu1 %v3744_v44, %s3357_s7 }
 0x180   : > { %1349 = vrot.lane.b32.xlu0 %v3744_v44, %s3356_s17  ;;  %s3368_s17 = smov 24  }
 0x181   : > { %1347 = vrot.lane.b32.xlu1 %v3746_v45, %s3357_s7  ;;  %s2577_s7 = sshll.u32 %s3657_s3, 4 }
 0x184   : > { %1486 = vrot.lane.b32.xlu0 %v3746_v45, %s3358_s29 }
 0x185   : > { %1484 = vrot.lane.b32.xlu1 %v3744_v44, %s3359_s21 }
 0x188   : > { %1624 = vrot.lane.b32.xlu0 %v3744_v44, %s3358_s29 }
 0x189   : > { %1622 = vrot.lane.b32.xlu1 %v3746_v45, %s3359_s21 }
 0x18c   : > { %1761 = vrot.lane.b32.xlu0 %v3746_v45, %s3360_s13 }
 0x18d   : > { %1759 = vrot.lane.b32.xlu1 %v3744_v44, %s3361_s14 }
 0x190   : > { %1899 = vrot.lane.b32.xlu0 %v3744_v44, %s3360_s13  ;;  %s714_s13 = scalar_lea.vmem [#allocation15], %s2577_s7 }
 0x191   : > { %1897 = vrot.lane.b32.xlu1 %v3746_v45, %s3361_s14  ;;  %s2339_s14 = sshll.u32 %s714_s13, 4  ;;  %s4095_s14 = int_to_ptr.vmem [resolvable:$true] %s2339_s14 }
 0x195   : > { %1020 = vrot.lane.b32.xlu1 %v3746_v45, %s3362_s28 }
 0x1ea   : > { %v944_v47 = vpop.permute.xlu0 %943 }
 0x1eb   : > { %v1079_v48 = vpop.permute.xlu1 %1078  ;;  %2748 = vmatmul.mubr.msk.bf16.vlgmr.msra.gmra.mxu0 %vm945_vm2, %v944_v47 }
 0x1ec   : > { %2758 = vmatpush3.bf16.xpose.msra.mxu0 %v1084_v49  ;;  %2759 = vmatprep.mubr.msk.bf16.mxu0 %vm3353_vm0, %v3352_v0 }
 0x1ed   : > { %2769 = vmatprep.subr.bf16.mxu0 %v3352_v0 }
 0x1ee   : > { %v1212_v51 = vpop.permute.xlu0 %1211 }
 0x1ef   : > { %v1210_v50 = vpop.permute.xlu1 %1209  ;;  %v1217_v52 = vsel %vm945_vm2, %v1212_v51, 0 }
 0x1f2   : > { %v1350_v55 = vpop.permute.xlu0 %1349 }
 0x1f3   : > { %v1348_v53 = vpop.permute.xlu1 %1347  ;;  %2760 = vmatmul.mubr.msk.bf16.vlgmr.msra.gmra.mxu0 %vm945_vm2, %v1079_v48  ;;  %v1355_v56 = vsel %vm945_vm2, %v1350_v55, 0 }
 0x1f4   : > { %2770 = vmatpush3.bf16.xpose.msra.mxu0 %v1217_v52  ;;  %2771 = vmatprep.mubr.msk.bf16.mxu0 %vm3353_vm0, %v3352_v0 }
 0x1f5   : > { %2781 = vmatprep.subr.bf16.mxu0 %v3352_v0 }
 0x1f6   : > { %v1487_v59 = vpop.permute.xlu0 %1486 }
 0x1f7   : > { %v1485_v54 = vpop.permute.xlu1 %1484  ;;  %v1492_v60 = vsel %vm945_vm2, %v1487_v59, 0 }
 0x1fa   : > { %v1625_v63 = vpop.permute.xlu0 %1624 }
 0x1fb   : > { %v1623_v57 = vpop.permute.xlu1 %1622  ;;  %2772 = vmatmul.mubr.msk.bf16.vlgmr.msra.gmra.mxu0 %vm945_vm2, %v1210_v50  ;;  %v1630_v1 = vsel %vm945_vm2, %v1625_v63, 0 }
 0x1fc   : > { %2782 = vmatpush3.bf16.xpose.msra.mxu0 %v1355_v56  ;;  %2783 = vmatprep.mubr.msk.bf16.mxu0 %vm3353_vm0, %v3352_v0 }
 0x1fd   : > { %2793 = vmatprep.subr.bf16.mxu0 %v3352_v0 }
 0x1fe   : > { %v1762_v2 = vpop.permute.xlu0 %1761 }
 0x1ff   : > { %v1760_v58 = vpop.permute.xlu1 %1759  ;;  %v1767_v3 = vsel %vm945_vm2, %v1762_v2, 0 }
 0x202   : > { %v1900_v4 = vpop.permute.xlu0 %1899 }
 0x203   : > { %v1898_v61 = vpop.permute.xlu1 %1897  ;;  %2784 = vmatmul.mubr.msk.bf16.vlgmr.msra.gmra.mxu0 %vm945_vm2, %v1348_v53  ;;  %v1905_v5 = vsel %vm945_vm2, %v1900_v4, 0 }
 0x204   : > { %2794 = vmatpush3.bf16.xpose.msra.mxu0 %v1492_v60  ;;  %2795 = vmatprep.mubr.msk.bf16.mxu0 %vm3353_vm0, %v3352_v0 }
 0x205   : > { %2805 = vmatprep.subr.bf16.mxu0 %v3352_v0 }
 0x207   : > { %v1021_v62 = vpop.permute.xlu1 %1020 }
 0x208   : > { %2752 = vmatpush3.bf16.msra.mxu1 %v1021_v62 }
 0x209   : > { %2763 = vmatprep.subr.bf16.mxu1 %v3352_v0 }
 0x20b   : > { %2796 = vmatmul.mubr.msk.bf16.vlgmr.msra.gmra.mxu0 %vm945_vm2, %v1485_v54 }
 0x20c   : > { %2806 = vmatpush3.bf16.xpose.msra.mxu0 %v1630_v1  ;;  %2807 = vmatprep.mubr.msk.bf16.mxu0 %vm3353_vm0, %v3352_v0 }
 0x20d   : > { %2817 = vmatprep.subr.bf16.mxu0 %v3352_v0 }
 0x213   : > { %2808 = vmatmul.mubr.msk.bf16.vlgmr.msra.gmra.mxu0 %vm945_vm2, %v1623_v57 }
 0x214   : > { %2818 = vmatpush3.bf16.xpose.msra.mxu0 %v1767_v3  ;;  %2819 = vmatprep.mubr.msk.bf16.mxu0 %vm3353_vm0, %v3352_v0 }
 0x215   : > { %2829 = vmatprep.subr.bf16.mxu0 %v3352_v0 }
 0x21b   : > { %2820 = vmatmul.mubr.msk.bf16.vlgmr.msra.gmra.mxu0 %vm945_vm2, %v1760_v58 }
 0x21c   : > { %2830 = vmatpush3.bf16.xpose.msra.mxu0 %v1905_v5  ;;  %2831 = vmatprep.mubr.msk.bf16.mxu0 %vm3353_vm0, %v3352_v0 }
 0x21d   : > { %2841 = vmatprep.subr.bf16.mxu0 %v3352_v0 }
 0x223   : > { %2832 = vmatmul.mubr.msk.bf16.vlgmr.msra.gmra.mxu0 %vm945_vm2, %v1898_v61 }
 0x224   : > { %2845 = vmatprep.mubr.msk.bf16.mxu0 %vm3353_vm0, %v3352_v0 }
 0x2ab   : > { %v986_v10 = vpop.f32.mrf.mxu0 }
 0x2ac   : > { %v3814_v13 = vsel %vm933_vm3, -1e+09, %v986_v10 }
 0x2ad   : > { %v2749_v14 = vpop.f32.mrf.mxu0  ;;  %v996_v15 = vsel %vm995_vm4, %v3814_v13, -inf }
 0x2ae   : > { %997 = vmax.xlane.f32.xlu0 %v996_v15 }
 0x2af   : > { %v989_v18 = vpop.f32.mrf.mxu0 }
 0x2b0   : > { %v3824_v19 = vsel %vm933_vm3, -1e+09, %v989_v18 }
 0x2b1   : > { %v2750_v20 = vpop.f32.mrf.mxu0  ;;  %v999_v21 = vsel %vm995_vm4, %v3824_v19, -inf }
 0x2b2   : > { %1000 = vmax.xlane.f32.xlu1 %v999_v21 }
 0x2b3   : > { %v1120_v22 = vpop.f32.mrf.mxu0 }
 0x2b4   : > { %v3831_v23 = vsel %vm941_vm5, -1e+09, %v1120_v22 }
 0x2b5   : > { %v2761_v24 = vpop.f32.mrf.mxu0  ;;  %v1129_v25 = vsel %vm995_vm4, %v3831_v23, -inf }
 0x2b6   : > { %1130 = vmax.xlane.f32.xlu0 %v1129_v25 }
 0x2b7   : > { %v1123_v26 = vpop.f32.mrf.mxu0 }
 0x2b8   : > { %v3837_v27 = vsel %vm941_vm5, -1e+09, %v1123_v26 }
 0x2b9   : > { %v2762_v28 = vpop.f32.mrf.mxu0  ;;  %v1132_v29 = vsel %vm995_vm4, %v3837_v27, -inf }
 0x2ba   : > { %1133 = vmax.xlane.f32.xlu0 %v1132_v29 }
 0x2bb   : > { %v1253_v30 = vpop.f32.mrf.mxu0 }
 0x2bc   : > { %v3843_v31 = vsel %vm933_vm3, -1e+09, %v1253_v30 }
 0x2bd   : > { %v2773_v32 = vpop.f32.mrf.mxu0  ;;  %v1262_v33 = vsel %vm995_vm4, %v3843_v31, -inf }
 0x2be   : > { %1263 = vmax.xlane.f32.xlu1 %v1262_v33 }
 0x2bf   : > { %v1256_v34 = vpop.f32.mrf.mxu0 }
 0x2c0   : > { %v3849_v35 = vsel %vm933_vm3, -1e+09, %v1256_v34 }
 0x2c1   : > { %v2774_v36 = vpop.f32.mrf.mxu0  ;;  %v1265_v37 = vsel %vm995_vm4, %v3849_v35, -inf }
 0x2c2   : > { %1266 = vmax.xlane.f32.xlu0 %v1265_v37 }
 0x2c3   : > { %v1391_v38 = vpop.f32.mrf.mxu0 }
 0x2c4   : > { %v3855_v39 = vsel %vm941_vm5, -1e+09, %v1391_v38 }
 0x2c5   : > { %v2785_v40 = vpop.f32.mrf.mxu0  ;;  %v1400_v41 = vsel %vm995_vm4, %v3855_v39, -inf }
 0x2c6   : > { %1401 = vmax.xlane.f32.xlu1 %v1400_v41 }
 0x2c7   : > { %v1394_v42 = vpop.f32.mrf.mxu0 }
 0x2c8   : > { %v3861_v43 = vsel %vm941_vm5, -1e+09, %v1394_v42 }
 0x2c9   : > { %v2786_v46 = vpop.f32.mrf.mxu0  ;;  %v1403_v47 = vsel %vm995_vm4, %v3861_v43, -inf }
 0x2ca   : > { %1404 = vmax.xlane.f32.xlu0 %v1403_v47 }
 0x2cb   : > { %v1528_v48 = vpop.f32.mrf.mxu0 }
 0x2cc   : > { %v3867_v49 = vsel %vm933_vm3, -1e+09, %v1528_v48 }
 0x2cd   : > { %v2797_v50 = vpop.f32.mrf.mxu0  ;;  %v1537_v51 = vsel %vm995_vm4, %v3867_v49, -inf }
 0x2ce   : > { %1538 = vmax.xlane.f32.xlu1 %v1537_v51 }
 0x2cf   : > { %v1531_v52 = vpop.f32.mrf.mxu0 }
 0x2d0   : > { %v3873_v53 = vsel %vm933_vm3, -1e+09, %v1531_v52 }
 0x2d1   : > { %v2798_v54 = vpop.f32.mrf.mxu0  ;;  %v1540_v55 = vsel %vm995_vm4, %v3873_v53, -inf }
 0x2d2   : > { %1541 = vmax.xlane.f32.xlu0 %v1540_v55 }
 0x2d3   : > { %v1666_v56 = vpop.f32.mrf.mxu0 }
 0x2d4   : > { %v3879_v57 = vsel %vm941_vm5, -1e+09, %v1666_v56 }
 0x2d5   : > { %v2809_v58 = vpop.f32.mrf.mxu0  ;;  %v1675_v59 = vsel %vm995_vm4, %v3879_v57, -inf }
 0x2d6   : > { %1676 = vmax.xlane.f32.xlu1 %v1675_v59 }
 0x2d7   : > { %v1669_v60 = vpop.f32.mrf.mxu0 }
 0x2d8   : > { %v3885_v61 = vsel %vm941_vm5, -1e+09, %v1669_v60 }
 0x2d9   : > { %v2810_v62 = vpop.f32.mrf.mxu0  ;;  %v1678_v63 = vsel %vm995_vm4, %v3885_v61, -inf }
 0x2da   : > { %1679 = vmax.xlane.f32.xlu0 %v1678_v63 }
 0x2db   : > { %v1803_v1 = vpop.f32.mrf.mxu0 }
 0x2dc   : > { %v3891_v2 = vsel %vm933_vm3, -1e+09, %v1803_v1 }
 0x2dd   : > { %v2821_v3 = vpop.f32.mrf.mxu0  ;;  %v1812_v4 = vsel %vm995_vm4, %v3891_v2, -inf }
 0x2de   : > { %1813 = vmax.xlane.f32.xlu1 %v1812_v4 }
 0x2df   : > { %v1806_v5 = vpop.f32.mrf.mxu0 }
 0x2e0   : > { %v3897_v10 = vsel %vm933_vm3, -1e+09, %v1806_v5 }
 0x2e1   : > { %v2822_v14 = vpop.f32.mrf.mxu0  ;;  %v1815_v15 = vsel %vm995_vm4, %v3897_v10, -inf }
 0x2e2   : > { %1816 = vmax.xlane.f32.xlu0 %v1815_v15 }
 0x2e3   : > { %v1941_v18 = vpop.f32.mrf.mxu0 }
 0x2e4   : > { %v3903_v20 = vsel %vm941_vm5, -1e+09, %v1941_v18 }
 0x2e5   : > { %v2833_v21 = vpop.f32.mrf.mxu0  ;;  %v1950_v22 = vsel %vm995_vm4, %v3903_v20, -inf }
 0x2e6   : > { %1951 = vmax.xlane.f32.xlu1 %v1950_v22 }
 0x2e7   : > { %v1944_v24 = vpop.f32.mrf.mxu0 }
 0x2e8   : > { %v3909_v9 = vsel %vm941_vm5, -1e+09, %v1944_v24 }
 0x2e9   : > { %v2834_v25 = vpop.f32.mrf.mxu0  ;;  %v1953_v26 = vsel %vm995_vm4, %v3909_v9, -inf }
 0x2ea   : > { %1954 = vmax.xlane.f32.xlu0 %v1953_v26 }
 0x2f7   : > { %1285 = vrot.lane.b32.xlu1 %v3746_v45, %s3363_s26 }
 0x300   : > { %1152 = vrot.lane.b32.xlu0 %v3744_v44, %s3362_s28  ;;  %s2677_s28 = sshll.u32 %s3483_s0, 8 }
 0x337   : > { %v998_v28 = vpop.xlane.xlu0 %997 }
 0x338   : > { %v1002_v29 = vsub.f32 %v3814_v13, %v998_v28 }
 0x33a   : > { %v1004_v30 = vmul.f32 1.442695, %v1002_v29 }
 0x33b   : > { %v1001_v32 = vpop.xlane.xlu1 %1000 }
 0x33c   : > { %3008 = vpow2.f32 %v1004_v30  ;;  %v1003_v16 = vsub.f32 %v3824_v19, %v1001_v32 }
 0x33e   : > { %v1006_v33 = vmul.f32 1.442695, %v1003_v16 }
 0x33f   : > { %v1131_v34 = vpop.xlane.xlu0 %1130 }
 0x340   : > { %3010 = vpow2.f32 %v1006_v33  ;;  %v1135_v36 = vsub.f32 %v3831_v23, %v1131_v34 }
 0x342   : > { %v1137_v37 = vmul.f32 1.442695, %v1135_v36 }
 0x343   : > { %v1134_v38 = vpop.xlane.xlu0 %1133 }
 0x344   : > { %3012 = vpow2.f32 %v1137_v37  ;;  %v1136_v40 = vsub.f32 %v3837_v27, %v1134_v38 }
 0x346   : > { %v1139_v41 = vmul.f32 1.442695, %v1136_v40 }
 0x347   : > { %v1264_v42 = vpop.xlane.xlu1 %1263 }
 0x348   : > { %3014 = vpow2.f32 %v1139_v41  ;;  %v1268_v13 = vsub.f32 %v3843_v31, %v1264_v42 }
 0x349   : > { %v3922_v46 = vpop.eup %3008 }
 0x34a   : > { %v1270_v47 = vmul.f32 1.442695, %v1268_v13  ;;  %v1008_v19 = vsel %vm995_vm4, %v3922_v46, 0.0 }
 0x34b   : > { %v1267_v48 = vpop.xlane.xlu0 %1266  ;;  %1009 = vadd.xlane.f32.xlu1 %v1008_v19 }
 0x34c   : > { %3016 = vpow2.f32 %v1270_v47  ;;  %v1269_v23 = vsub.f32 %v3849_v35, %v1267_v48 }
 0x34d   : > { %v3927_v50 = vpop.eup %3010 }
 0x34e   : > { %v1272_v51 = vmul.f32 1.442695, %v1269_v23  ;;  %v1011_v27 = vsel %vm995_vm4, %v3927_v50, 0.0 }
 0x34f   : > { %v1402_v52 = vpop.xlane.xlu1 %1401  ;;  %1012 = vadd.xlane.f32.xlu0 %v1011_v27 }
 0x350   : > { %3018 = vpow2.f32 %v1272_v51  ;;  %v1406_v31 = vsub.f32 %v3855_v39, %v1402_v52 }
 0x351   : > { %v3932_v54 = vpop.eup %3012 }
 0x352   : > { %v1408_v55 = vmul.f32 1.442695, %v1406_v31  ;;  %v1141_v56 = vsel %vm995_vm4, %v3932_v54, 0.0 }
 0x353   : > { %v1405_v58 = vpop.xlane.xlu0 %1404  ;;  %1142 = vadd.xlane.f32.xlu1 %v1141_v56 }
 0x354   : > { %3020 = vpow2.f32 %v1408_v55  ;;  %v1407_v35 = vsub.f32 %v3861_v43, %v1405_v58 }
 0x355   : > { %v3937_v59 = vpop.eup %3014 }
 0x356   : > { %v1410_v60 = vmul.f32 1.442695, %v1407_v35  ;;  %v1144_v62 = vsel %vm995_vm4, %v3937_v59, 0.0 }
 0x357   : > { %v1539_v63 = vpop.xlane.xlu1 %1538  ;;  %1145 = vadd.xlane.f32.xlu0 %v1144_v62 }
 0x358   : > { %3022 = vpow2.f32 %v1410_v60  ;;  %v1543_v39 = vsub.f32 %v3867_v49, %v1539_v63 }
 0x359   : > { %v3942_v1 = vpop.eup %3016 }
 0x35a   : > { %v1545_v3 = vmul.f32 1.442695, %v1543_v39  ;;  %v1274_v4 = vsel %vm995_vm4, %v3942_v1, 0.0 }
 0x35b   : > { %v1542_v5 = vpop.xlane.xlu0 %1541  ;;  %1275 = vadd.xlane.f32.xlu1 %v1274_v4 }
 0x35c   : > { %3024 = vpow2.f32 %v1545_v3  ;;  %v1544_v43 = vsub.f32 %v3873_v53, %v1542_v5 }
 0x35d   : > { %v3947_v14 = vpop.eup %3018 }
 0x35e   : > { %v1547_v15 = vmul.f32 1.442695, %v1544_v43  ;;  %v1277_v18 = vsel %vm995_vm4, %v3947_v14, 0.0 }
 0x35f   : > { %v1677_v21 = vpop.xlane.xlu1 %1676  ;;  %1278 = vadd.xlane.f32.xlu0 %v1277_v18 }
 0x360   : > { %3026 = vpow2.f32 %v1547_v15  ;;  %v1681_v49 = vsub.f32 %v3879_v57, %v1677_v21 }
 0x361   : > { %v3952_v22 = vpop.eup %3020 }
 0x362   : > { %v1683_v24 = vmul.f32 1.442695, %v1681_v49  ;;  %v1412_v25 = vsel %vm995_vm4, %v3952_v22, 0.0 }
 0x363   : > { %v1680_v26 = vpop.xlane.xlu0 %1679  ;;  %1413 = vadd.xlane.f32.xlu1 %v1412_v25 }
 0x364   : > { %3028 = vpow2.f32 %v1683_v24  ;;  %v1682_v53 = vsub.f32 %v3885_v61, %v1680_v26 }
 0x365   : > { %v3957_v28 = vpop.eup %3022 }
 0x366   : > { %v1685_v29 = vmul.f32 1.442695, %v1682_v53  ;;  %v1415_v30 = vsel %vm995_vm4, %v3957_v28, 0.0 }
 0x367   : > { %v1814_v32 = vpop.xlane.xlu1 %1813  ;;  %1416 = vadd.xlane.f32.xlu0 %v1415_v30 }
 0x368   : > { %3030 = vpow2.f32 %v1685_v29  ;;  %v1818_v57 = vsub.f32 %v3891_v2, %v1814_v32 }
 0x369   : > { %v3962_v16 = vpop.eup %3024 }
 0x36a   : > { %v1820_v33 = vmul.f32 1.442695, %v1818_v57  ;;  %v1549_v34 = vsel %vm995_vm4, %v3962_v16, 0.0 }
 0x36b   : > { %v1817_v36 = vpop.xlane.xlu0 %1816  ;;  %1550 = vadd.xlane.f32.xlu0 %v1549_v34 }
 0x36c   : > { %3032 = vpow2.f32 %v1820_v33  ;;  %v1819_v61 = vsub.f32 %v3897_v10, %v1817_v36 }
 0x36d   : > { %v3967_v37 = vpop.eup %3026 }
 0x36e   : > { %v1822_v38 = vmul.f32 1.442695, %v1819_v61  ;;  %v1552_v40 = vsel %vm995_vm4, %v3967_v37, 0.0 }
 0x36f   : > { %v1952_v41 = vpop.xlane.xlu1 %1951  ;;  %1553 = vadd.xlane.f32.xlu0 %v1552_v40 }
 0x370   : > { %3034 = vpow2.f32 %v1822_v38  ;;  %v1956_v2 = vsub.f32 %v3903_v20, %v1952_v41 }
 0x371   : > { %v3972_v42 = vpop.eup %3028 }
 0x372   : > { %v1958_v13 = vmul.f32 1.442695, %v1956_v2  ;;  %v1687_v47 = vsel %vm995_vm4, %v3972_v42, 0.0 }
 0x373   : > { %1688 = vadd.xlane.f32.xlu1 %v1687_v47  ;;  %v1955_v31 = vpop.xlane.xlu0 %1954  ;;  %v1286_v60 = vpop.permute.xlu1 %1285 }
 0x374   : > { %3036 = vpow2.f32 %v1958_v13  ;;  %v1957_v55 = vsub.f32 %v3909_v9, %v1955_v31 }
 0x375   : > { %v3976_v10 = vpop.eup %3030 }
 0x376   : > { %v1690_v19 = vsel %vm995_vm4, %v3976_v10, 0.0  ;;  %v1960_v56 = vmul.f32 1.442695, %v1957_v55 }
 0x377   : > { %1691 = vadd.xlane.f32.xlu0 %v1690_v19  ;;  %v1153_v9 = vpop.permute.xlu0 %1152 }
 0x378   : > { %3038 = vpow2.f32 %v1960_v56 }
 0x379   : > { %v3980_v48 = vpop.eup %3032 }
 0x37a   : > { %v1824_v23 = vsel %vm995_vm4, %v3980_v48, 0.0 }
 0x37b   : > { %1825 = vadd.xlane.f32.xlu0 %v1824_v23 }
 0x37d   : > { %v3984_v20 = vpop.eup %3034 }
 0x37e   : > { %v1827_v51 = vsel %vm995_vm4, %v3984_v20, 0.0 }
 0x37f   : > { %1828 = vadd.xlane.f32.xlu0 %v1827_v51 }
 0x381   : > { %v3988_v27 = vpop.eup %3036 }
 0x382   : > { %v1962_v52 = vsel %vm995_vm4, %v3988_v27, 0.0 }
 0x383   : > { %1963 = vadd.xlane.f32.xlu0 %v1962_v52 }
 0x384   : > { %1423 = vrot.lane.b32.xlu1 %v3744_v44, %s3363_s26  ;;  %s4102_s26 = scalar_lea.hbm %s4202_s16, %s2677_s28 }
 0x385   : > { %v3998_v58 = vpop.eup %3038 }
 0x386   : > { %v1965_v35 = vsel %vm995_vm4, %v3998_v58, 0.0 }
 0x399   : > { %1560 = vrot.lane.b32.xlu0 %v3746_v45, %s3364_s1 }
 0x39d   : > { %1698 = vrot.lane.b32.xlu0 %v3744_v44, %s3364_s1  ;;  %s2321_s1 = scalar_lea.sflag [#allocation6], %s3657_s3 }
 0x3a1   : > { %1835 = vrot.lane.b32.xlu0 %v3746_v45, %s3365_s24 }
 0x3a5   : > { %1973 = vrot.lane.b32.xlu0 %v3744_v44, %s3365_s24  ;;  %s3232_s24 = scalar_lea.vmem %s4095_s14, 256 }
 0x3a6   : > { %p3233_p9 = scmp.ne.s32.totalorder %s4095_s14, %s3232_s24 }
 0x3a8   : > { %1966 = vadd.xlane.f32.xlu1 %v1965_v35  ;;  %p3234_p13 = pnand %p3233_p9, %p4254_p11 }
 0x3aa   : > { %p3235_p1 = pneg %p3234_p13 }
 0x3d4   : > { %v1010_v62 = vpop.xlane.xlu1 %1009 }
 0x3d5   : > { %3040 = vrcp.f32 %v1010_v62 }
 0x3d8   : > { %v1013_v63 = vpop.xlane.xlu0 %1012 }
 0x3d9   : > { %3042 = vrcp.f32 %v1013_v63 }
 0x3dc   : > { %v1143_v39 = vpop.xlane.xlu1 %1142 }
 0x3dd   : > { %3044 = vrcp.f32 %v1143_v39 }
 0x3e0   : > { %v1146_v3 = vpop.xlane.xlu0 %1145 }
 0x3e1   : > { %3046 = vrcp.f32 %v1146_v3 }
 0x3e2   : > { %v3041_v4 = vpop.eup %3040 }
 0x3e3   : > { %v1016_v44 = vmul.f32 %v3041_v4, %v3922_v46 }
 0x3e4   : > { %v1276_v45 = vpop.xlane.xlu1 %1275 }
 0x3e5   : > { %3048 = vrcp.f32 %v1276_v45 }
 0x3e6   : > { %v3043_v5 = vpop.eup %3042 }
 0x3e7   : > { %v1017_v43 = vmul.f32 %v3043_v5, %v3927_v50 }
 0x3e8   : > { %v1279_v15 = vpop.xlane.xlu0 %1278 }
 0x3e9   : > { %3050 = vrcp.f32 %v1279_v15  ;;  %v1018_v18 = vpack.c.bf16 %v1017_v43, %v1016_v44 }
 0x3ea   : > { %v3045_v21 = vpop.eup %3044 }
 0x3eb   : > { %2754 = vmatmul.mubr.msk.bf16.vlgmr.msra.gmra.mxu1 %vm995_vm4, %v1018_v18  ;;  %v1149_v25 = vmul.f32 %v3045_v21, %v3932_v54 }
 0x3ec   : > { %2764 = vmatpush3.bf16.msra.mxu1 %v1153_v9  ;;  %v1414_v49 = vpop.xlane.xlu1 %1413  ;;  %2765 = vmatprep.mubr.msk.bf16.mxu1 %vm3353_vm0, %v3352_v0 }
 0x3ed   : > { %2775 = vmatprep.subr.bf16.mxu1 %v3352_v0  ;;  %3052 = vrcp.f32 %v1414_v49 }
 0x3ee   : > { %v3047_v24 = vpop.eup %3046 }
 0x3ef   : > { %v1150_v46 = vmul.f32 %v3047_v24, %v3937_v59 }
 0x3f0   : > { %v1417_v50 = vpop.xlane.xlu0 %1416 }
 0x3f1   : > { %3054 = vrcp.f32 %v1417_v50  ;;  %v1151_v26 = vpack.c.bf16 %v1150_v46, %v1149_v25 }
 0x3f2   : > { %v3049_v53 = vpop.eup %3048 }
 0x3f3   : > { %2766 = vmatmul.mubr.msk.bf16.vlgmr.msra.gmra.mxu1 %vm995_vm4, %v1151_v26  ;;  %v1282_v32 = vmul.f32 %v3049_v53, %v3942_v1 }
 0x3f4   : > { %2776 = vmatpush3.bf16.msra.mxu1 %v1286_v60  ;;  %2777 = vmatprep.mubr.msk.bf16.mxu1 %vm3353_vm0, %v3352_v0  ;;  %v1551_v29 = vpop.xlane.xlu0 %1550 }
 0x3f5   : > { %2787 = vmatprep.subr.bf16.mxu1 %v3352_v0 }
 0x3f6   : > { %v3051_v30 = vpop.eup %3050 }
 0x3f7   : > { %v1283_v54 = vmul.f32 %v3051_v30, %v3947_v14 }
 0x3f8   : > { %v1554_v59 = vpop.xlane.xlu0 %1553 }
 0x3f9   : > { %v1284_v57 = vpack.c.bf16 %v1283_v54, %v1282_v32  ;;  %3056 = vrcp.f32 %v1554_v59 }
 0x3fa   : > { %v3053_v33 = vpop.eup %3052  ;;  %3058 = vrcp.f32 %v1551_v29 }
 0x3fb   : > { %2778 = vmatmul.mubr.msk.bf16.vlgmr.msra.gmra.mxu1 %vm995_vm4, %v1284_v57  ;;  %v1420_v61 = vmul.f32 %v3053_v33, %v3952_v22 }
 0x3fc   : > { %v1689_v34 = vpop.xlane.xlu1 %1688  ;;  %2789 = vmatprep.mubr.msk.bf16.mxu1 %vm3353_vm0, %v3352_v0 }
 0x3fe   : > { %v3055_v36 = vpop.eup %3054 }
 0x3ff   : > { %v1421_v38 = vmul.f32 %v3055_v36, %v3957_v28 }
 0x400   : > { %v1424_v40 = vpop.permute.xlu1 %1423  ;;  %v1692_v1 = vpop.xlane.xlu0 %1691 }
 0x401   : > { %2788 = vmatpush3.bf16.msra.mxu1 %v1424_v40  ;;  %v1422_v14 = vpack.c.bf16 %v1421_v38, %v1420_v61  ;;  %3060 = vrcp.f32 %v1692_v1 }
 0x402   : > { %2799 = vmatprep.subr.bf16.mxu1 %v3352_v0  ;;  %3062 = vrcp.f32 %v1689_v34 }
 0x404   : > { %2790 = vmatmul.mubr.msk.bf16.vlgmr.msra.gmra.mxu1 %vm995_vm4, %v1422_v14  ;;  %v1826_v41 = vpop.xlane.xlu0 %1825 }
 0x405   : > { %2801 = vmatprep.mubr.msk.bf16.mxu1 %vm3353_vm0, %v3352_v0 }
 0x406   : > { %v3057_v13 = vpop.eup %3056 }
 0x407   : > { %v3059_v47 = vpop.eup %3058  ;;  %v1558_v28 = vmul.f32 %v3057_v13, %v3967_v37 }
 0x408   : > { %v1829_v2 = vpop.xlane.xlu0 %1828  ;;  %v1557_v23 = vmul.f32 %v3059_v47, %v3962_v16  ;;  %v2998_v47 = vld [vmem:[#allocation10 + $0x8] sm:$0xff]  }
 0x409   : > { %3064 = vrcp.f32 %v1829_v2  ;;  %2842 = vmatpush3.bf16.msra.mxu0 %v2998_v47 }
 0x40a   : > { %3066 = vrcp.f32 %v1826_v41  ;;  %v1559_v51 = vpack.c.bf16 %v1558_v28, %v1557_v23  ;;  %v2999_v28 = vld [vmem:[%s4196_s10 + $0x8] sm:$0xff]   ;;  %2843 = vmatprep.subr.bf16.mxu0 %v3352_v0 }
 0x40c   : > { %v1964_v22 = vpop.xlane.xlu0 %1963 }
 0x40d   : > { %3068 = vrcp.f32 %v1964_v22 }
 0x40e   : > { %v3061_v52 = vpop.eup %3060 }
 0x40f   : > { %v3063_v55 = vpop.eup %3062  ;;  %v1696_v37 = vmul.f32 %v3061_v52, %v3976_v10  ;;  %v3001_v52 = vld [vmem:[%s4196_s10] sm:$0xff]  }
 0x410   : > { %v1561_v19 = vpop.permute.xlu0 %1560  ;;  %v1695_v56 = vmul.f32 %v3063_v55, %v3972_v42 }
 0x411   : > { %2800 = vmatpush3.bf16.msra.mxu1 %v1561_v19 }
 0x412   : > { %2811 = vmatprep.subr.bf16.mxu1 %v3352_v0  ;;  %v1697_v16 = vpack.c.bf16 %v1696_v37, %v1695_v56 }
 0x414   : > { %2802 = vmatmul.mubr.msk.bf16.vlgmr.msra.gmra.mxu1 %vm995_vm4, %v1559_v51  ;;  %v1699_v31 = vpop.permute.xlu0 %1698  ;;  %v3000_v51 = vld [vmem:[#allocation10] sm:$0xff]  }
 0x415   : > { %2812 = vmatpush3.bf16.msra.mxu1 %v1699_v31  ;;  %2813 = vmatprep.mubr.msk.bf16.mxu1 %vm3353_vm0, %v3352_v0 }
 0x416   : > { %2823 = vmatprep.subr.bf16.mxu1 %v3352_v0  ;;  %v3065_v35 = vpop.eup %3064  ;;  %2844 = vmatpush3.bf16.msra.mxu0 %v3000_v51 }
 0x417   : > { %v3067_v9 = vpop.eup %3066  ;;  %v1833_v62 = vmul.f32 %v3065_v35, %v3984_v20  ;;  %2857 = vmatprep.subr.bf16.mxu0 %v3352_v0 }
 0x418   : > { %v1836_v60 = vpop.permute.xlu0 %1835  ;;  %v1832_v63 = vmul.f32 %v3067_v9, %v3980_v48  ;;  %v3003_v9 = vld [vmem:[#allocation12 + $0x8] sm:$0xff]  }
 0x41a   : > { %v1834_v39 = vpack.c.bf16 %v1833_v62, %v1832_v63  ;;  %v3069_v3 = vpop.eup %3068  ;;  %v3004_v62 = vld [vmem:[#allocation12] sm:$0xff]  }
 0x41b   : > { %v1970_v45 = vmul.f32 %v3069_v3, %v3988_v27 }
 0x41c   : > { %2814 = vmatmul.mubr.msk.bf16.vlgmr.msra.gmra.mxu1 %vm995_vm4, %v1697_v16  ;;  %v1974_v10 = vpop.permute.xlu0 %1973 }
 0x41d   : > { %2824 = vmatpush3.bf16.msra.mxu1 %v1836_v60  ;;  %2825 = vmatprep.mubr.msk.bf16.mxu1 %vm3353_vm0, %v3352_v0 }
 0x41e   : > { %2835 = vmatprep.subr.bf16.mxu1 %v3352_v0 }
 0x424   : > { %2826 = vmatmul.mubr.msk.bf16.vlgmr.msra.gmra.mxu1 %vm995_vm4, %v1834_v39 }
 0x425   : > { %2836 = vmatpush3.bf16.msra.mxu1 %v1974_v10  ;;  %2837 = vmatprep.mubr.msk.bf16.mxu1 %vm3353_vm0, %v3352_v0 }
 0x426   : > { %2849 = vmatprep.subr.bf16.mxu1 %v3352_v0 }
 0x431   : > { %v1967_v42 = vpop.xlane.xlu1 %1966 }
 0x432   : > { %3070 = vrcp.f32 %v1967_v42 }
 0x43f   : > { %v3071_v4 = vpop.eup %3070 }
 0x440   : > { %v1971_v20 = vmul.f32 %v3071_v4, %v3998_v58 }
 0x442   : > { %v1972_v48 = vpack.c.bf16 %v1971_v20, %v1970_v45 }
 0x444   : > { %2838 = vmatmul.mubr.msk.bf16.vlgmr.msra.gmra.mxu1 %vm995_vm4, %v1972_v48 }
 0x445   : > { %2853 = vmatprep.mubr.msk.bf16.mxu1 %vm3353_vm0, %v3352_v0  ;;  %2850 = vmatpush3.bf16.msra.mxu1 %v2999_v28 }
 0x446   : > { %2851 = vmatprep.subr.bf16.mxu1 %v3352_v0 }
 0x449   : > { %2852 = vmatpush3.bf16.msra.mxu1 %v3001_v52 }
 0x44a   : > { %2865 = vmatprep.subr.bf16.mxu1 %v3352_v0 }
 0x44c   : > { %2854 = vmatmul.mubr.msk.bf16.vlgmr.msra.gmra.mxu1 %vm777_vm1, %v2635_v11 }
 0x44d   : > { %2869 = vmatprep.mubr.msk.bf16.mxu1 %vm3353_vm0, %v3352_v0  ;;  %2866 = vmatpush3.bf16.msra.mxu1 %v3003_v9 }
 0x44e   : > { %2867 = vmatprep.subr.bf16.mxu1 %v3352_v0 }
 0x451   : > { %2868 = vmatpush3.bf16.msra.mxu1 %v3004_v62 }
 0x454   : > { %2870 = vmatmul.mubr.msk.bf16.vlgmr.msra.gmra.mxu1 %vm777_vm1, %v2644_v17 }
 0x4ab   : > { %v1060_v5 = vpop.f32.mrf.mxu1 }
 0x4ac   : > { %v2661_v44 = vpack.c.bf16 %v1060_v5, %v1060_v5 }
 0x4ad   : > { %v2755_v43 = vpop.f32.mrf.mxu1 }
 0x4ae   : > { %1076 = vst.msk [vmem:[#allocation2] sm:$0xf] %vm1075_vm6, %v2661_v44  ;;  %v3005_v44 = vld [vmem:[#allocation13 + $0x8] sm:$0xff]  }
 0x4af   : > { %v1063_v15 = vpop.f32.mrf.mxu1 }
 0x4b0   : > { %v2662_v18 = vpack.c.bf16 %v1063_v15, %v1063_v15  ;;  %v3006_v15 = vld [vmem:[#allocation13] sm:$0xff]  }
 0x4b1   : > { %v2756_v21 = vpop.f32.mrf.mxu1 }
 0x4b2   : > { %1077 = vst.msk [vmem:[#allocation2 + $0x4] sm:$0xf] %vm1075_vm6, %v2662_v18 }
 0x4b3   : > { %v1192_v49 = vpop.f32.mrf.mxu1 }
 0x4b4   : > { %v2663_v24 = vpack.c.bf16 %v1192_v49, %v1192_v49 }
 0x4b5   : > { %v2767_v27 = vpop.f32.mrf.mxu1 }
 0x4b6   : > { %1207 = vst.msk [vmem:[#allocation3] sm:$0xf] %vm1075_vm6, %v2663_v24 }
 0x4b7   : > { %v1195_v58 = vpop.f32.mrf.mxu1 }
 0x4b8   : > { %v2664_v25 = vpack.c.bf16 %v1195_v58, %v1195_v58 }
 0x4b9   : > { %v2768_v46 = vpop.f32.mrf.mxu1 }
 0x4ba   : > { %1208 = vst.msk [vmem:[#allocation3 + $0x4] sm:$0xf] %vm1075_vm6, %v2664_v25 }
 0x4bb   : > { %v1325_v50 = vpop.f32.mrf.mxu1 }
 0x4bc   : > { %v2665_v26 = vpack.c.bf16 %v1325_v50, %v1325_v50 }
 0x4bd   : > { %v2779_v53 = vpop.f32.mrf.mxu1 }
 0x4be   : > { %1338 = vrot.lane.b32.xlu0 %v2665_v26, %s3366_s20 }
 0x4bf   : > { %v1328_v29 = vpop.f32.mrf.mxu1 }
 0x4c0   : > { %v2666_v30 = vpack.c.bf16 %v1328_v29, %v1328_v29  ;;  %v2639_v29 = vld [vmem:[%s4198_s12] ss:$0 sm:$0xff] }
 0x4c1   : > { %v2780_v32 = vpop.f32.mrf.mxu1 }
 0x4c2   : > { %1340 = vrot.lane.b32.xlu1 %v2666_v30, %s3366_s20 }
 0x4c4   : > { %v1463_v54 = vpop.f32.mrf.mxu1 }
 0x4c5   : > { %v2667_v57 = vpack.c.bf16 %v1463_v54, %v1463_v54 }
 0x4c6   : > { %v2791_v59 = vpop.f32.mrf.mxu1 }
 0x4c7   : > { %1476 = vrot.lane.b32.xlu1 %v2667_v57, %s3366_s20 }
 0x4c8   : > { %v1466_v33 = vpop.f32.mrf.mxu1 }
 0x4c9   : > { %v2668_v34 = vpack.c.bf16 %v1466_v33, %v1466_v33 }
 0x4ca   : > { %v2792_v36 = vpop.f32.mrf.mxu1 }
 0x4cb   : > { %1478 = vrot.lane.b32.xlu0 %v2668_v34, %s3366_s20 }
 0x4d4   : > { %v1600_v61 = vpop.f32.mrf.mxu1 }
 0x4d5   : > { %v2669_v38 = vpack.c.bf16 %v1600_v61, %v1600_v61 }
 0x4d6   : > { %v2803_v40 = vpop.f32.mrf.mxu1 }
 0x4d7   : > { %1613 = vrot.lane.b32.xlu0 %v2669_v38, %s3367_s18 }
 0x4d8   : > { %v1603_v1 = vpop.f32.mrf.mxu1 }
 0x4d9   : > { %v2670_v14 = vpack.c.bf16 %v1603_v1, %v1603_v1 }
 0x4da   : > { %v2804_v41 = vpop.f32.mrf.mxu1 }
 0x4db   : > { %1615 = vrot.lane.b32.xlu0 %v2670_v14, %s3367_s18 }
 0x4dc   : > { %v1738_v2 = vpop.f32.mrf.mxu1 }
 0x4dd   : > { %v2671_v13 = vpack.c.bf16 %v1738_v2, %v1738_v2 }
 0x4de   : > { %v2815_v22 = vpop.f32.mrf.mxu1 }
 0x4df   : > { %1751 = vrot.lane.b32.xlu1 %v2671_v13, %s3367_s18 }
 0x4e0   : > { %v1741_v19 = vpop.f32.mrf.mxu1 }
 0x4e1   : > { %v2672_v60 = vpack.c.bf16 %v1741_v19, %v1741_v19 }
 0x4e2   : > { %v2816_v23 = vpop.f32.mrf.mxu1 }
 0x4e4   : > { %v1875_v31 = vpop.f32.mrf.mxu1 }
 0x4e5   : > { %v2673_v55 = vpack.c.bf16 %v1875_v31, %v1875_v31 }
 0x4e6   : > { %v2827_v37 = vpop.f32.mrf.mxu1 }
 0x4e7   : > { %1888 = vrot.lane.b32.xlu0 %v2673_v55, %s3368_s17 }
 0x4e8   : > { %v1878_v56 = vpop.f32.mrf.mxu1 }
 0x4e9   : > { %v2674_v16 = vpack.c.bf16 %v1878_v56, %v1878_v56 }
 0x4ea   : > { %v2828_v35 = vpop.f32.mrf.mxu1 }
 0x4eb   : > { %1890 = vrot.lane.b32.xlu0 %v2674_v16, %s3368_s17 }
 0x4ef   : > { %1753 = vrot.lane.b32.xlu0 %v2672_v60, %s3367_s18  ;;  %s3369_s18 = smov [#allocation15]  }
 0x4f0   : > { %s3236_s11 = sshll.u32 %s3369_s18, 4  ;;  %s3237_s11 = int_to_ptr.vmem [resolvable:$false] %s3236_s11 }
 0x4f1   : > { %s3238_s5 = scalar_lea.vmem %s3237_s11, 512  ;;  %p3239_p4 = scmp.lt.s32.totalorder %s4095_s14, %s3237_s11 }
 0x4f2   : > { %p3240_p6 = scmp.lt.s32.totalorder %s3238_s5, %s3232_s24 }
 0x4f4   : > { %p3241_p10 = por %p3240_p6, %p3239_p4 }
 0x4f6   : > { %p3242_p3 = pnand %p3241_p10, %p3235_p1 }
 0x504   : > { %v2013_v6 = vpop.f32.mrf.mxu1 }
 0x505   : > { %v2675_v7 = vpack.c.bf16 %v2013_v6, %v2013_v6 }
 0x506   : > { %v2839_v11 = vpop.f32.mrf.mxu1 }
 0x507   : > { %2026 = vrot.lane.b32.xlu1 %v2675_v7, %s3368_s17 }
 0x508   : > { %v2016_v63 = vpop.f32.mrf.mxu1 }
 0x509   : > { %v2676_v39 = vpack.c.bf16 %v2016_v63, %v2016_v63 }
 0x50a   : > { %v2840_v10 = vpop.f32.mrf.mxu1 }
 0x50b   : > { %2028 = vrot.lane.b32.xlu0 %v2676_v39, %s3368_s17 }
 0x50c   : > { %v2161_v24 = vpop.f32.mrf.mxu1 }
 0x50e   : > { %v2855_v27 = vpop.f32.mrf.mxu1 }
 0x510   : > { %v2164_v58 = vpop.f32.mrf.mxu1 }
 0x512   : > { %v2856_v25 = vpop.f32.mrf.mxu1 }
 0x514   : > { %v2300_v46 = vpop.f32.mrf.mxu1 }
 0x516   : > { %v2871_v50 = vpop.f32.mrf.mxu1 }
 0x530   : > { %v1339_v42 = vpop.permute.xlu0 %1338 }
 0x531   : > { %1345 = vst.msk [vmem:[#allocation2] sm:$0xf] %vm1344_vm7, %v1339_v42 }
 0x534   : > { %v1341_v3 = vpop.permute.xlu1 %1340 }
 0x535   : > { %1346 = vst.msk [vmem:[#allocation2 + $0x4] sm:$0xf] %vm1344_vm7, %v1341_v3 }
 0x539   : > { %v1477_v4 = vpop.permute.xlu1 %1476 }
 0x53a   : > { %1482 = vst.msk [vmem:[#allocation3] sm:$0xf] %vm1344_vm7, %v1477_v4 }
 0x53d   : > { %v1479_v45 = vpop.permute.xlu0 %1478 }
 0x53e   : > { %1483 = vst.msk [vmem:[#allocation3 + $0x4] sm:$0xf] %vm1344_vm7, %v1479_v45 }
 0x549   : > { %v1614_v8 = vpop.permute.xlu0 %1613 }
 0x54a   : > { %1620 = vst.msk [vmem:[#allocation2] sm:$0xf] %vm1619_vm8, %v1614_v8 }
 0x54d   : > { %v1616_v12 = vpop.permute.xlu0 %1615 }
 0x54e   : > { %1621 = vst.msk [vmem:[#allocation2 + $0x4] sm:$0xf] %vm1619_vm8, %v1616_v12 }
 0x551   : > { %v1752_v17 = vpop.permute.xlu1 %1751 }
 0x552   : > { %1757 = vst.msk [vmem:[#allocation3] sm:$0xf] %vm1619_vm8, %v1752_v17 }
 0x559   : > { %v1889_v20 = vpop.permute.xlu0 %1888 }
 0x55a   : > { %1895 = vst.msk [vmem:[#allocation2] sm:$0xf] %vm1894_vm9, %v1889_v20 }
 0x55d   : > { %v1891_v48 = vpop.permute.xlu0 %1890 }
 0x55e   : > { %1896 = vst.msk [vmem:[#allocation2 + $0x4] sm:$0xf] %vm1894_vm9, %v1891_v48 }
 0x561   : > { %v1754_v5 = vpop.permute.xlu0 %1753 }
 0x562   : > { %1758 = vst.msk [vmem:[#allocation3 + $0x4] sm:$0xf] %vm1619_vm8, %v1754_v5 }
 0x565   : > { %v3002_v43 = vld [vmem:[#allocation2] sm:$0xff]  }
 0x566   : > { %2846 = vmatmul.mubr.msk.bf16.vlgmr.msra.gmra.mxu0 %vm777_vm1, %v3002_v43 }
 0x567   : > { %2858 = vmatpush3.bf16.msra.mxu0 %v3005_v44  ;;  %2861 = vmatprep.mubr.msk.bf16.mxu0 %vm3353_vm0, %v3352_v0 }
 0x568   : > { %2859 = vmatprep.subr.bf16.mxu0 %v3352_v0  ;;  %v2303_v0 = vpop.f32.mrf.mxu1 }
 0x56a   : > { %v2872_v26 = vpop.f32.mrf.mxu1 }
 0x56b   : > { %2860 = vmatpush3.bf16.msra.mxu0 %v3006_v15 }
 0x579   : > { %v2027_v18 = vpop.permute.xlu1 %2026 }
 0x57a   : > { %2032 = vst.msk [vmem:[#allocation3] sm:$0xf] %vm1894_vm9, %v2027_v18 }
 0x57d   : > { %v2029_v21 = vpop.permute.xlu0 %2028 }
 0x57e   : > { %2033 = vst.msk [vmem:[#allocation3 + $0x4] sm:$0xf] %vm1894_vm9, %v2029_v21 }
 0x585   : > { %v3007_v49 = vld [vmem:[#allocation3] sm:$0xff]  }
 0x586   : > { %2862 = vmatmul.mubr.msk.bf16.vlgmr.msra.gmra.mxu0 %vm777_vm1, %v3007_v49 }
 0x626   : > { %v2100_v53 = vpop.f32.mrf.mxu0 }
 0x627   : > { %v2162_v30 = vadd.f32 %v2161_v24, %v2100_v53 }
 0x628   : > { %v2847_v32 = vpop.f32.mrf.mxu0 }
 0x629   : > { %v2175_v54 = vadd.f32 %v2639_v29, %v2162_v30 }
 0x62a   : > { %v2103_v57 = vpop.f32.mrf.mxu0 }
 0x62b   : > { %2316 = vst [vmem:[%s714_s13] sm:$0xff] %v2175_v54  ;;  %v2165_v59 = vadd.f32 %v2164_v58, %v2103_v57 }
 0x62c   : > { %v2848_v33 = vpop.f32.mrf.mxu0 }
 0x62d   : > { %v2176_v34 = vadd.f32 %v2639_v29, %v2165_v59 }
 0x62f   : > { %2317 = vst [vmem:[%s714_s13 + $0x8] sm:$0xff] %v2176_v34 }
 0x630   : > { %3245 = shalt.err (!%p3242_p3)
}
 0x631   : > { %s3246_s15 = scalar_lea.hbm %s4102_s26, 256  ;;  %s3250_s29 = scalar_lea.hbm %s4202_s16, 512 }
 0x632   : > { %p3247_p7 = scmp.ne.s32.totalorder %s4102_s26, %s3246_s15  ;;  %p3251_p12 = scmp.lt.s32.totalorder %s4102_s26, %s4202_s16 }
 0x633   : > { %p3252_p0 = scmp.lt.s32.totalorder %s3250_s29, %s3246_s15 }
 0x634   : > { %p3248_p5 = pnand %p3247_p7, %p4254_p11 }
 0x635   : > { %p3253_p2 = por %p3252_p0, %p3251_p12 }
 0x636   : > { %p3249_p8 = pneg %p3248_p5 }
 0x638   : > { %p3254_p9 = pnand %p3253_p2, %p3249_p8 }
 0x63a   : > { %3257 = shalt.err (!%p3254_p9)
}
 0x63b   : > { %s3370_s19 = smov 128   ;;  %s4255_s18 = sld [smem:[#allocation38_spill]] }
 0x63c   : > { %2893 = dma.vmem_to_hbm [thread:$0]  (%p4254_p11), %s4095_s14, 256, %s4102_s26, %s2321_s1, %s3370_s19, %s3370_s19, %s3366_s20  }
 0x63d   : > { %s721_s11 = scalar_lea.vmem [#allocation16], %s2577_s7  ;;  %s4256_s1 = sld [smem:[#allocation39_spill]] }
 0x63e   : > { %s2355_s5 = sshll.u32 %s721_s11, 4  ;;  %s2326_s30 = scalar_lea.sflag [#allocation17], %s3657_s3  ;;  %s4135_s5 = int_to_ptr.vmem [resolvable:$true] %s2355_s5 }
 0x63f   : > { %s3258_s7 = scalar_lea.vmem %s4135_s5, 256  ;;  %s3371_s17 = smov [#allocation16]  }
 0x640   : > { %p3259_p13 = scmp.ne.s32.totalorder %s4135_s5, %s3258_s7  ;;  %s3262_s29 = sshll.u32 %s3371_s17, 4  ;;  %s3263_s29 = int_to_ptr.vmem [resolvable:$false] %s3262_s29 }
 0x641   : > { %v2648_v61 = vld [vmem:[%s4255_s18] ss:$0 sm:$0xff]  ;;  %s3264_s21 = scalar_lea.vmem %s3263_s29, 512  ;;  %p3265_p6 = scmp.lt.s32.totalorder %s4135_s5, %s3263_s29 }
 0x642   : > { %p3260_p1 = pnand %p3259_p13, %p4254_p11  ;;  %p3266_p10 = scmp.lt.s32.totalorder %s3264_s21, %s3258_s7 }
 0x643   : > { %s4142_s15 = scalar_lea.hbm %s4256_s1, %s2677_s28 }
 0x644   : > { %p3261_p4 = pneg %p3260_p1  ;;  %p3267_p3 = por %p3266_p10, %p3265_p6 }
 0x646   : > { %v2239_v36 = vpop.f32.mrf.mxu0  ;;  %p3268_p7 = pnand %p3267_p3, %p3261_p4 }
 0x647   : > { %v2301_v38 = vadd.f32 %v2300_v46, %v2239_v36 }
 0x648   : > { %v2863_v40 = vpop.f32.mrf.mxu0 }
 0x649   : > { %v2314_v1 = vadd.f32 %v2648_v61, %v2301_v38 }
 0x64a   : > { %v2242_v14 = vpop.f32.mrf.mxu0 }
 0x64b   : > { %2318 = vst [vmem:[%s721_s11] sm:$0xff] %v2314_v1  ;;  %v2304_v41 = vadd.f32 %v2303_v0, %v2242_v14 }
 0x64c   : > { %v2864_v2 = vpop.f32.mrf.mxu0 }
 0x64d   : > { %v2315_v13 = vadd.f32 %v2648_v61, %v2304_v41 }
 0x64f   : > { %2319 = vst [vmem:[%s721_s11 + $0x8] sm:$0xff] %v2315_v13 }
 0x650   : > { %3271 = shalt.err (!%p3268_p7)
}
 0x651   : > { %s3272_s0 = scalar_lea.hbm %s4142_s15, 256  ;;  %s3276_s13 = scalar_lea.hbm %s4256_s1, 512 }
 0x652   : > { %p3273_p5 = scmp.ne.s32.totalorder %s4142_s15, %s3272_s0  ;;  %p3277_p0 = scmp.lt.s32.totalorder %s4142_s15, %s4256_s1 }
 0x653   : > { %p3278_p2 = scmp.lt.s32.totalorder %s3276_s13, %s3272_s0 }
 0x654   : > { %p3274_p8 = pnand %p3273_p5, %p4254_p11 }
 0x655   : > { %p3279_p9 = por %p3278_p2, %p3277_p0 }
 0x656   : > { %p3275_p12 = pneg %p3274_p8 }
 0x658   : > { %p3280_p13 = pnand %p3279_p9, %p3275_p12 }
 0x65a   : > { %3283 = shalt.err (!%p3280_p13)
}
 0x65b   : > { %2894 = dma.vmem_to_hbm [thread:$0]  (%p4254_p11), %s4135_s5, 256, %s4142_s15, %s2326_s30, %s3370_s19, %s3370_s19, %s3366_s20  }
 0x65c PF: > { %s4257_s18 = sld [smem:[#allocation25_spill]]  ;;  %p4260_p4 = scmp.ge.s32.totalorder %s3342_s27, 2 }
 0x65d   : > { %s4258_s11 = sld [smem:[#allocation29_spill]] }
 0x662   : > { %s2370_s14 = sand.u32 1, %s4257_s18  }
 0x663   : > { %p4259_p1 = scmp.ne.s32.totalorder %s4258_s11, 0  ;;  %s2371_s26 = scalar_lea.sflag [#allocation6], %s2370_s14 }
 0x665   : > { %p2918_p6 = pnand %p4260_p4, %p4259_p1 }
 0x667   : > { %p2919_p10 = pneg %p2918_p6 }
 0x669   : > { %3321 = dma.done.wait (%p2919_p10), %s2371_s26, 256  }
 0x66a   : > { %3323 = vsyncadd (%p2919_p10), %s2371_s26, 4294967040  ;;  %s2380_s7 = scalar_lea.sflag [#allocation17], %s2370_s14 }
 0x66b   : > { %3325 = dma.done.wait (%p2919_p10), %s2380_s7, 256  }
 0x66c   : > { %3327 = vsyncadd (%p2919_p10), %s2380_s7, 4294967040  ;;  %s4261_s27 = sld [smem:[#allocation27_spill]]  ;;  %s4264_s24 = smov %s3334_s25 }
 0x66d   : > { %s4262_s23 = sld [smem:[#allocation26_spill]] }
 0x66e   : > { %s4263_s26 = sld [smem:[#allocation28_spill]] }
 0x672   : > { %p39_p11 = scmp.ge.s32.totalorder %s4261_s27, 4  }
 0x673   : > { %s4265_s25 = smov %s4262_s23 }
 0x674   :  { %41 = sbr.rel (!%p39_p11) target bundleno = 22 (0x16), region = 187 }
 0x679   :  { %2385 = vsyncpa [#allocation5], 1 }
 0x67a   :  { %2387 = vsyncpa [#allocation5 + $0x1], 1 }
 0x67b   :  { %2388 = vsyncpa [#allocation8], 1 }
 0x67c   :  { %2390 = vsyncpa [#allocation8 + $0x1], 1 }
 0x67d   :  { %2391 = vsyncpa [#allocation11], 1 }
 0x67e   :  { %2392 = vsyncpa [#allocation14], 1 }
 0x67f   :  { %2393 = vsyncpa [#allocation6], 1 }
 0x680   :  { %2395 = vsyncpa [#allocation6 + $0x1], 1 }
 0x681   :  { %2396 = vsyncpa [#allocation17], 1 }
 0x682   :  { %2398 = vsyncpa [#allocation17 + $0x1], 1 }

// kernel: tpu_custom_call.1
= control target key start
LH: loop header
LB: loop body
LE: loop exit
PB: predicated region body
PF: predicated region fallthrough
CT: control target
= control target key end

     0   :  { %s4186_s0 = inlined_call_operand.vmem [shape: bf16[2,16,32], index: 0, kind: input, shape index: {}]   ;;  %s4187_s1 = inlined_call_operand.vmem [shape: bf16[2,16,32], index: 1, kind: input, shape index: {}]   ;;  %s4188_s2 = inlined_call_operand.vmem [shape: f32[2,16,1], index: 2, kind: input, shape index: {}]   ;;  %s4189_s3 = inlined_call_operand.hbm [shape: f32[2,1,16], index: 3, kind: input, shape index: {}]   ;;  %s4190_s4 = inlined_call_operand.vmem [shape: f32[2,16,1], index: 4, kind: input, shape index: {}]   ;;  %s4191_s5 = inlined_call_operand.hbm [shape: f32[2,1,16], index: 5, kind: input, shape index: {}]   ;;  %s4192_s6 = inlined_call_operand.vmem [shape: bf16[32,96], index: 6, kind: input, shape index: {}]   ;;  %s4193_s7 = inlined_call_operand.hbm [shape: f32[1,96], index: 7, kind: input, shape index: {}]   ;;  %s4194_s8 = inlined_call_operand.vmem [shape: bf16[32,96], index: 8, kind: input, shape index: {}]   ;;  %s4195_s9 = inlined_call_operand.vmem [shape: f32[1,96], index: 9, kind: input, shape index: {}]   ;;  %s4196_s10 = inlined_call_operand.vmem [shape: bf16[32,128], index: 10, kind: input, shape index: {}]   ;;  %s4197_s11 = inlined_call_operand.hbm [shape: bf16[32,128], index: 11, kind: input, shape index: {}]   ;;  %s4198_s12 = inlined_call_operand.vmem [shape: f32[1,128], index: 12, kind: input, shape index: {}]   ;;  %s4199_s13 = inlined_call_operand.hbm [shape: bf16[32,128], index: 13, kind: input, shape index: {}]   ;;  %s4200_s14 = inlined_call_operand.hbm [shape: bf16[32,128], index: 14, kind: input, shape index: {}]   ;;  %s4201_s15 = inlined_call_operand.vmem [shape: f32[1,128], index: 15, kind: input, shape index: {}]   ;;  %s4202_s16 = inlined_call_operand.hbm [shape: f32[2,16,128], index: 16, kind: output, shape index: {0}]   ;;  %s4203_s17 = inlined_call_operand.hbm [shape: f32[2,16,128], index: 17, kind: output, shape index: {1}]  }
   0x1   :  { %4214 = sst [smem:[#allocation30_spill]] %s4186_s0 }
   0x2   :  { %4215 = sst [smem:[#allocation31_spill]] %s4187_s1 }
   0x3   :  { %4216 = sst [smem:[#allocation32_spill]] %s4189_s3 }
   0x4   :  { %4217 = sst [smem:[#allocation33_spill]] %s4191_s5 }
   0x5   :  { %4218 = sst [smem:[#allocation34_spill]] %s4193_s7 }
   0x6   :  { %4219 = sst [smem:[#allocation35_spill]] %s4197_s11 }
   0x7   :  { %4220 = sst [smem:[#allocation36_spill]] %s4199_s13 }
   0x8   :  { %4221 = sst [smem:[#allocation37_spill]] %s4200_s14 }
   0x9   :  { %4222 = sst [smem:[#allocation38_spill]] %s4201_s15 }
   0xa   :  { %4223 = sst [smem:[#allocation39_spill]] %s4203_s17 }
   0xb   :  { %23 = vsyncpa [#allocation5], 0 }
   0xc   :  { %25 = vsyncpa [#allocation5 + $0x1], 0 }
   0xd   :  { %26 = vsyncpa [#allocation8], 0 }
   0xe   :  { %28 = vsyncpa [#allocation8 + $0x1], 0 }
   0xf   :  { %29 = vsyncpa [#allocation11], 0 }
  0x10   :  { %30 = vsyncpa [#allocation14], 0 }
  0x11   :  { %31 = vsyncpa [#allocation6], 0 }
  0x12   :  { %33 = vsyncpa [#allocation6 + $0x1], 0 }
  0x13   :  { %34 = vsyncpa [#allocation17], 0 }
  0x14   :  { %36 = vsyncpa [#allocation17 + $0x1], 0  ;;  %s3462_s24 = smov 0   ;;  %s3464_s25 = smov 0  }
  0x15   :  { %s3466_s26 = smov 0   ;;  %s3468_s27 = smov 0  }
  0x16 LB: > { %4224 = sst [smem:[#allocation25_spill]] %s3330_s24  ;;  %s3344_s28 = smov [#allocation9]   ;;  %s3342_s27 = sphi %s3468_s27, %s4261_s27   ;;  %s3338_s26 = sphi %s3466_s26, %s4263_s26   ;;  %s3334_s25 = sphi %s3464_s25, %s4265_s25   ;;  %s3330_s24 = sphi %s3462_s24, %s4264_s24  }
  0x17   : > { %4225 = sst [smem:[#allocation26_spill]] %s3338_s26  ;;  %s481_s29 = sshll.u32 %s3344_s28, 4  ;;  %s482_s29 = int_to_ptr.vmem [resolvable:$true] %s481_s29 }
  0x18   : > { %s3483_s0 = sadd.s32 4294967295, %s3342_s27   ;;  %p2564_p0 = scmp.ge.s32.totalorder %s3342_s27, 1 }
  0x19   : > { %p4210_p1 = scmp.eq.s32.totalorder %s3483_s0, 0  ;;  %p465_p2 = scmp.lt.s32.totalorder %s3342_s27, 3 }
  0x1a   : > { %s3345_s18 = smov [#allocation10]   ;;  %s3346_s20 = smov [#allocation12]  }
  0x1b   : > { %p3488_p3 = pnand %p2564_p0, %p465_p2  ;;  %s500_s19 = sshll.u32 %s3345_s18, 4  ;;  %s3495_s19 = int_to_ptr.vmem [resolvable:$true] %s500_s19 }
  0x1c   : > { %s516_s21 = sshll.u32 %s3346_s20, 4  ;;  %s3083_s22 = scalar_lea.vmem %s482_s29, 16  ;;  %s3503_s21 = int_to_ptr.vmem [resolvable:$true] %s516_s21 }
  0x1d   : > { %s4226_s30 = scalar_select %p3488_p3, 1, 0 }
  0x1e   : > { %p2897_p5 = pneg %p3488_p3  ;;  %p3084_p8 = scmp.ne.s32.totalorder %s482_s29, %s3083_s22 }
  0x1f   : > { %s3090_s23 = scalar_lea.vmem %s482_s29, 32  ;;  %p3091_p11 = scmp.lt.s32.totalorder %s482_s29, %s482_s29 }
  0x20   : > { %p3499_p6 = pnand %p2897_p5, %p4210_p1  ;;  %p3092_p12 = scmp.lt.s32.totalorder %s3090_s23, %s3083_s22 }
  0x22   : > { %p3074_p7 = pneg %p3499_p6  ;;  %p3093_p13 = por %p3092_p12, %p3091_p11 }
  0x24   : > { %p3086_p9 = pnand %p3084_p8, %p3074_p7 }
  0x26   : > { %p3087_p10 = pneg %p3086_p9 }
  0x28   : > { %p3094_p0 = pnand %p3093_p13, %p3087_p10 }
  0x2a   : > { %3097 = shalt.err (!%p3094_p0)
}
  0x2b   : > { %s4228_s7 = sld [smem:[#allocation34_spill]]  ;;  %s3109_s20 = scalar_lea.vmem %s3495_s19, 256 }
  0x2c   : > { %p3110_p2 = scmp.ne.s32.totalorder %s3495_s19, %s3109_s20  ;;  %p3117_p9 = scmp.lt.s32.totalorder %s3495_s19, %s3495_s19 }
  0x2d   : > { %p3118_p10 = scmp.lt.s32.totalorder %s3109_s20, %s3109_s20 }
  0x2e   : > { %p3112_p5 = pnand %p3110_p2, %p3074_p7 }
  0x2f   : > { %p3119_p11 = por %p3118_p10, %p3117_p9 }
  0x30   : > { %p3113_p8 = pneg %p3112_p5 }
  0x31   : > { %2900 = dma.hbm_to_vmem [thread:$0]  (!%p3499_p6), %s4228_s7, 16, %s482_s29, [#allocation8]  }
  0x32   : > { %p3120_p12 = pnand %p3119_p11, %p3113_p8 }
  0x34   : > { %3123 = shalt.err (!%p3120_p12)
}
  0x35   : > { %s3347_s22 = smov 64   ;;  %s3348_s29 = smov 4  }
  0x36   : > { %s4229_s11 = sld [smem:[#allocation35_spill]]  ;;  %s3135_s18 = scalar_lea.vmem %s3503_s21, 256 }
  0x37   : > { %p3136_p13 = scmp.ne.s32.totalorder %s3503_s21, %s3135_s18  ;;  %p3143_p5 = scmp.lt.s32.totalorder %s3503_s21, %s3503_s21 }
  0x38   : > { %p3144_p8 = scmp.lt.s32.totalorder %s3135_s18, %s3135_s18 }
  0x39   : > { %p3138_p0 = pnand %p3136_p13, %p3074_p7 }
  0x3a   : > { %p3145_p9 = por %p3144_p8, %p3143_p5 }
  0x3b   : > { %p3139_p2 = pneg %p3138_p0 }
  0x3c   : > { %2903 = dma.hbm_to_vmem [thread:$0]  (!%p3499_p6), %s4229_s11, 256, %s3495_s19, [#allocation11], %s3347_s22, %s3347_s22, %s3348_s29  }
  0x3d   : > { %p3146_p10 = pnand %p3145_p9, %p3139_p2 }
  0x3f   : > { %3149 = shalt.err (!%p3146_p10)
}
  0x40   : > { %s4230_s13 = sld [smem:[#allocation36_spill]]  ;;  %s3349_s19 = smov [#allocation13]  }
  0x41   : > { %s529_s23 = sshll.u32 %s3349_s19, 4  ;;  %s530_s23 = int_to_ptr.vmem [resolvable:$true] %s529_s23 }
  0x42   : > { %s3161_s28 = scalar_lea.vmem %s530_s23, 256  ;;  %p3169_p0 = scmp.lt.s32.totalorder %s530_s23, %s530_s23 }
  0x43   : > { %p3162_p11 = scmp.ne.s32.totalorder %s530_s23, %s3161_s28  ;;  %p3170_p2 = scmp.lt.s32.totalorder %s3161_s28, %s3161_s28 }
  0x45   : > { %p3164_p12 = pnand %p3162_p11, %p3074_p7  ;;  %p3171_p5 = por %p3170_p2, %p3169_p0 }
  0x46   : > { %2906 = dma.hbm_to_vmem [thread:$0]  (!%p3499_p6), %s4230_s13, 256, %s3503_s21, [#allocation11], %s3347_s22, %s3347_s22, %s3348_s29  }
  0x47   : > { %p3165_p13 = pneg %p3164_p12 }
  0x49   : > { %p3172_p8 = pnand %p3171_p5, %p3165_p13 }
  0x4b   : > { %3175 = shalt.err (!%p3172_p8)
}
  0x4c   : > { %s4231_s14 = sld [smem:[#allocation37_spill]]  ;;  %s2563_s21 = sadd.s32 4294967294, %s3342_s27  }
  0x4d   : > { %s3551_s1 = sadd.s32 1, %s3342_s27   ;;  %s127_s19 = sadd.s32 1, %s3338_s26 }
  0x4e   : > { %4232 = sst [smem:[#allocation27_spill]] %s3551_s1  ;;  %s124_s20 = ssub.s32 %s3342_s27, %s3551_s1 }
  0x4f   : > { %p125_p7 = scmp.eq.s32.totalorder %s124_s20, 0  ;;  %p134_p9 = scmp.ne.s32.totalorder %s3338_s26, %s3334_s25 }
  0x50   : > { %p135_p10 = scmp.eq.s32.totalorder %s3342_s27, 0  ;;  %p140_p11 = scmp.ne.s32.totalorder %s3334_s25, %s3330_s24 }
  0x51   : > { %s3562_s28 = scalar_select %p125_p7, %s3338_s26, %s127_s19  }
  0x52   : > { %2909 = dma.hbm_to_vmem [thread:$0]  (!%p3499_p6), %s4231_s14, 256, %s530_s23, [#allocation14], %s3347_s22, %s3347_s22, %s3348_s29  }
  0x53   : > { %4233 = sst [smem:[#allocation28_spill]] %s3562_s28  ;;  %p3564_p12 = por %p135_p10, %p134_p9 }
  0x54   : > { %p3570_p6 = por %p4210_p1, %p140_p11  ;;  %p426_p13 = scmp.eq.s32.totalorder %s3483_s0, 1 }
  0x55   : > { %p432_p0 = scmp.eq.s32.totalorder %s2563_s21, 1  ;;  %p2928_p2 = scmp.lt.s32.totalorder %s3342_s27, 2 }
  0x56   : > { %s4235_s22 = scalar_select %p3570_p6, 1, 0 }
  0x57   : > { %s3577_s29 = sand.u32 1, %s3338_s26   ;;  %p3579_p5 = por %p426_p13, %p134_p9 }
  0x58   : > { %p3583_p8 = por %p432_p0, %p140_p11  ;;  %s2570_s20 = sshll.u32 %s3342_s27, 4 }
  0x59   : > { %s4236_s23 = scalar_select %p3579_p5, 1, 0 }
  0x5a   : > { %s4237_s7 = scalar_select %p3583_p8, 1, 0 }
  0x5b   : > { %s573_s19 = scalar_lea.vmem [#allocation4], %s3577_s29  ;;  %s4239_s3 = sld [smem:[#allocation32_spill]] }
  0x5c   : > { %4238 = sst [smem:[#allocation29_spill]] %s4237_s7  ;;  %s580_s11 = sshll.u32 %s573_s19, 4  ;;  %s3594_s11 = int_to_ptr.vmem [resolvable:$true] %s580_s11 }
  0x5d   : > { %p3598_p7 = pnand %p2928_p2, %p3564_p12  ;;  %s4241_s5 = sld [smem:[#allocation33_spill]] }
  0x5e   : > { %s595_s13 = sand.u32 1, %s3342_s27   ;;  %s571_s14 = scalar_lea.sflag [#allocation5], %s3577_s29 }
  0x5f   : > { %p3178_p10 = pneg %p3598_p7 }
  0x61   : > { %s3592_s21 = scalar_lea.hbm %s4239_s3, %s2570_s20  ;;  %s3181_s17 = scalar_lea.hbm %s4239_s3, 32 }
  0x62   : > { %s3176_s7 = scalar_lea.hbm %s3592_s21, 16  ;;  %p3182_p13 = scmp.lt.s32.totalorder %s3592_s21, %s4239_s3 }
  0x63   : > { %s3605_s19 = scalar_lea.hbm %s4241_s5, %s2570_s20  ;;  %p3177_p9 = scmp.ne.s32.totalorder %s3592_s21, %s3176_s7 }
  0x64   : > { %p3183_p0 = scmp.lt.s32.totalorder %s3181_s17, %s3176_s7 }
  0x65   : > { %p3179_p11 = pnand %p3178_p10, %p3177_p9 }
  0x66   : > { %p3184_p2 = por %p3183_p0, %p3182_p13 }
  0x67   : > { %p3180_p12 = pneg %p3179_p11 }
  0x69   : > { %p3185_p4 = pnand %p3184_p2, %p3180_p12 }
  0x6b   : > { %3188 = shalt.err (!%p3185_p4)
}
  0x6c   : > { %s3189_s1 = scalar_lea.vmem %s3594_s11, 16  ;;  %s3350_s24 = smov [#allocation4]  }
  0x6d   : > { %p3190_p1 = scmp.ne.s32.totalorder %s3594_s11, %s3189_s1  ;;  %s3194_s20 = sshll.u32 %s3350_s24, 4  ;;  %s3195_s20 = int_to_ptr.vmem [resolvable:$false] %s3194_s20 }
  0x6e   : > { %s3196_s18 = scalar_lea.vmem %s3195_s20, 32  ;;  %p3197_p8 = scmp.lt.s32.totalorder %s3594_s11, %s3195_s20 }
  0x6f   : > { %p3192_p9 = pnand %p3190_p1, %p3178_p10  ;;  %p3198_p5 = scmp.lt.s32.totalorder %s3196_s18, %s3189_s1 }
  0x71   : > { %p3193_p11 = pneg %p3192_p9  ;;  %p3199_p6 = por %p3198_p5, %p3197_p8 }
  0x73   : > { %p3200_p13 = pnand %p3199_p6, %p3193_p11 }
  0x75   : > { %3203 = shalt.err (!%p3200_p13)
}
  0x76   : > { %2913 = dma.hbm_to_vmem [thread:$0]  (!%p3598_p7), %s3592_s21, 16, %s3594_s11, %s571_s14  }
  0x77   : > { %s598_s15 = scalar_lea.vmem [#allocation7], %s3577_s29  ;;  %s596_s7 = scalar_lea.sflag [#allocation8], %s595_s13 }
  0x78   : > { %s605_s17 = sshll.u32 %s598_s15, 4  ;;  %s3204_s26 = scalar_lea.hbm %s3605_s19, 16  ;;  %s606_s17 = int_to_ptr.vmem [resolvable:$true] %s605_s17 }
  0x79   : > { %p3205_p1 = scmp.ne.s32.totalorder %s3605_s19, %s3204_s26  ;;  %s3209_s20 = scalar_lea.hbm %s4241_s5, 32 }
  0x7a   : > { %p3210_p5 = scmp.lt.s32.totalorder %s3605_s19, %s4241_s5  ;;  %p3211_p8 = scmp.lt.s32.totalorder %s3209_s20, %s3204_s26 }
  0x7b   : > { %p3207_p4 = pnand %p3205_p1, %p3178_p10 }
  0x7c   : > { %p3212_p12 = por %p3211_p8, %p3210_p5 }
  0x7d   : > { %p3208_p6 = pneg %p3207_p4 }
  0x7f   : > { %p3213_p0 = pnand %p3212_p12, %p3208_p6 }
  0x81   : > { %3216 = shalt.err (!%p3213_p0)
}
  0x82   : > { %s3217_s11 = scalar_lea.vmem %s606_s17, 16  ;;  %s3351_s29 = smov [#allocation7]  }
  0x83   : > { %p3218_p2 = scmp.ne.s32.totalorder %s606_s17, %s3217_s11  ;;  %s3222_s21 = sshll.u32 %s3351_s29, 4  ;;  %s3223_s21 = int_to_ptr.vmem [resolvable:$false] %s3222_s21 }
  0x84   : > { %s3224_s13 = scalar_lea.vmem %s3223_s21, 32  ;;  %p3225_p13 = scmp.lt.s32.totalorder %s606_s17, %s3223_s21 }
  0x85   : > { %p3220_p9 = pnand %p3218_p2, %p3178_p10  ;;  %p3226_p1 = scmp.lt.s32.totalorder %s3224_s13, %s3217_s11 }
  0x87   : > { %p3221_p11 = pneg %p3220_p9  ;;  %p3227_p4 = por %p3226_p1, %p3225_p13 }
  0x89   : > { %p3228_p3 = pnand %p3227_p4, %p3221_p11 }
  0x8b   : > { %3231 = shalt.err (!%p3228_p3)
}
  0x8c   : > { %2916 = dma.hbm_to_vmem [thread:$0]  (!%p3598_p7), %s3605_s19, 16, %s606_s17, %s596_s7  }
  0x8d   : > { %p4242_p6 = scmp.ne.s32.totalorder %s4226_s30, 0 }
  0x8e   : > { %s3657_s3 = sand.u32 (!%p4242_p6), 1, %s3334_s25   ;;  %p4243_p10 = scmp.ne.s32.totalorder (!%p4242_p6), %s4235_s22, 0 }
  0x8f   : > { %614 = sbr.rel (%p4242_p6) target bundleno = 1628 (0x65c), region = 84  ;;  %s617_s14 = scalar_lea.sflag (!%p4242_p6), [#allocation5], %s3657_s3 }
  0x94   : > { %3301 = dma.done.wait (%p4243_p10), %s617_s14, 16  }
  0x95   : > { %3303 = vsyncadd (%p4243_p10), %s617_s14, 4294967280  ;;  %s624_s28 = sand.u32 1, %s3483_s0  }
  0x96   : > { %s625_s19 = scalar_lea.sflag [#allocation8], %s624_s28 }
  0x97   : > { %3305 = dma.done.wait (%p4243_p10), %s625_s19, 16  }
  0x98   : > { %3307 = vsyncadd (%p4243_p10), %s625_s19, 4294967280  ;;  %p4244_p3 = scmp.eq.s32.totalorder %s3483_s0, 0 }
  0x9a   : > { %3309 = dma.done.wait (%p4244_p3), [#allocation8], 16   ;;  %p4245_p7 = pmov %p4244_p3 }
  0x9b   : > { %p4246_p5 = pmov %p4244_p3 }
  0x9c   : > { %3311 = vsyncadd (%p4245_p7), [#allocation8], 4294967280 }
  0x9d   : > { %3313 = dma.done.wait (%p4246_p5), [#allocation11], 512   ;;  %p4247_p8 = pmov %p4244_p3 }
  0x9e   : > { %p4248_p12 = pmov %p4244_p3 }
  0x9f   : > { %3315 = vsyncadd (%p4247_p8), [#allocation11], 4294966784 }
  0xa0   : > { %3317 = dma.done.wait (%p4248_p12), [#allocation14], 256   ;;  %p4249_p0 = pmov %p4244_p3 }
  0xa1   : > { %p722_p2 = scmp.lt.s32.totalorder %s3483_s0, 1  ;;  %v3352_v0 = vmov 0.0   ;;  %vm3353_vm0 = vmmov 0   ;;  %v3354_v1 = vmov 0   ;;  %v2992_v2 = vld [vmem:[%s4192_s6 + $0x8] sm:$0xff]   ;;  %s4250_s29 = sld [smem:[#allocation30_spill]] }
  0xa2   : > { %3319 = vsyncadd (%p4249_p0), [#allocation14], 4294967040  ;;  %2729 = vmatprep.subr.bf16.mxu0 %v3352_v0  ;;  %2737 = vmatprep.subr.bf16.mxu1 %v3352_v0  ;;  %v2993_v3 = vld [vmem:[%s4194_s8 + $0x8] sm:$0xff]   ;;  %s4251_s28 = sld [smem:[#allocation31_spill]]  ;;  %v2994_v4 = vld [vmem:[%s4192_s6] sm:$0xff]   ;;  %vm777_vm1 = vcmask 261120  }
  0xa3   : > { %2733 = vmatprep.mubr.msk.bf16.mxu0 %vm3353_vm0, %v3352_v0  ;;  %2741 = vmatprep.mubr.msk.bf16.mxu1 %vm3353_vm0, %v3352_v0  ;;  %s723_s22 = scalar_select %p722_p2, %s3483_s0, 1  ;;  %v2995_v5 = vld [vmem:[%s4194_s8] sm:$0xff]   ;;  %v2587_v25 = vld [vmem:[#allocation9] ss:$0 sm:$0xff]  ;;  %vm945_vm2 = vcmask 64512   ;;  %vm995_vm4 = vcmask 130048  }
  0xa4   : > { %2990 = vset.pattern.permute.xlu0 %v3354_v1  ;;  %2991 = vset.pattern.permute.xlu1 %v3354_v1  ;;  %v2592_v22 = vld [vmem:[%s4195_s9] ss:$0 sm:$0xff]  ;;  %s3355_s30 = smov 96   ;;  %s3360_s13 = smov 104   ;;  %vm1075_vm6 = vcmask 60416   ;;  %vm1344_vm7 = vcmask 126016  }
  0xa5   : > { %s2657_s17 = sshll.u32 %s723_s22, 3  ;;  %s2659_s7 = sshll.u32 %s723_s22, 4  ;;  %2730 = vmatpush3.bf16.msra.mxu0 %v2992_v2  ;;  %2738 = vmatpush3.bf16.msra.mxu1 %v2993_v3  ;;  %vm1619_vm8 = vcmask 191616   ;;  %vm1894_vm9 = vcmask 257216  }
  0xa6   : > { %s736_s1 = scalar_lea.vmem %s4188_s2, %s2659_s7  ;;  %s741_s20 = scalar_lea.vmem %s4190_s4, %s2659_s7  ;;  %2731 = vmatprep.subr.bf16.mxu0 %v3352_v0  ;;  %2739 = vmatprep.subr.bf16.mxu1 %v3352_v0 }
  0xa7   : > { %s726_s21 = scalar_lea.vmem %s4250_s29, %s2657_s17  ;;  %v896_v14 = vld [vmem:[%s736_s1] sm:$0xff]  ;;  %v897_v18 = vld [vmem:[%s736_s1 + $0x8] sm:$0xff]  ;;  %s3357_s7 = smov 88  }
  0xa8   : > { %s731_s19 = scalar_lea.vmem %s4251_s28, %s2657_s17  ;;  %v3717_v6 = vld [vmem:[%s726_s21] sm:$0xf]  ;;  %v3719_v7 = vld [vmem:[%s726_s21 + $0x4] sm:$0xf]  ;;  %900 = vperm.xlu0 %2990, %v896_v14   ;;  %v912_v19 = vld [vmem:[%s741_s20 + $0x8] sm:$0xff]  ;;  %s3356_s17 = smov 120  }
  0xa9   : > { %v3721_v8 = vld [vmem:[%s731_s19] sm:$0xf]  ;;  %v747_v9 = vmax.bf16 %v3354_v1, %v3717_v6  ;;  %v748_v10 = vmax.bf16 %v3354_v1, %v3719_v7  ;;  %v2635_v11 = vcombine.low %v3717_v6, %v3719_v7  ;;  %v3727_v12 = vld [vmem:[%s731_s19 + $0x4] sm:$0xf]  ;;  %2732 = vmatpush3.bf16.msra.mxu0 %v2994_v4  ;;  %2740 = vmatpush3.bf16.msra.mxu1 %v2995_v5  ;;  %s3358_s29 = smov 112   ;;  %s3359_s21 = smov 80  }
  0xaa   : > { %v822_v13 = vmax.bf16 %v3354_v1, %v3721_v8  ;;  %v911_v15 = vld [vmem:[%s741_s20] sm:$0xff]  ;;  %v823_v16 = vmax.bf16 %v3354_v1, %v3727_v12  ;;  %v2644_v17 = vcombine.low %v3721_v8, %v3727_v12  ;;  %2745 = vmatprep.subr.bf16.mxu0 %v3352_v0  ;;  %2751 = vmatprep.subr.bf16.mxu1 %v3352_v0  ;;  %s3361_s14 = smov 72   ;;  %s3362_s28 = smov 64  }
  0xab   : > { %v2588_v20 = vcombine.low %v747_v9, %v748_v10  ;;  %915 = vperm.xlu1 %2991, %v911_v15   ;;  %s4252_s19 = scalar_lea.vmem [#allocation7], %s3657_s3  ;;  %s4253_s22 = scalar_lea.vmem [#allocation4], %s3657_s3 }
  0xac   : > { %v2593_v21 = vcombine.low %v822_v13, %v823_v16  ;;  %905 = vperm.xlu0 %2990, %v897_v18   ;;  %v3809_v9 = vld [vmem:[%s4252_s19] ss:$0 sm:$0xff]  ;;  %s3363_s26 = smov 56   ;;  %s3364_s1 = smov 48  }
  0xad   : > { %2734 = vmatmul.mubr.msk.bf16.vlgmr.msra.gmra.mxu0 %vm777_vm1, %v2588_v20  ;;  %vm933_vm3 = vcmp.eq.f32.partialorder %v3809_v9, 0.0  ;;  %v3820_v16 = vld [vmem:[%s4253_s22] ss:$0 sm:$0xff]  ;;  %s3365_s24 = smov 40   ;;  %s3366_s20 = smov 8  }
  0xae   : > { %2742 = vmatmul.mubr.msk.bf16.vlgmr.msra.gmra.mxu1 %vm777_vm1, %v2593_v21  ;;  %2747 = vmatprep.mubr.msk.bf16.mxu0 %vm3353_vm0, %v3352_v0  ;;  %vm941_vm5 = vcmp.eq.f32.partialorder %v3820_v16, 0.0  ;;  %s3367_s18 = smov 16   ;;  %p4254_p11 = scmp.ne.s32.totalorder %s4236_s23, 0 }
  0xaf   : > { %920 = vperm.xlu1 %2991, %v912_v19   ;;  %2753 = vmatprep.mubr.msk.bf16.mxu1 %vm3353_vm0, %v3352_v0 }
 0x123   : > { %v901_v24 = vpop.permute.xlu0 %900 }
 0x126   : > { %v916_v23 = vpop.permute.xlu1 %915 }
 0x127   : > { %v906_v37 = vpop.permute.xlu0 %905 }
 0x12a   : > { %v921_v35 = vpop.permute.xlu1 %920 }
 0x16d   : > { %v815_v26 = vpop.f32.mrf.mxu0 }
 0x16e   : > { %v889_v27 = vpop.f32.mrf.mxu1  ;;  %v816_v30 = vadd.f32 %v2587_v25, %v815_v26 }
 0x16f   : > { %v890_v28 = vadd.f32 %v2592_v22, %v889_v27  ;;  %v2735_v29 = vpop.f32.mrf.mxu0 }
 0x170   : > { %v2743_v31 = vpop.f32.mrf.mxu1  ;;  %v908_v40 = vmul.f32 %v901_v24, %v816_v30 }
 0x171   : > { %v818_v32 = vpop.f32.mrf.mxu0  ;;  %v923_v36 = vmul.f32 %v916_v23, %v890_v28 }
 0x172   : > { %v819_v33 = vadd.f32 %v2587_v25, %v818_v32  ;;  %v892_v34 = vpop.f32.mrf.mxu1 }
 0x173   : > { %v893_v38 = vadd.f32 %v2592_v22, %v892_v34  ;;  %v2736_v39 = vpop.f32.mrf.mxu0 }
 0x174   : > { %v909_v41 = vmul.f32 %v906_v37, %v819_v33  ;;  %v2744_v42 = vpop.f32.mrf.mxu1 }
 0x175   : > { %v924_v43 = vmul.f32 %v921_v35, %v893_v38 }
 0x176   : > { %v3744_v44 = vpack.c.bf16 %v909_v41, %v908_v40 }
 0x177   : > { %v3746_v45 = vpack.c.bf16 %v924_v43, %v923_v36 }
 0x178   : > { %943 = vrot.lane.b32.xlu0 %v3744_v44, %s3355_s30  ;;  %v1084_v49 = vsel %vm945_vm2, %v3744_v44, 0 }
 0x179   : > { %1078 = vrot.lane.b32.xlu1 %v3746_v45, %s3355_s30  ;;  %v950_v46 = vsel %vm945_vm2, %v3746_v45, 0 }
 0x17a   : > { %2746 = vmatpush3.bf16.xpose.msra.mxu0 %v950_v46 }
 0x17b   : > { %2757 = vmatprep.subr.bf16.mxu0 %v3352_v0 }
 0x17c   : > { %1211 = vrot.lane.b32.xlu0 %v3746_v45, %s3356_s17 }
 0x17d   : > { %1209 = vrot.lane.b32.xlu1 %v3744_v44, %s3357_s7 }
 0x180   : > { %1349 = vrot.lane.b32.xlu0 %v3744_v44, %s3356_s17  ;;  %s3368_s17 = smov 24  }
 0x181   : > { %1347 = vrot.lane.b32.xlu1 %v3746_v45, %s3357_s7  ;;  %s2577_s7 = sshll.u32 %s3657_s3, 4 }
 0x184   : > { %1486 = vrot.lane.b32.xlu0 %v3746_v45, %s3358_s29 }
 0x185   : > { %1484 = vrot.lane.b32.xlu1 %v3744_v44, %s3359_s21 }
 0x188   : > { %1624 = vrot.lane.b32.xlu0 %v3744_v44, %s3358_s29 }
 0x189   : > { %1622 = vrot.lane.b32.xlu1 %v3746_v45, %s3359_s21 }
 0x18c   : > { %1761 = vrot.lane.b32.xlu0 %v3746_v45, %s3360_s13 }
 0x18d   : > { %1759 = vrot.lane.b32.xlu1 %v3744_v44, %s3361_s14 }
 0x190   : > { %1899 = vrot.lane.b32.xlu0 %v3744_v44, %s3360_s13  ;;  %s714_s13 = scalar_lea.vmem [#allocation15], %s2577_s7 }
 0x191   : > { %1897 = vrot.lane.b32.xlu1 %v3746_v45, %s3361_s14  ;;  %s2339_s14 = sshll.u32 %s714_s13, 4  ;;  %s4095_s14 = int_to_ptr.vmem [resolvable:$true] %s2339_s14 }
 0x195   : > { %1020 = vrot.lane.b32.xlu1 %v3746_v45, %s3362_s28 }
 0x1ea   : > { %v944_v47 = vpop.permute.xlu0 %943 }
 0x1eb   : > { %v1079_v48 = vpop.permute.xlu1 %1078  ;;  %2748 = vmatmul.mubr.msk.bf16.vlgmr.msra.gmra.mxu0 %vm945_vm2, %v944_v47 }
 0x1ec   : > { %2758 = vmatpush3.bf16.xpose.msra.mxu0 %v1084_v49  ;;  %2759 = vmatprep.mubr.msk.bf16.mxu0 %vm3353_vm0, %v3352_v0 }
 0x1ed   : > { %2769 = vmatprep.subr.bf16.mxu0 %v3352_v0 }
 0x1ee   : > { %v1212_v51 = vpop.permute.xlu0 %1211 }
 0x1ef   : > { %v1210_v50 = vpop.permute.xlu1 %1209  ;;  %v1217_v52 = vsel %vm945_vm2, %v1212_v51, 0 }
 0x1f2   : > { %v1350_v55 = vpop.permute.xlu0 %1349 }
 0x1f3   : > { %v1348_v53 = vpop.permute.xlu1 %1347  ;;  %2760 = vmatmul.mubr.msk.bf16.vlgmr.msra.gmra.mxu0 %vm945_vm2, %v1079_v48  ;;  %v1355_v56 = vsel %vm945_vm2, %v1350_v55, 0 }
 0x1f4   : > { %2770 = vmatpush3.bf16.xpose.msra.mxu0 %v1217_v52  ;;  %2771 = vmatprep.mubr.msk.bf16.mxu0 %vm3353_vm0, %v3352_v0 }
 0x1f5   : > { %2781 = vmatprep.subr.bf16.mxu0 %v3352_v0 }
 0x1f6   : > { %v1487_v59 = vpop.permute.xlu0 %1486 }
 0x1f7   : > { %v1485_v54 = vpop.permute.xlu1 %1484  ;;  %v1492_v60 = vsel %vm945_vm2, %v1487_v59, 0 }
 0x1fa   : > { %v1625_v63 = vpop.permute.xlu0 %1624 }
 0x1fb   : > { %v1623_v57 = vpop.permute.xlu1 %1622  ;;  %2772 = vmatmul.mubr.msk.bf16.vlgmr.msra.gmra.mxu0 %vm945_vm2, %v1210_v50  ;;  %v1630_v1 = vsel %vm945_vm2, %v1625_v63, 0 }
 0x1fc   : > { %2782 = vmatpush3.bf16.xpose.msra.mxu0 %v1355_v56  ;;  %2783 = vmatprep.mubr.msk.bf16.mxu0 %vm3353_vm0, %v3352_v0 }
 0x1fd   : > { %2793 = vmatprep.subr.bf16.mxu0 %v3352_v0 }
 0x1fe   : > { %v1762_v2 = vpop.permute.xlu0 %1761 }
 0x1ff   : > { %v1760_v58 = vpop.permute.xlu1 %1759  ;;  %v1767_v3 = vsel %vm945_vm2, %v1762_v2, 0 }
 0x202   : > { %v1900_v4 = vpop.permute.xlu0 %1899 }
 0x203   : > { %v1898_v61 = vpop.permute.xlu1 %1897  ;;  %2784 = vmatmul.mubr.msk.bf16.vlgmr.msra.gmra.mxu0 %vm945_vm2, %v1348_v53  ;;  %v1905_v5 = vsel %vm945_vm2, %v1900_v4, 0 }
 0x204   : > { %2794 = vmatpush3.bf16.xpose.msra.mxu0 %v1492_v60  ;;  %2795 = vmatprep.mubr.msk.bf16.mxu0 %vm3353_vm0, %v3352_v0 }
 0x205   : > { %2805 = vmatprep.subr.bf16.mxu0 %v3352_v0 }
 0x207   : > { %v1021_v62 = vpop.permute.xlu1 %1020 }
 0x208   : > { %2752 = vmatpush3.bf16.msra.mxu1 %v1021_v62 }
 0x209   : > { %2763 = vmatprep.subr.bf16.mxu1 %v3352_v0 }
 0x20b   : > { %2796 = vmatmul.mubr.msk.bf16.vlgmr.msra.gmra.mxu0 %vm945_vm2, %v1485_v54 }
 0x20c   : > { %2806 = vmatpush3.bf16.xpose.msra.mxu0 %v1630_v1  ;;  %2807 = vmatprep.mubr.msk.bf16.mxu0 %vm3353_vm0, %v3352_v0 }
 0x20d   : > { %2817 = vmatprep.subr.bf16.mxu0 %v3352_v0 }
 0x213   : > { %2808 = vmatmul.mubr.msk.bf16.vlgmr.msra.gmra.mxu0 %vm945_vm2, %v1623_v57 }
 0x214   : > { %2818 = vmatpush3.bf16.xpose.msra.mxu0 %v1767_v3  ;;  %2819 = vmatprep.mubr.msk.bf16.mxu0 %vm3353_vm0, %v3352_v0 }
 0x215   : > { %2829 = vmatprep.subr.bf16.mxu0 %v3352_v0 }
 0x21b   : > { %2820 = vmatmul.mubr.msk.bf16.vlgmr.msra.gmra.mxu0 %vm945_vm2, %v1760_v58 }
 0x21c   : > { %2830 = vmatpush3.bf16.xpose.msra.mxu0 %v1905_v5  ;;  %2831 = vmatprep.mubr.msk.bf16.mxu0 %vm3353_vm0, %v3352_v0 }
 0x21d   : > { %2841 = vmatprep.subr.bf16.mxu0 %v3352_v0 }
 0x223   : > { %2832 = vmatmul.mubr.msk.bf16.vlgmr.msra.gmra.mxu0 %vm945_vm2, %v1898_v61 }
 0x224   : > { %2845 = vmatprep.mubr.msk.bf16.mxu0 %vm3353_vm0, %v3352_v0 }
 0x2ab   : > { %v986_v10 = vpop.f32.mrf.mxu0 }
 0x2ac   : > { %v3814_v13 = vsel %vm933_vm3, -1e+09, %v986_v10 }
 0x2ad   : > { %v2749_v14 = vpop.f32.mrf.mxu0  ;;  %v996_v15 = vsel %vm995_vm4, %v3814_v13, -inf }
 0x2ae   : > { %997 = vmax.xlane.f32.xlu0 %v996_v15 }
 0x2af   : > { %v989_v18 = vpop.f32.mrf.mxu0 }
 0x2b0   : > { %v3824_v19 = vsel %vm933_vm3, -1e+09, %v989_v18 }
 0x2b1   : > { %v2750_v20 = vpop.f32.mrf.mxu0  ;;  %v999_v21 = vsel %vm995_vm4, %v3824_v19, -inf }
 0x2b2   : > { %1000 = vmax.xlane.f32.xlu1 %v999_v21 }
 0x2b3   : > { %v1120_v22 = vpop.f32.mrf.mxu0 }
 0x2b4   : > { %v3831_v23 = vsel %vm941_vm5, -1e+09, %v1120_v22 }
 0x2b5   : > { %v2761_v24 = vpop.f32.mrf.mxu0  ;;  %v1129_v25 = vsel %vm995_vm4, %v3831_v23, -inf }
 0x2b6   : > { %1130 = vmax.xlane.f32.xlu0 %v1129_v25 }
 0x2b7   : > { %v1123_v26 = vpop.f32.mrf.mxu0 }
 0x2b8   : > { %v3837_v27 = vsel %vm941_vm5, -1e+09, %v1123_v26 }
 0x2b9   : > { %v2762_v28 = vpop.f32.mrf.mxu0  ;;  %v1132_v29 = vsel %vm995_vm4, %v3837_v27, -inf }
 0x2ba   : > { %1133 = vmax.xlane.f32.xlu0 %v1132_v29 }
 0x2bb   : > { %v1253_v30 = vpop.f32.mrf.mxu0 }
 0x2bc   : > { %v3843_v31 = vsel %vm933_vm3, -1e+09, %v1253_v30 }
 0x2bd   : > { %v2773_v32 = vpop.f32.mrf.mxu0  ;;  %v1262_v33 = vsel %vm995_vm4, %v3843_v31, -inf }
 0x2be   : > { %1263 = vmax.xlane.f32.xlu1 %v1262_v33 }
 0x2bf   : > { %v1256_v34 = vpop.f32.mrf.mxu0 }
 0x2c0   : > { %v3849_v35 = vsel %vm933_vm3, -1e+09, %v1256_v34 }
 0x2c1   : > { %v2774_v36 = vpop.f32.mrf.mxu0  ;;  %v1265_v37 = vsel %vm995_vm4, %v3849_v35, -inf }
 0x2c2   : > { %1266 = vmax.xlane.f32.xlu0 %v1265_v37 }
 0x2c3   : > { %v1391_v38 = vpop.f32.mrf.mxu0 }
 0x2c4   : > { %v3855_v39 = vsel %vm941_vm5, -1e+09, %v1391_v38 }
 0x2c5   : > { %v2785_v40 = vpop.f32.mrf.mxu0  ;;  %v1400_v41 = vsel %vm995_vm4, %v3855_v39, -inf }
 0x2c6   : > { %1401 = vmax.xlane.f32.xlu1 %v1400_v41 }
 0x2c7   : > { %v1394_v42 = vpop.f32.mrf.mxu0 }
 0x2c8   : > { %v3861_v43 = vsel %vm941_vm5, -1e+09, %v1394_v42 }
 0x2c9   : > { %v2786_v46 = vpop.f32.mrf.mxu0  ;;  %v1403_v47 = vsel %vm995_vm4, %v3861_v43, -inf }
 0x2ca   : > { %1404 = vmax.xlane.f32.xlu0 %v1403_v47 }
 0x2cb   : > { %v1528_v48 = vpop.f32.mrf.mxu0 }
 0x2cc   : > { %v3867_v49 = vsel %vm933_vm3, -1e+09, %v1528_v48 }
 0x2cd   : > { %v2797_v50 = vpop.f32.mrf.mxu0  ;;  %v1537_v51 = vsel %vm995_vm4, %v3867_v49, -inf }
 0x2ce   : > { %1538 = vmax.xlane.f32.xlu1 %v1537_v51 }
 0x2cf   : > { %v1531_v52 = vpop.f32.mrf.mxu0 }
 0x2d0   : > { %v3873_v53 = vsel %vm933_vm3, -1e+09, %v1531_v52 }
 0x2d1   : > { %v2798_v54 = vpop.f32.mrf.mxu0  ;;  %v1540_v55 = vsel %vm995_vm4, %v3873_v53, -inf }
 0x2d2   : > { %1541 = vmax.xlane.f32.xlu0 %v1540_v55 }
 0x2d3   : > { %v1666_v56 = vpop.f32.mrf.mxu0 }
 0x2d4   : > { %v3879_v57 = vsel %vm941_vm5, -1e+09, %v1666_v56 }
 0x2d5   : > { %v2809_v58 = vpop.f32.mrf.mxu0  ;;  %v1675_v59 = vsel %vm995_vm4, %v3879_v57, -inf }
 0x2d6   : > { %1676 = vmax.xlane.f32.xlu1 %v1675_v59 }
 0x2d7   : > { %v1669_v60 = vpop.f32.mrf.mxu0 }
 0x2d8   : > { %v3885_v61 = vsel %vm941_vm5, -1e+09, %v1669_v60 }
 0x2d9   : > { %v2810_v62 = vpop.f32.mrf.mxu0  ;;  %v1678_v63 = vsel %vm995_vm4, %v3885_v61, -inf }
 0x2da   : > { %1679 = vmax.xlane.f32.xlu0 %v1678_v63 }
 0x2db   : > { %v1803_v1 = vpop.f32.mrf.mxu0 }
 0x2dc   : > { %v3891_v2 = vsel %vm933_vm3, -1e+09, %v1803_v1 }
 0x2dd   : > { %v2821_v3 = vpop.f32.mrf.mxu0  ;;  %v1812_v4 = vsel %vm995_vm4, %v3891_v2, -inf }
 0x2de   : > { %1813 = vmax.xlane.f32.xlu1 %v1812_v4 }
 0x2df   : > { %v1806_v5 = vpop.f32.mrf.mxu0 }
 0x2e0   : > { %v3897_v10 = vsel %vm933_vm3, -1e+09, %v1806_v5 }
 0x2e1   : > { %v2822_v14 = vpop.f32.mrf.mxu0  ;;  %v1815_v15 = vsel %vm995_vm4, %v3897_v10, -inf }
 0x2e2   : > { %1816 = vmax.xlane.f32.xlu0 %v1815_v15 }
 0x2e3   : > { %v1941_v18 = vpop.f32.mrf.mxu0 }
 0x2e4   : > { %v3903_v20 = vsel %vm941_vm5, -1e+09, %v1941_v18 }
 0x2e5   : > { %v2833_v21 = vpop.f32.mrf.mxu0  ;;  %v1950_v22 = vsel %vm995_vm4, %v3903_v20, -inf }
 0x2e6   : > { %1951 = vmax.xlane.f32.xlu1 %v1950_v22 }
 0x2e7   : > { %v1944_v24 = vpop.f32.mrf.mxu0 }
 0x2e8   : > { %v3909_v9 = vsel %vm941_vm5, -1e+09, %v1944_v24 }
 0x2e9   : > { %v2834_v25 = vpop.f32.mrf.mxu0  ;;  %v1953_v26 = vsel %vm995_vm4, %v3909_v9, -inf }
 0x2ea   : > { %1954 = vmax.xlane.f32.xlu0 %v1953_v26 }
 0x2f7   : > { %1285 = vrot.lane.b32.xlu1 %v3746_v45, %s3363_s26 }
 0x300   : > { %1152 = vrot.lane.b32.xlu0 %v3744_v44, %s3362_s28  ;;  %s2677_s28 = sshll.u32 %s3483_s0, 8 }
 0x337   : > { %v998_v28 = vpop.xlane.xlu0 %997 }
 0x338   : > { %v1002_v29 = vsub.f32 %v3814_v13, %v998_v28 }
 0x33a   : > { %v1004_v30 = vmul.f32 1.442695, %v1002_v29 }
 0x33b   : > { %v1001_v32 = vpop.xlane.xlu1 %1000 }
 0x33c   : > { %3008 = vpow2.f32 %v1004_v30  ;;  %v1003_v16 = vsub.f32 %v3824_v19, %v1001_v32 }
 0x33e   : > { %v1006_v33 = vmul.f32 1.442695, %v1003_v16 }
 0x33f   : > { %v1131_v34 = vpop.xlane.xlu0 %1130 }
 0x340   : > { %3010 = vpow2.f32 %v1006_v33  ;;  %v1135_v36 = vsub.f32 %v3831_v23, %v1131_v34 }
 0x342   : > { %v1137_v37 = vmul.f32 1.442695, %v1135_v36 }
 0x343   : > { %v1134_v38 = vpop.xlane.xlu0 %1133 }
 0x344   : > { %3012 = vpow2.f32 %v1137_v37  ;;  %v1136_v40 = vsub.f32 %v3837_v27, %v1134_v38 }
 0x346   : > { %v1139_v41 = vmul.f32 1.442695, %v1136_v40 }
 0x347   : > { %v1264_v42 = vpop.xlane.xlu1 %1263 }
 0x348   : > { %3014 = vpow2.f32 %v1139_v41  ;;  %v1268_v13 = vsub.f32 %v3843_v31, %v1264_v42 }
 0x349   : > { %v3922_v46 = vpop.eup %3008 }
 0x34a   : > { %v1270_v47 = vmul.f32 1.442695, %v1268_v13  ;;  %v1008_v19 = vsel %vm995_vm4, %v3922_v46, 0.0 }
 0x34b   : > { %v1267_v48 = vpop.xlane.xlu0 %1266  ;;  %1009 = vadd.xlane.f32.xlu1 %v1008_v19 }
 0x34c   : > { %3016 = vpow2.f32 %v1270_v47  ;;  %v1269_v23 = vsub.f32 %v3849_v35, %v1267_v48 }
 0x34d   : > { %v3927_v50 = vpop.eup %3010 }
 0x34e   : > { %v1272_v51 = vmul.f32 1.442695, %v1269_v23  ;;  %v1011_v27 = vsel %vm995_vm4, %v3927_v50, 0.0 }
 0x34f   : > { %v1402_v52 = vpop.xlane.xlu1 %1401  ;;  %1012 = vadd.xlane.f32.xlu0 %v1011_v27 }
 0x350   : > { %3018 = vpow2.f32 %v1272_v51  ;;  %v1406_v31 = vsub.f32 %v3855_v39, %v1402_v52 }
 0x351   : > { %v3932_v54 = vpop.eup %3012 }
 0x352   : > { %v1408_v55 = vmul.f32 1.442695, %v1406_v31  ;;  %v1141_v56 = vsel %vm995_vm4, %v3932_v54, 0.0 }
 0x353   : > { %v1405_v58 = vpop.xlane.xlu0 %1404  ;;  %1142 = vadd.xlane.f32.xlu1 %v1141_v56 }
 0x354   : > { %3020 = vpow2.f32 %v1408_v55  ;;  %v1407_v35 = vsub.f32 %v3861_v43, %v1405_v58 }
 0x355   : > { %v3937_v59 = vpop.eup %3014 }
 0x356   : > { %v1410_v60 = vmul.f32 1.442695, %v1407_v35  ;;  %v1144_v62 = vsel %vm995_vm4, %v3937_v59, 0.0 }
 0x357   : > { %v1539_v63 = vpop.xlane.xlu1 %1538  ;;  %1145 = vadd.xlane.f32.xlu0 %v1144_v62 }
 0x358   : > { %3022 = vpow2.f32 %v1410_v60  ;;  %v1543_v39 = vsub.f32 %v3867_v49, %v1539_v63 }
 0x359   : > { %v3942_v1 = vpop.eup %3016 }
 0x35a   : > { %v1545_v3 = vmul.f32 1.442695, %v1543_v39  ;;  %v1274_v4 = vsel %vm995_vm4, %v3942_v1, 0.0 }
 0x35b   : > { %v1542_v5 = vpop.xlane.xlu0 %1541  ;;  %1275 = vadd.xlane.f32.xlu1 %v1274_v4 }
 0x35c   : > { %3024 = vpow2.f32 %v1545_v3  ;;  %v1544_v43 = vsub.f32 %v3873_v53, %v1542_v5 }
 0x35d   : > { %v3947_v14 = vpop.eup %3018 }
 0x35e   : > { %v1547_v15 = vmul.f32 1.442695, %v1544_v43  ;;  %v1277_v18 = vsel %vm995_vm4, %v3947_v14, 0.0 }
 0x35f   : > { %v1677_v21 = vpop.xlane.xlu1 %1676  ;;  %1278 = vadd.xlane.f32.xlu0 %v1277_v18 }
 0x360   : > { %3026 = vpow2.f32 %v1547_v15  ;;  %v1681_v49 = vsub.f32 %v3879_v57, %v1677_v21 }
 0x361   : > { %v3952_v22 = vpop.eup %3020 }
 0x362   : > { %v1683_v24 = vmul.f32 1.442695, %v1681_v49  ;;  %v1412_v25 = vsel %vm995_vm4, %v3952_v22, 0.0 }
 0x363   : > { %v1680_v26 = vpop.xlane.xlu0 %1679  ;;  %1413 = vadd.xlane.f32.xlu1 %v1412_v25 }
 0x364   : > { %3028 = vpow2.f32 %v1683_v24  ;;  %v1682_v53 = vsub.f32 %v3885_v61, %v1680_v26 }
 0x365   : > { %v3957_v28 = vpop.eup %3022 }
 0x366   : > { %v1685_v29 = vmul.f32 1.442695, %v1682_v53  ;;  %v1415_v30 = vsel %vm995_vm4, %v3957_v28, 0.0 }
 0x367   : > { %v1814_v32 = vpop.xlane.xlu1 %1813  ;;  %1416 = vadd.xlane.f32.xlu0 %v1415_v30 }
 0x368   : > { %3030 = vpow2.f32 %v1685_v29  ;;  %v1818_v57 = vsub.f32 %v3891_v2, %v1814_v32 }
 0x369   : > { %v3962_v16 = vpop.eup %3024 }
 0x36a   : > { %v1820_v33 = vmul.f32 1.442695, %v1818_v57  ;;  %v1549_v34 = vsel %vm995_vm4, %v3962_v16, 0.0 }
 0x36b   : > { %v1817_v36 = vpop.xlane.xlu0 %1816  ;;  %1550 = vadd.xlane.f32.xlu0 %v1549_v34 }
 0x36c   : > { %3032 = vpow2.f32 %v1820_v33  ;;  %v1819_v61 = vsub.f32 %v3897_v10, %v1817_v36 }
 0x36d   : > { %v3967_v37 = vpop.eup %3026 }
 0x36e   : > { %v1822_v38 = vmul.f32 1.442695, %v1819_v61  ;;  %v1552_v40 = vsel %vm995_vm4, %v3967_v37, 0.0 }
 0x36f   : > { %v1952_v41 = vpop.xlane.xlu1 %1951  ;;  %1553 = vadd.xlane.f32.xlu0 %v1552_v40 }
 0x370   : > { %3034 = vpow2.f32 %v1822_v38  ;;  %v1956_v2 = vsub.f32 %v3903_v20, %v1952_v41 }
 0x371   : > { %v3972_v42 = vpop.eup %3028 }
 0x372   : > { %v1958_v13 = vmul.f32 1.442695, %v1956_v2  ;;  %v1687_v47 = vsel %vm995_vm4, %v3972_v42, 0.0 }
 0x373   : > { %1688 = vadd.xlane.f32.xlu1 %v1687_v47  ;;  %v1955_v31 = vpop.xlane.xlu0 %1954  ;;  %v1286_v60 = vpop.permute.xlu1 %1285 }
 0x374   : > { %3036 = vpow2.f32 %v1958_v13  ;;  %v1957_v55 = vsub.f32 %v3909_v9, %v1955_v31 }
 0x375   : > { %v3976_v10 = vpop.eup %3030 }
 0x376   : > { %v1690_v19 = vsel %vm995_vm4, %v3976_v10, 0.0  ;;  %v1960_v56 = vmul.f32 1.442695, %v1957_v55 }
 0x377   : > { %1691 = vadd.xlane.f32.xlu0 %v1690_v19  ;;  %v1153_v9 = vpop.permute.xlu0 %1152 }
 0x378   : > { %3038 = vpow2.f32 %v1960_v56 }
 0x379   : > { %v3980_v48 = vpop.eup %3032 }
 0x37a   : > { %v1824_v23 = vsel %vm995_vm4, %v3980_v48, 0.0 }
 0x37b   : > { %1825 = vadd.xlane.f32.xlu0 %v1824_v23 }
 0x37d   : > { %v3984_v20 = vpop.eup %3034 }
 0x37e   : > { %v1827_v51 = vsel %vm995_vm4, %v3984_v20, 0.0 }
 0x37f   : > { %1828 = vadd.xlane.f32.xlu0 %v1827_v51 }
 0x381   : > { %v3988_v27 = vpop.eup %3036 }
 0x382   : > { %v1962_v52 = vsel %vm995_vm4, %v3988_v27, 0.0 }
 0x383   : > { %1963 = vadd.xlane.f32.xlu0 %v1962_v52 }
 0x384   : > { %1423 = vrot.lane.b32.xlu1 %v3744_v44, %s3363_s26  ;;  %s4102_s26 = scalar_lea.hbm %s4202_s16, %s2677_s28 }
 0x385   : > { %v3998_v58 = vpop.eup %3038 }
 0x386   : > { %v1965_v35 = vsel %vm995_vm4, %v3998_v58, 0.0 }
 0x399   : > { %1560 = vrot.lane.b32.xlu0 %v3746_v45, %s3364_s1 }
 0x39d   : > { %1698 = vrot.lane.b32.xlu0 %v3744_v44, %s3364_s1  ;;  %s2321_s1 = scalar_lea.sflag [#allocation6], %s3657_s3 }
 0x3a1   : > { %1835 = vrot.lane.b32.xlu0 %v3746_v45, %s3365_s24 }
 0x3a5   : > { %1973 = vrot.lane.b32.xlu0 %v3744_v44, %s3365_s24  ;;  %s3232_s24 = scalar_lea.vmem %s4095_s14, 256 }
 0x3a6   : > { %p3233_p9 = scmp.ne.s32.totalorder %s4095_s14, %s3232_s24 }
 0x3a8   : > { %1966 = vadd.xlane.f32.xlu1 %v1965_v35  ;;  %p3234_p13 = pnand %p3233_p9, %p4254_p11 }
 0x3aa   : > { %p3235_p1 = pneg %p3234_p13 }
 0x3d4   : > { %v1010_v62 = vpop.xlane.xlu1 %1009 }
 0x3d5   : > { %3040 = vrcp.f32 %v1010_v62 }
 0x3d8   : > { %v1013_v63 = vpop.xlane.xlu0 %1012 }
 0x3d9   : > { %3042 = vrcp.f32 %v1013_v63 }
 0x3dc   : > { %v1143_v39 = vpop.xlane.xlu1 %1142 }
 0x3dd   : > { %3044 = vrcp.f32 %v1143_v39 }
 0x3e0   : > { %v1146_v3 = vpop.xlane.xlu0 %1145 }
 0x3e1   : > { %3046 = vrcp.f32 %v1146_v3 }
 0x3e2   : > { %v3041_v4 = vpop.eup %3040 }
 0x3e3   : > { %v1016_v44 = vmul.f32 %v3041_v4, %v3922_v46 }
 0x3e4   : > { %v1276_v45 = vpop.xlane.xlu1 %1275 }
 0x3e5   : > { %3048 = vrcp.f32 %v1276_v45 }
 0x3e6   : > { %v3043_v5 = vpop.eup %3042 }
 0x3e7   : > { %v1017_v43 = vmul.f32 %v3043_v5, %v3927_v50 }
 0x3e8   : > { %v1279_v15 = vpop.xlane.xlu0 %1278 }
 0x3e9   : > { %3050 = vrcp.f32 %v1279_v15  ;;  %v1018_v18 = vpack.c.bf16 %v1017_v43, %v1016_v44 }
 0x3ea   : > { %v3045_v21 = vpop.eup %3044 }
 0x3eb   : > { %2754 = vmatmul.mubr.msk.bf16.vlgmr.msra.gmra.mxu1 %vm995_vm4, %v1018_v18  ;;  %v1149_v25 = vmul.f32 %v3045_v21, %v3932_v54 }
 0x3ec   : > { %2764 = vmatpush3.bf16.msra.mxu1 %v1153_v9  ;;  %v1414_v49 = vpop.xlane.xlu1 %1413  ;;  %2765 = vmatprep.mubr.msk.bf16.mxu1 %vm3353_vm0, %v3352_v0 }
 0x3ed   : > { %2775 = vmatprep.subr.bf16.mxu1 %v3352_v0  ;;  %3052 = vrcp.f32 %v1414_v49 }
 0x3ee   : > { %v3047_v24 = vpop.eup %3046 }
 0x3ef   : > { %v1150_v46 = vmul.f32 %v3047_v24, %v3937_v59 }
 0x3f0   : > { %v1417_v50 = vpop.xlane.xlu0 %1416 }
 0x3f1   : > { %3054 = vrcp.f32 %v1417_v50  ;;  %v1151_v26 = vpack.c.bf16 %v1150_v46, %v1149_v25 }
 0x3f2   : > { %v3049_v53 = vpop.eup %3048 }
 0x3f3   : > { %2766 = vmatmul.mubr.msk.bf16.vlgmr.msra.gmra.mxu1 %vm995_vm4, %v1151_v26  ;;  %v1282_v32 = vmul.f32 %v3049_v53, %v3942_v1 }
 0x3f4   : > { %2776 = vmatpush3.bf16.msra.mxu1 %v1286_v60  ;;  %2777 = vmatprep.mubr.msk.bf16.mxu1 %vm3353_vm0, %v3352_v0  ;;  %v1551_v29 = vpop.xlane.xlu0 %1550 }
 0x3f5   : > { %2787 = vmatprep.subr.bf16.mxu1 %v3352_v0 }
 0x3f6   : > { %v3051_v30 = vpop.eup %3050 }
 0x3f7   : > { %v1283_v54 = vmul.f32 %v3051_v30, %v3947_v14 }
 0x3f8   : > { %v1554_v59 = vpop.xlane.xlu0 %1553 }
 0x3f9   : > { %v1284_v57 = vpack.c.bf16 %v1283_v54, %v1282_v32  ;;  %3056 = vrcp.f32 %v1554_v59 }
 0x3fa   : > { %v3053_v33 = vpop.eup %3052  ;;  %3058 = vrcp.f32 %v1551_v29 }
 0x3fb   : > { %2778 = vmatmul.mubr.msk.bf16.vlgmr.msra.gmra.mxu1 %vm995_vm4, %v1284_v57  ;;  %v1420_v61 = vmul.f32 %v3053_v33, %v3952_v22 }
 0x3fc   : > { %v1689_v34 = vpop.xlane.xlu1 %1688  ;;  %2789 = vmatprep.mubr.msk.bf16.mxu1 %vm3353_vm0, %v3352_v0 }
 0x3fe   : > { %v3055_v36 = vpop.eup %3054 }
 0x3ff   : > { %v1421_v38 = vmul.f32 %v3055_v36, %v3957_v28 }
 0x400   : > { %v1424_v40 = vpop.permute.xlu1 %1423  ;;  %v1692_v1 = vpop.xlane.xlu0 %1691 }
 0x401   : > { %2788 = vmatpush3.bf16.msra.mxu1 %v1424_v40  ;;  %v1422_v14 = vpack.c.bf16 %v1421_v38, %v1420_v61  ;;  %3060 = vrcp.f32 %v1692_v1 }
 0x402   : > { %2799 = vmatprep.subr.bf16.mxu1 %v3352_v0  ;;  %3062 = vrcp.f32 %v1689_v34 }
 0x404   : > { %2790 = vmatmul.mubr.msk.bf16.vlgmr.msra.gmra.mxu1 %vm995_vm4, %v1422_v14  ;;  %v1826_v41 = vpop.xlane.xlu0 %1825 }
 0x405   : > { %2801 = vmatprep.mubr.msk.bf16.mxu1 %vm3353_vm0, %v3352_v0 }
 0x406   : > { %v3057_v13 = vpop.eup %3056 }
 0x407   : > { %v3059_v47 = vpop.eup %3058  ;;  %v1558_v28 = vmul.f32 %v3057_v13, %v3967_v37 }
 0x408   : > { %v1829_v2 = vpop.xlane.xlu0 %1828  ;;  %v1557_v23 = vmul.f32 %v3059_v47, %v3962_v16  ;;  %v2998_v47 = vld [vmem:[#allocation10 + $0x8] sm:$0xff]  }
 0x409   : > { %3064 = vrcp.f32 %v1829_v2  ;;  %2842 = vmatpush3.bf16.msra.mxu0 %v2998_v47 }
 0x40a   : > { %3066 = vrcp.f32 %v1826_v41  ;;  %v1559_v51 = vpack.c.bf16 %v1558_v28, %v1557_v23  ;;  %v2999_v28 = vld [vmem:[%s4196_s10 + $0x8] sm:$0xff]   ;;  %2843 = vmatprep.subr.bf16.mxu0 %v3352_v0 }
 0x40c   : > { %v1964_v22 = vpop.xlane.xlu0 %1963 }
 0x40d   : > { %3068 = vrcp.f32 %v1964_v22 }
 0x40e   : > { %v3061_v52 = vpop.eup %3060 }
 0x40f   : > { %v3063_v55 = vpop.eup %3062  ;;  %v1696_v37 = vmul.f32 %v3061_v52, %v3976_v10  ;;  %v3001_v52 = vld [vmem:[%s4196_s10] sm:$0xff]  }
 0x410   : > { %v1561_v19 = vpop.permute.xlu0 %1560  ;;  %v1695_v56 = vmul.f32 %v3063_v55, %v3972_v42 }
 0x411   : > { %2800 = vmatpush3.bf16.msra.mxu1 %v1561_v19 }
 0x412   : > { %2811 = vmatprep.subr.bf16.mxu1 %v3352_v0  ;;  %v1697_v16 = vpack.c.bf16 %v1696_v37, %v1695_v56 }
 0x414   : > { %2802 = vmatmul.mubr.msk.bf16.vlgmr.msra.gmra.mxu1 %vm995_vm4, %v1559_v51  ;;  %v1699_v31 = vpop.permute.xlu0 %1698  ;;  %v3000_v51 = vld [vmem:[#allocation10] sm:$0xff]  }
 0x415   : > { %2812 = vmatpush3.bf16.msra.mxu1 %v1699_v31  ;;  %2813 = vmatprep.mubr.msk.bf16.mxu1 %vm3353_vm0, %v3352_v0 }
 0x416   : > { %2823 = vmatprep.subr.bf16.mxu1 %v3352_v0  ;;  %v3065_v35 = vpop.eup %3064  ;;  %2844 = vmatpush3.bf16.msra.mxu0 %v3000_v51 }
 0x417   : > { %v3067_v9 = vpop.eup %3066  ;;  %v1833_v62 = vmul.f32 %v3065_v35, %v3984_v20  ;;  %2857 = vmatprep.subr.bf16.mxu0 %v3352_v0 }
 0x418   : > { %v1836_v60 = vpop.permute.xlu0 %1835  ;;  %v1832_v63 = vmul.f32 %v3067_v9, %v3980_v48  ;;  %v3003_v9 = vld [vmem:[#allocation12 + $0x8] sm:$0xff]  }
 0x41a   : > { %v1834_v39 = vpack.c.bf16 %v1833_v62, %v1832_v63  ;;  %v3069_v3 = vpop.eup %3068  ;;  %v3004_v62 = vld [vmem:[#allocation12] sm:$0xff]  }
 0x41b   : > { %v1970_v45 = vmul.f32 %v3069_v3, %v3988_v27 }
 0x41c   : > { %2814 = vmatmul.mubr.msk.bf16.vlgmr.msra.gmra.mxu1 %vm995_vm4, %v1697_v16  ;;  %v1974_v10 = vpop.permute.xlu0 %1973 }
 0x41d   : > { %2824 = vmatpush3.bf16.msra.mxu1 %v1836_v60  ;;  %2825 = vmatprep.mubr.msk.bf16.mxu1 %vm3353_vm0, %v3352_v0 }
 0x41e   : > { %2835 = vmatprep.subr.bf16.mxu1 %v3352_v0 }
 0x424   : > { %2826 = vmatmul.mubr.msk.bf16.vlgmr.msra.gmra.mxu1 %vm995_vm4, %v1834_v39 }
 0x425   : > { %2836 = vmatpush3.bf16.msra.mxu1 %v1974_v10  ;;  %2837 = vmatprep.mubr.msk.bf16.mxu1 %vm3353_vm0, %v3352_v0 }
 0x426   : > { %2849 = vmatprep.subr.bf16.mxu1 %v3352_v0 }
 0x431   : > { %v1967_v42 = vpop.xlane.xlu1 %1966 }
 0x432   : > { %3070 = vrcp.f32 %v1967_v42 }
 0x43f   : > { %v3071_v4 = vpop.eup %3070 }
 0x440   : > { %v1971_v20 = vmul.f32 %v3071_v4, %v3998_v58 }
 0x442   : > { %v1972_v48 = vpack.c.bf16 %v1971_v20, %v1970_v45 }
 0x444   : > { %2838 = vmatmul.mubr.msk.bf16.vlgmr.msra.gmra.mxu1 %vm995_vm4, %v1972_v48 }
 0x445   : > { %2853 = vmatprep.mubr.msk.bf16.mxu1 %vm3353_vm0, %v3352_v0  ;;  %2850 = vmatpush3.bf16.msra.mxu1 %v2999_v28 }
 0x446   : > { %2851 = vmatprep.subr.bf16.mxu1 %v3352_v0 }
 0x449   : > { %2852 = vmatpush3.bf16.msra.mxu1 %v3001_v52 }
 0x44a   : > { %2865 = vmatprep.subr.bf16.mxu1 %v3352_v0 }
 0x44c   : > { %2854 = vmatmul.mubr.msk.bf16.vlgmr.msra.gmra.mxu1 %vm777_vm1, %v2635_v11 }
 0x44d   : > { %2869 = vmatprep.mubr.msk.bf16.mxu1 %vm3353_vm0, %v3352_v0  ;;  %2866 = vmatpush3.bf16.msra.mxu1 %v3003_v9 }
 0x44e   : > { %2867 = vmatprep.subr.bf16.mxu1 %v3352_v0 }
 0x451   : > { %2868 = vmatpush3.bf16.msra.mxu1 %v3004_v62 }
 0x454   : > { %2870 = vmatmul.mubr.msk.bf16.vlgmr.msra.gmra.mxu1 %vm777_vm1, %v2644_v17 }
 0x4ab   : > { %v1060_v5 = vpop.f32.mrf.mxu1 }
 0x4ac   : > { %v2661_v44 = vpack.c.bf16 %v1060_v5, %v1060_v5 }
 0x4ad   : > { %v2755_v43 = vpop.f32.mrf.mxu1 }
 0x4ae   : > { %1076 = vst.msk [vmem:[#allocation2] sm:$0xf] %vm1075_vm6, %v2661_v44  ;;  %v3005_v44 = vld [vmem:[#allocation13 + $0x8] sm:$0xff]  }
 0x4af   : > { %v1063_v15 = vpop.f32.mrf.mxu1 }
 0x4b0   : > { %v2662_v18 = vpack.c.bf16 %v1063_v15, %v1063_v15  ;;  %v3006_v15 = vld [vmem:[#allocation13] sm:$0xff]  }
 0x4b1   : > { %v2756_v21 = vpop.f32.mrf.mxu1 }
 0x4b2   : > { %1077 = vst.msk [vmem:[#allocation2 + $0x4] sm:$0xf] %vm1075_vm6, %v2662_v18 }
 0x4b3   : > { %v1192_v49 = vpop.f32.mrf.mxu1 }
 0x4b4   : > { %v2663_v24 = vpack.c.bf16 %v1192_v49, %v1192_v49 }
 0x4b5   : > { %v2767_v27 = vpop.f32.mrf.mxu1 }
 0x4b6   : > { %1207 = vst.msk [vmem:[#allocation3] sm:$0xf] %vm1075_vm6, %v2663_v24 }
 0x4b7   : > { %v1195_v58 = vpop.f32.mrf.mxu1 }
 0x4b8   : > { %v2664_v25 = vpack.c.bf16 %v1195_v58, %v1195_v58 }
 0x4b9   : > { %v2768_v46 = vpop.f32.mrf.mxu1 }
 0x4ba   : > { %1208 = vst.msk [vmem:[#allocation3 + $0x4] sm:$0xf] %vm1075_vm6, %v2664_v25 }
 0x4bb   : > { %v1325_v50 = vpop.f32.mrf.mxu1 }
 0x4bc   : > { %v2665_v26 = vpack.c.bf16 %v1325_v50, %v1325_v50 }
 0x4bd   : > { %v2779_v53 = vpop.f32.mrf.mxu1 }
 0x4be   : > { %1338 = vrot.lane.b32.xlu0 %v2665_v26, %s3366_s20 }
 0x4bf   : > { %v1328_v29 = vpop.f32.mrf.mxu1 }
 0x4c0   : > { %v2666_v30 = vpack.c.bf16 %v1328_v29, %v1328_v29  ;;  %v2639_v29 = vld [vmem:[%s4198_s12] ss:$0 sm:$0xff] }
 0x4c1   : > { %v2780_v32 = vpop.f32.mrf.mxu1 }
 0x4c2   : > { %1340 = vrot.lane.b32.xlu1 %v2666_v30, %s3366_s20 }
 0x4c4   : > { %v1463_v54 = vpop.f32.mrf.mxu1 }
 0x4c5   : > { %v2667_v57 = vpack.c.bf16 %v1463_v54, %v1463_v54 }
 0x4c6   : > { %v2791_v59 = vpop.f32.mrf.mxu1 }
 0x4c7   : > { %1476 = vrot.lane.b32.xlu1 %v2667_v57, %s3366_s20 }
 0x4c8   : > { %v1466_v33 = vpop.f32.mrf.mxu1 }
 0x4c9   : > { %v2668_v34 = vpack.c.bf16 %v1466_v33, %v1466_v33 }
 0x4ca   : > { %v2792_v36 = vpop.f32.mrf.mxu1 }
 0x4cb   : > { %1478 = vrot.lane.b32.xlu0 %v2668_v34, %s3366_s20 }
 0x4d4   : > { %v1600_v61 = vpop.f32.mrf.mxu1 }
 0x4d5   : > { %v2669_v38 = vpack.c.bf16 %v1600_v61, %v1600_v61 }
 0x4d6   : > { %v2803_v40 = vpop.f32.mrf.mxu1 }
 0x4d7   : > { %1613 = vrot.lane.b32.xlu0 %v2669_v38, %s3367_s18 }
 0x4d8   : > { %v1603_v1 = vpop.f32.mrf.mxu1 }
 0x4d9   : > { %v2670_v14 = vpack.c.bf16 %v1603_v1, %v1603_v1 }
 0x4da   : > { %v2804_v41 = vpop.f32.mrf.mxu1 }
 0x4db   : > { %1615 = vrot.lane.b32.xlu0 %v2670_v14, %s3367_s18 }
 0x4dc   : > { %v1738_v2 = vpop.f32.mrf.mxu1 }
 0x4dd   : > { %v2671_v13 = vpack.c.bf16 %v1738_v2, %v1738_v2 }
 0x4de   : > { %v2815_v22 = vpop.f32.mrf.mxu1 }
 0x4df   : > { %1751 = vrot.lane.b32.xlu1 %v2671_v13, %s3367_s18 }
 0x4e0   : > { %v1741_v19 = vpop.f32.mrf.mxu1 }
 0x4e1   : > { %v2672_v60 = vpack.c.bf16 %v1741_v19, %v1741_v19 }
 0x4e2   : > { %v2816_v23 = vpop.f32.mrf.mxu1 }
 0x4e4   : > { %v1875_v31 = vpop.f32.mrf.mxu1 }
 0x4e5   : > { %v2673_v55 = vpack.c.bf16 %v1875_v31, %v1875_v31 }
 0x4e6   : > { %v2827_v37 = vpop.f32.mrf.mxu1 }
 0x4e7   : > { %1888 = vrot.lane.b32.xlu0 %v2673_v55, %s3368_s17 }
 0x4e8   : > { %v1878_v56 = vpop.f32.mrf.mxu1 }
 0x4e9   : > { %v2674_v16 = vpack.c.bf16 %v1878_v56, %v1878_v56 }
 0x4ea   : > { %v2828_v35 = vpop.f32.mrf.mxu1 }
 0x4eb   : > { %1890 = vrot.lane.b32.xlu0 %v2674_v16, %s3368_s17 }
 0x4ef   : > { %1753 = vrot.lane.b32.xlu0 %v2672_v60, %s3367_s18  ;;  %s3369_s18 = smov [#allocation15]  }
 0x4f0   : > { %s3236_s11 = sshll.u32 %s3369_s18, 4  ;;  %s3237_s11 = int_to_ptr.vmem [resolvable:$false] %s3236_s11 }
 0x4f1   : > { %s3238_s5 = scalar_lea.vmem %s3237_s11, 512  ;;  %p3239_p4 = scmp.lt.s32.totalorder %s4095_s14, %s3237_s11 }
 0x4f2   : > { %p3240_p6 = scmp.lt.s32.totalorder %s3238_s5, %s3232_s24 }
 0x4f4   : > { %p3241_p10 = por %p3240_p6, %p3239_p4 }
 0x4f6   : > { %p3242_p3 = pnand %p3241_p10, %p3235_p1 }
 0x504   : > { %v2013_v6 = vpop.f32.mrf.mxu1 }
 0x505   : > { %v2675_v7 = vpack.c.bf16 %v2013_v6, %v2013_v6 }
 0x506   : > { %v2839_v11 = vpop.f32.mrf.mxu1 }
 0x507   : > { %2026 = vrot.lane.b32.xlu1 %v2675_v7, %s3368_s17 }
 0x508   : > { %v2016_v63 = vpop.f32.mrf.mxu1 }
 0x509   : > { %v2676_v39 = vpack.c.bf16 %v2016_v63, %v2016_v63 }
 0x50a   : > { %v2840_v10 = vpop.f32.mrf.mxu1 }
 0x50b   : > { %2028 = vrot.lane.b32.xlu0 %v2676_v39, %s3368_s17 }
 0x50c   : > { %v2161_v24 = vpop.f32.mrf.mxu1 }
 0x50e   : > { %v2855_v27 = vpop.f32.mrf.mxu1 }
 0x510   : > { %v2164_v58 = vpop.f32.mrf.mxu1 }
 0x512   : > { %v2856_v25 = vpop.f32.mrf.mxu1 }
 0x514   : > { %v2300_v46 = vpop.f32.mrf.mxu1 }
 0x516   : > { %v2871_v50 = vpop.f32.mrf.mxu1 }
 0x530   : > { %v1339_v42 = vpop.permute.xlu0 %1338 }
 0x531   : > { %1345 = vst.msk [vmem:[#allocation2] sm:$0xf] %vm1344_vm7, %v1339_v42 }
 0x534   : > { %v1341_v3 = vpop.permute.xlu1 %1340 }
 0x535   : > { %1346 = vst.msk [vmem:[#allocation2 + $0x4] sm:$0xf] %vm1344_vm7, %v1341_v3 }
 0x539   : > { %v1477_v4 = vpop.permute.xlu1 %1476 }
 0x53a   : > { %1482 = vst.msk [vmem:[#allocation3] sm:$0xf] %vm1344_vm7, %v1477_v4 }
 0x53d   : > { %v1479_v45 = vpop.permute.xlu0 %1478 }
 0x53e   : > { %1483 = vst.msk [vmem:[#allocation3 + $0x4] sm:$0xf] %vm1344_vm7, %v1479_v45 }
 0x549   : > { %v1614_v8 = vpop.permute.xlu0 %1613 }
 0x54a   : > { %1620 = vst.msk [vmem:[#allocation2] sm:$0xf] %vm1619_vm8, %v1614_v8 }
 0x54d   : > { %v1616_v12 = vpop.permute.xlu0 %1615 }
 0x54e   : > { %1621 = vst.msk [vmem:[#allocation2 + $0x4] sm:$0xf] %vm1619_vm8, %v1616_v12 }
 0x551   : > { %v1752_v17 = vpop.permute.xlu1 %1751 }
 0x552   : > { %1757 = vst.msk [vmem:[#allocation3] sm:$0xf] %vm1619_vm8, %v1752_v17 }
 0x559   : > { %v1889_v20 = vpop.permute.xlu0 %1888 }
 0x55a   : > { %1895 = vst.msk [vmem:[#allocation2] sm:$0xf] %vm1894_vm9, %v1889_v20 }
 0x55d   : > { %v1891_v48 = vpop.permute.xlu0 %1890 }
 0x55e   : > { %1896 = vst.msk [vmem:[#allocation2 + $0x4] sm:$0xf] %vm1894_vm9, %v1891_v48 }
 0x561   : > { %v1754_v5 = vpop.permute.xlu0 %1753 }
 0x562   : > { %1758 = vst.msk [vmem:[#allocation3 + $0x4] sm:$0xf] %vm1619_vm8, %v1754_v5 }
 0x565   : > { %v3002_v43 = vld [vmem:[#allocation2] sm:$0xff]  }
 0x566   : > { %2846 = vmatmul.mubr.msk.bf16.vlgmr.msra.gmra.mxu0 %vm777_vm1, %v3002_v43 }
 0x567   : > { %2858 = vmatpush3.bf16.msra.mxu0 %v3005_v44  ;;  %2861 = vmatprep.mubr.msk.bf16.mxu0 %vm3353_vm0, %v3352_v0 }
 0x568   : > { %2859 = vmatprep.subr.bf16.mxu0 %v3352_v0  ;;  %v2303_v0 = vpop.f32.mrf.mxu1 }
 0x56a   : > { %v2872_v26 = vpop.f32.mrf.mxu1 }
 0x56b   : > { %2860 = vmatpush3.bf16.msra.mxu0 %v3006_v15 }
 0x579   : > { %v2027_v18 = vpop.permute.xlu1 %2026 }
 0x57a   : > { %2032 = vst.msk [vmem:[#allocation3] sm:$0xf] %vm1894_vm9, %v2027_v18 }
 0x57d   : > { %v2029_v21 = vpop.permute.xlu0 %2028 }
 0x57e   : > { %2033 = vst.msk [vmem:[#allocation3 + $0x4] sm:$0xf] %vm1894_vm9, %v2029_v21 }
 0x585   : > { %v3007_v49 = vld [vmem:[#allocation3] sm:$0xff]  }
 0x586   : > { %2862 = vmatmul.mubr.msk.bf16.vlgmr.msra.gmra.mxu0 %vm777_vm1, %v3007_v49 }
 0x626   : > { %v2100_v53 = vpop.f32.mrf.mxu0 }
 0x627   : > { %v2162_v30 = vadd.f32 %v2161_v24, %v2100_v53 }
 0x628   : > { %v2847_v32 = vpop.f32.mrf.mxu0 }
 0x629   : > { %v2175_v54 = vadd.f32 %v2639_v29, %v2162_v30 }
 0x62a   : > { %v2103_v57 = vpop.f32.mrf.mxu0 }
 0x62b   : > { %2316 = vst [vmem:[%s714_s13] sm:$0xff] %v2175_v54  ;;  %v2165_v59 = vadd.f32 %v2164_v58, %v2103_v57 }
 0x62c   : > { %v2848_v33 = vpop.f32.mrf.mxu0 }
 0x62d   : > { %v2176_v34 = vadd.f32 %v2639_v29, %v2165_v59 }
 0x62f   : > { %2317 = vst [vmem:[%s714_s13 + $0x8] sm:$0xff] %v2176_v34 }
 0x630   : > { %3245 = shalt.err (!%p3242_p3)
}
 0x631   : > { %s3246_s15 = scalar_lea.hbm %s4102_s26, 256  ;;  %s3250_s29 = scalar_lea.hbm %s4202_s16, 512 }
 0x632   : > { %p3247_p7 = scmp.ne.s32.totalorder %s4102_s26, %s3246_s15  ;;  %p3251_p12 = scmp.lt.s32.totalorder %s4102_s26, %s4202_s16 }
 0x633   : > { %p3252_p0 = scmp.lt.s32.totalorder %s3250_s29, %s3246_s15 }
 0x634   : > { %p3248_p5 = pnand %p3247_p7, %p4254_p11 }
 0x635   : > { %p3253_p2 = por %p3252_p0, %p3251_p12 }
 0x636   : > { %p3249_p8 = pneg %p3248_p5 }
 0x638   : > { %p3254_p9 = pnand %p3253_p2, %p3249_p8 }
 0x63a   : > { %3257 = shalt.err (!%p3254_p9)
}
 0x63b   : > { %s3370_s19 = smov 128   ;;  %s4255_s18 = sld [smem:[#allocation38_spill]] }
 0x63c   : > { %2893 = dma.vmem_to_hbm [thread:$0]  (%p4254_p11), %s4095_s14, 256, %s4102_s26, %s2321_s1, %s3370_s19, %s3370_s19, %s3366_s20  }
 0x63d   : > { %s721_s11 = scalar_lea.vmem [#allocation16], %s2577_s7  ;;  %s4256_s1 = sld [smem:[#allocation39_spill]] }
 0x63e   : > { %s2355_s5 = sshll.u32 %s721_s11, 4  ;;  %s2326_s30 = scalar_lea.sflag [#allocation17], %s3657_s3  ;;  %s4135_s5 = int_to_ptr.vmem [resolvable:$true] %s2355_s5 }
 0x63f   : > { %s3258_s7 = scalar_lea.vmem %s4135_s5, 256  ;;  %s3371_s17 = smov [#allocation16]  }
 0x640   : > { %p3259_p13 = scmp.ne.s32.totalorder %s4135_s5, %s3258_s7  ;;  %s3262_s29 = sshll.u32 %s3371_s17, 4  ;;  %s3263_s29 = int_to_ptr.vmem [resolvable:$false] %s3262_s29 }
 0x641   : > { %v2648_v61 = vld [vmem:[%s4255_s18] ss:$0 sm:$0xff]  ;;  %s3264_s21 = scalar_lea.vmem %s3263_s29, 512  ;;  %p3265_p6 = scmp.lt.s32.totalorder %s4135_s5, %s3263_s29 }
 0x642   : > { %p3260_p1 = pnand %p3259_p13, %p4254_p11  ;;  %p3266_p10 = scmp.lt.s32.totalorder %s3264_s21, %s3258_s7 }
 0x643   : > { %s4142_s15 = scalar_lea.hbm %s4256_s1, %s2677_s28 }
 0x644   : > { %p3261_p4 = pneg %p3260_p1  ;;  %p3267_p3 = por %p3266_p10, %p3265_p6 }
 0x646   : > { %v2239_v36 = vpop.f32.mrf.mxu0  ;;  %p3268_p7 = pnand %p3267_p3, %p3261_p4 }
 0x647   : > { %v2301_v38 = vadd.f32 %v2300_v46, %v2239_v36 }
 0x648   : > { %v2863_v40 = vpop.f32.mrf.mxu0 }
 0x649   : > { %v2314_v1 = vadd.f32 %v2648_v61, %v2301_v38 }
 0x64a   : > { %v2242_v14 = vpop.f32.mrf.mxu0 }
 0x64b   : > { %2318 = vst [vmem:[%s721_s11] sm:$0xff] %v2314_v1  ;;  %v2304_v41 = vadd.f32 %v2303_v0, %v2242_v14 }
 0x64c   : > { %v2864_v2 = vpop.f32.mrf.mxu0 }
 0x64d   : > { %v2315_v13 = vadd.f32 %v2648_v61, %v2304_v41 }
 0x64f   : > { %2319 = vst [vmem:[%s721_s11 + $0x8] sm:$0xff] %v2315_v13 }
 0x650   : > { %3271 = shalt.err (!%p3268_p7)
}
 0x651   : > { %s3272_s0 = scalar_lea.hbm %s4142_s15, 256  ;;  %s3276_s13 = scalar_lea.hbm %s4256_s1, 512 }
 0x652   : > { %p3273_p5 = scmp.ne.s32.totalorder %s4142_s15, %s3272_s0  ;;  %p3277_p0 = scmp.lt.s32.totalorder %s4142_s15, %s4256_s1 }
 0x653   : > { %p3278_p2 = scmp.lt.s32.totalorder %s3276_s13, %s3272_s0 }
 0x654   : > { %p3274_p8 = pnand %p3273_p5, %p4254_p11 }
 0x655   : > { %p3279_p9 = por %p3278_p2, %p3277_p0 }
 0x656   : > { %p3275_p12 = pneg %p3274_p8 }
 0x658   : > { %p3280_p13 = pnand %p3279_p9, %p3275_p12 }
 0x65a   : > { %3283 = shalt.err (!%p3280_p13)
}
 0x65b   : > { %2894 = dma.vmem_to_hbm [thread:$0]  (%p4254_p11), %s4135_s5, 256, %s4142_s15, %s2326_s30, %s3370_s19, %s3370_s19, %s3366_s20  }
 0x65c PF: > { %s4257_s18 = sld [smem:[#allocation25_spill]]  ;;  %p4260_p4 = scmp.ge.s32.totalorder %s3342_s27, 2 }
 0x65d   : > { %s4258_s11 = sld [smem:[#allocation29_spill]] }
 0x662   : > { %s2370_s14 = sand.u32 1, %s4257_s18  }
 0x663   : > { %p4259_p1 = scmp.ne.s32.totalorder %s4258_s11, 0  ;;  %s2371_s26 = scalar_lea.sflag [#allocation6], %s2370_s14 }
 0x665   : > { %p2918_p6 = pnand %p4260_p4, %p4259_p1 }
 0x667   : > { %p2919_p10 = pneg %p2918_p6 }
 0x669   : > { %3321 = dma.done.wait (%p2919_p10), %s2371_s26, 256  }
 0x66a   : > { %3323 = vsyncadd (%p2919_p10), %s2371_s26, 4294967040  ;;  %s2380_s7 = scalar_lea.sflag [#allocation17], %s2370_s14 }
 0x66b   : > { %3325 = dma.done.wait (%p2919_p10), %s2380_s7, 256  }
 0x66c   : > { %3327 = vsyncadd (%p2919_p10), %s2380_s7, 4294967040  ;;  %s4261_s27 = sld [smem:[#allocation27_spill]]  ;;  %s4264_s24 = smov %s3334_s25 }
 0x66d   : > { %s4262_s23 = sld [smem:[#allocation26_spill]] }
 0x66e   : > { %s4263_s26 = sld [smem:[#allocation28_spill]] }
 0x672   : > { %p39_p11 = scmp.ge.s32.totalorder %s4261_s27, 4  }
 0x673   : > { %s4265_s25 = smov %s4262_s23 }
 0x674   :  { %41 = sbr.rel (!%p39_p11) target bundleno = 22 (0x16), region = 187 }
 0x679   :  { %2385 = vsyncpa [#allocation5], 1 }
 0x67a   :  { %2387 = vsyncpa [#allocation5 + $0x1], 1 }
 0x67b   :  { %2388 = vsyncpa [#allocation8], 1 }
 0x67c   :  { %2390 = vsyncpa [#allocation8 + $0x1], 1 }
 0x67d   :  { %2391 = vsyncpa [#allocation11], 1 }
 0x67e   :  { %2392 = vsyncpa [#allocation14], 1 }
 0x67f   :  { %2393 = vsyncpa [#allocation6], 1 }
 0x680   :  { %2395 = vsyncpa [#allocation6 + $0x1], 1 }
 0x681   :  { %2396 = vsyncpa [#allocation17], 1 }
 0x682   :  { %2398 = vsyncpa [#allocation17 + $0x1], 1 }

</bundles_post_ra>
